<compile_context>
chip_gen: v7x
topology: tpu7x:2x2x1
jax: 0.10.0
libtpu: 0.0.40
codegen_flags: <defaults>
</compile_context>

<pallas_src>
import functools

import jax
import jax.numpy as jnp
from jax.experimental import pallas as pl
from jax.experimental.pallas import tpu as pltpu


def _round_up(x, m):
    return (x + m - 1) // m * m


# ---------------------------------------------------------------------------
# Kernel
# ---------------------------------------------------------------------------
def _seg_head_kernel(x_ref, qmask_ref, w1_ref, b1_ref, dw_ref, w2_ref, bo_ref,
                     o_ref, pbuf, *, Wp, LZpad):
    """One grid step = one batch image, both branches fused.

    x_ref     : (1, Cin, LX)       zero-padded canvas, flat, row stride Wp
    qmask_ref : (1, LPpad)         1.0 at interior positions of the 7x7-padded grid
    w1_ref    : (9, C2m, Cin)      fused 3x3 weights (BN1 scale folded), per tap
    b1_ref    : (C2m, 1)           BN1 bias (added before ReLU)
    dw_ref    : (C2m, 49)          depthwise 7x7 weights, taps flattened
    w2_ref    : (NCpad, C2m)       block-diagonal 1x1 weights, BN2 folded
    bo_ref    : (NCpad, 1)         1x1 bias (BN2 bias folded), zero pad rows
    o_ref     : (1, NCpad, LZpad)  lane/sublane-dense output
    pbuf      : VMEM (C2m, LPpad)  masked post-ReLU activations (7x7 input)
    """
    C2m, LPpad = pbuf.shape
    NCpad = o_ref.shape[1]

    # --- 1. fused 3x3 convs (both branches): 9 accumulating MXU matmuls on
    # lane-shifted views of the pre-padded canvas (no im2col scratch).
    y = jnp.zeros((C2m, LPpad), jnp.float32)
    for t in range(9):
        kh, kw = divmod(t, 3)
        off = kh * Wp + kw
        y = y + jnp.dot(w1_ref[t], x_ref[0, :, off:off + LPpad],
                        preferred_element_type=jnp.float32)

    # BN1 bias + ReLU, then zero the non-interior positions (single multiply by
    # a precomputed 0/1 mask) so the depthwise conv sees exact zero padding.
    pbuf[...] = jnp.maximum(y + b1_ref[...], 0.0) * qmask_ref[...]

    # --- 2. depthwise 7x7: 7 row-slabs x 7 lane shifts, f32 FMA accumulation.
    # One ref load per tap row keeps only one row of taps live at a time.
    dwv = dw_ref[...]                                     # (C2m, 49)
    z = jnp.zeros((C2m, LZpad), jnp.float32)
    for kh in range(7):
        slab = pbuf[:, kh * Wp: kh * Wp + LZpad + 6]      # (C2m, LZpad + 6)
        for kw in range(7):
            k = kh * 7 + kw
            z = z + slab[:, kw:kw + LZpad] * dwv[:, k:k + 1]

    # --- 3. fused block-diagonal 1x1 convs (BN2 folded) + bias.
    # (NCpad, LZpad) = (8, mult of 128): fully lane/sublane-dense store.
    out = jnp.dot(w2_ref[...], z, preferred_element_type=jnp.float32) + bo_ref[...]
    o_ref[...] = out.reshape(1, NCpad, LZpad).astype(o_ref.dtype)


# ---------------------------------------------------------------------------
# Wrapper
# ---------------------------------------------------------------------------
def seg_head_forward(x_nchw, fused):
    """Matches seg_head.forward: returns (seg_out, edge_out), both NCHW."""
    N, Cin, H, W = x_nchw.shape
    nc = fused["num_classes"]
    C2m = fused["w1t"].shape[1]
    NCpad = fused["w2t"].shape[0]

    Wp = W + 6                                  # canvas row stride
    LZ = H * Wp                                 # logical output length
    LZpad = _round_up(LZ, 128)                  # lane-dense output length
    LPpad = _round_up(6 * Wp + 6 + LZpad, 128)  # 7x7-padded activation length
    LXneed = LPpad + 2 * Wp + 2                 # canvas length the taps read
    LXtot = max(LXneed, (H + 10) * Wp)

    # Canvas construction (layout plumbing, done once by XLA): real pixels at
    # rows [4, 4+H), cols [4, 4+W) of a (H+10, Wp) grid, flattened, zero tail.
    xpad = jnp.pad(x_nchw, ((0, 0), (0, 0), (4, 6), (4, 2)))
    xflat = xpad.reshape(N, Cin, (H + 10) * Wp)
    xflat = jnp.pad(xflat, ((0, 0), (0, 0), (0, LXtot - (H + 10) * Wp)))

    # Interior mask of the 7x7-padded grid (rows [3,3+H), cols [3,3+W)).
    pidx = jnp.arange(LPpad, dtype=jnp.int32)
    r, c = pidx // Wp, pidx % Wp
    qmask = (((r >= 3) & (r < 3 + H) & (c >= 3) & (c < 3 + W))
             .astype(jnp.float32))[None, :]

    kernel = functools.partial(_seg_head_kernel, Wp=Wp, LZpad=LZpad)
    out_flat = pl.pallas_call(
        kernel,
        out_shape=jax.ShapeDtypeStruct((N, NCpad, LZpad), jnp.float32),
        grid_spec=pltpu.PrefetchScalarGridSpec(
            num_scalar_prefetch=0,
            grid=(N,),
            in_specs=[
                pl.BlockSpec((1, Cin, LXtot), lambda n: (n, 0, 0)),
                pl.BlockSpec((1, LPpad), lambda n: (0, 0)),
                pl.BlockSpec((9, C2m, Cin), lambda n: (0, 0, 0)),
                pl.BlockSpec((C2m, 1), lambda n: (0, 0)),
                pl.BlockSpec((C2m, 49), lambda n: (0, 0)),
                pl.BlockSpec((NCpad, C2m), lambda n: (0, 0)),
                pl.BlockSpec((NCpad, 1), lambda n: (0, 0)),
            ],
            out_specs=pl.BlockSpec((1, NCpad, LZpad), lambda n: (n, 0, 0)),
            scratch_shapes=[
                pltpu.VMEM((C2m, LPpad), jnp.float32),
            ],
        ),
        compiler_params=pltpu.CompilerParams(
            dimension_semantics=("parallel",),
            vmem_limit_bytes=32 * 1024 * 1024,
        ),
    )(xflat, qmask, fused["w1t"], fused["b1"], fused["dw"],
      fused["w2t"], fused["bo"])

    # Cheap XLA epilogue: drop padded lanes, stride-gap columns and pad channels.
    out = out_flat[:, :, :LZ].reshape(N, NCpad, H, Wp)[:, :, :, :W]
    return out[:, :nc], out[:, nc:2 * nc]


# ---------------------------------------------------------------------------
# Parameters (synthetic, eval-mode BatchNorm) + folding / branch fusion
# ---------------------------------------------------------------------------
def init_branch_params(key, cin, cmid, nc):
    ks = jax.random.split(key, 12)
    w1 = 0.1 * jax.random.normal(ks[0], (3, 3, cin, cmid), jnp.float32)
    g1 = 1.0 + 0.1 * jax.random.normal(ks[1], (cmid,), jnp.float32)
    be1 = 0.1 * jax.random.normal(ks[2], (cmid,), jnp.float32)
    m1 = 0.1 * jax.random.normal(ks[3], (cmid,), jnp.float32)
    v1 = jax.random.uniform(ks[4], (cmid,), jnp.float32, 0.5, 1.5)
    s1 = g1 / jnp.sqrt(v1 + 1e-5)              # BatchNorm2d default eps
    b1 = be1 - m1 * s1
    dw = 0.1 * jax.random.normal(ks[5], (7, 7, cmid), jnp.float32)
    g2 = 1.0 + 0.1 * jax.random.normal(ks[6], (cmid,), jnp.float32)
    be2 = 0.1 * jax.random.normal(ks[7], (cmid,), jnp.float32)
    m2 = 0.1 * jax.random.normal(ks[8], (cmid,), jnp.float32)
    v2 = jax.random.uniform(ks[9], (cmid,), jnp.float32, 0.5, 1.5)
    s2 = g2 / jnp.sqrt(v2 + 1e-6)              # activation.bn uses eps=1e-6
    b2 = be2 - m2 * s2
    w2 = 0.1 * jax.random.normal(ks[10], (cmid, nc), jnp.float32)
    bo = 0.1 * jax.random.normal(ks[11], (nc,), jnp.float32)
    return {"w1": w1, "s1": s1, "b1": b1, "dw": dw, "s2": s2, "b2": b2,
            "w2": w2, "bo": bo}


def _fold_branch(p):
    """Fold the two eval-mode BatchNorms into the adjacent linear convs."""
    cin = p["w1"].shape[2]
    cmid = p["w1"].shape[3]
    # BN1 scale into the 3x3 conv; kernel-ready per-tap layout (9, Cmid, Cin).
    w1s = p["w1"] * p["s1"][None, None, None, :]
    w1t = jnp.transpose(w1s, (0, 1, 3, 2)).reshape(9, cmid, cin)
    # Depthwise weights, channel-major, taps flattened to 49.
    dwc = jnp.transpose(p["dw"], (2, 0, 1)).reshape(cmid, 49)
    # BN2 folded into the 1x1 conv.
    w2s = p["s2"][:, None] * p["w2"]
    bos = p["bo"] + p["b2"] @ p["w2"]
    return w1t, p["b1"], dwc, w2s, bos


def prepare_fused_params(seg_p, edge_p):
    """Concatenate the two branches along the channel axes for one kernel."""
    w1_s, b1_s, dw_s, w2_s, bo_s = _fold_branch(seg_p)
    w1_e, b1_e, dw_e, w2_e, bo_e = _fold_branch(edge_p)
    cmid, nc = w2_s.shape
    c2m = 2 * cmid
    ncpad = _round_up(2 * nc, 8)                            # sublane-dense out
    w1t = jnp.concatenate([w1_s, w1_e], axis=1)             # (9, 2Cmid, Cin)
    b1 = jnp.concatenate([b1_s, b1_e], axis=0)[:, None]     # (2Cmid, 1)
    dwc = jnp.concatenate([dw_s, dw_e], axis=0)             # (2Cmid, 49)
    w2t = jnp.zeros((ncpad, c2m), jnp.float32)               # block-diagonal
    w2t = w2t.at[:nc, :cmid].set(w2_s.T)
    w2t = w2t.at[nc:2 * nc, cmid:].set(w2_e.T)
    bo = jnp.zeros((ncpad, 1), jnp.float32)
    bo = bo.at[:2 * nc, 0].set(jnp.concatenate([bo_s, bo_e]))
    return {"w1t": w1t, "b1": b1, "dw": dwc, "w2t": w2t, "bo": bo,
            "num_classes": nc}


# ---------------------------------------------------------------------------
# Pure-JAX reference (un-folded parameters) for the correctness check
# ---------------------------------------------------------------------------
def _branch_ref(x_nhwc, p):
    y = jax.lax.conv_general_dilated(
        x_nhwc, p["w1"], (1, 1), ((1, 1), (1, 1)),
        dimension_numbers=("NHWC", "HWIO", "NHWC"))
    y = jnp.maximum(y * p["s1"] + p["b1"], 0.0)
    cmid = p["dw"].shape[2]
    z = jax.lax.conv_general_dilated(
        y, p["dw"][:, :, None, :], (1, 1), ((3, 3), (3, 3)),
        dimension_numbers=("NHWC", "HWIO", "NHWC"),
        feature_group_count=cmid)
    z = z * p["s2"] + p["b2"]
    return jnp.einsum("nhwc,cd->nhwd", z, p["w2"]) + p["bo"]


if __name__ == "__main__":
    key = jax.random.PRNGKey(0)
    N, Cin, H, W = 2, 8, 16, 16
    num_classes = 3
    Cmid = Cin // 2

    kx, kseg, kedge = jax.random.split(key, 3)
    x_nchw = jax.random.normal(kx, (N, Cin, H, W), jnp.float32)
    seg_p = init_branch_params(kseg, Cin, Cmid, num_classes)
    edge_p = init_branch_params(kedge, Cin, Cmid, num_classes)
    fused = prepare_fused_params(seg_p, edge_p)

    seg_out, edge_out = seg_head_forward(x_nchw, fused)
    jax.block_until_ready((seg_out, edge_out))

    # correctness check against a pure-JAX reference
    x_nhwc = jnp.transpose(x_nchw, (0, 2, 3, 1))
    seg_ref = jnp.transpose(_branch_ref(x_nhwc, seg_p), (0, 3, 1, 2))
    edge_ref = jnp.transpose(_branch_ref(x_nhwc, edge_p), (0, 3, 1, 2))
    assert seg_out.shape == (N, num_classes, H, W)
    assert edge_out.shape == (N, num_classes, H, W)
    assert jnp.allclose(seg_out, seg_ref, atol=2e-4, rtol=2e-4)
    assert jnp.allclose(edge_out, edge_ref, atol=2e-4, rtol=2e-4)
    print("KERNEL_OK")
</pallas_src>

<mosaic_0001>
module attributes {stable_mosaic.version = 11 : i64} {
  func.func @_seg_head_kernel(%arg0: i32, %arg1: memref<1x8x686xf32, #tpu.memory_space<vmem>>, %arg2: memref<1x640xf32, #tpu.memory_space<vmem>>, %arg3: memref<9x8x8xf32, #tpu.memory_space<vmem>>, %arg4: memref<8x1xf32, #tpu.memory_space<vmem>>, %arg5: memref<8x49xf32, #tpu.memory_space<vmem>>, %arg6: memref<8x8xf32, #tpu.memory_space<vmem>>, %arg7: memref<8x1xf32, #tpu.memory_space<vmem>>, %arg8: memref<1x8x384xf32, #tpu.memory_space<vmem>>, %arg9: memref<8x640xf32, #tpu.memory_space<vmem>>) attributes {dimension_semantics = [#tpu.dimension_semantics<parallel>], iteration_bounds = array<i64: 2>, scalar_prefetch = 0 : i64, scratch_operands = 1 : i64, tpu.core_type = #tpu.core_type<tc>, window_params = [{transform_indices = @transform_0, window_bounds = array<i64: 1, 8, 686>}, {pipeline_mode = #tpu.pipeline_mode<synchronous>, transform_indices = @transform_1, window_bounds = array<i64: 1, 640>}, {pipeline_mode = #tpu.pipeline_mode<synchronous>, transform_indices = @transform_2, window_bounds = array<i64: 9, 8, 8>}, {pipeline_mode = #tpu.pipeline_mode<synchronous>, transform_indices = @transform_3, window_bounds = array<i64: 8, 1>}, {pipeline_mode = #tpu.pipeline_mode<synchronous>, transform_indices = @transform_4, window_bounds = array<i64: 8, 49>}, {pipeline_mode = #tpu.pipeline_mode<synchronous>, transform_indices = @transform_5, window_bounds = array<i64: 8, 8>}, {pipeline_mode = #tpu.pipeline_mode<synchronous>, transform_indices = @transform_6, window_bounds = array<i64: 8, 1>}, {transform_indices = @transform_7, window_bounds = array<i64: 1, 8, 384>}]} {
    %cst = arith.constant 0.000000e+00 : f32
    %0 = vector.broadcast %cst : f32 to vector<8x640xf32>
    %c0 = arith.constant 0 : index
    %c0_0 = arith.constant 0 : index
    %c0_1 = arith.constant 0 : index
    %1 = vector.load %arg3[%c0, %c0_0, %c0_1] : memref<9x8x8xf32, #tpu.memory_space<vmem>>, vector<1x8x8xf32>
    %2 = vector.shape_cast %1 : vector<1x8x8xf32> to vector<8x8xf32>
    %c0_2 = arith.constant 0 : index
    %c0_3 = arith.constant 0 : index
    %c0_4 = arith.constant 0 : index
    %3 = vector.load %arg1[%c0_2, %c0_3, %c0_4] : memref<1x8x686xf32, #tpu.memory_space<vmem>>, vector<1x8x640xf32>
    %4 = vector.shape_cast %3 : vector<1x8x640xf32> to vector<8x640xf32>
    %cst_5 = arith.constant dense<0.000000e+00> : vector<8x640xf32>
    %5 = tpu.matmul %2, %4, %cst_5 {dimension_numbers = #tpu.dot_dimension_numbers<[1], [0], [0], [1], [0, 0, 1, 1], [], []>} : vector<8x8xf32>, vector<8x640xf32>, vector<8x640xf32> -> vector<8x640xf32>
    %6 = arith.addf %0, %5 : vector<8x640xf32>
    %c1 = arith.constant 1 : index
    %c0_6 = arith.constant 0 : index
    %c0_7 = arith.constant 0 : index
    %7 = vector.load %arg3[%c1, %c0_6, %c0_7] : memref<9x8x8xf32, #tpu.memory_space<vmem>>, vector<1x8x8xf32>
    %8 = vector.shape_cast %7 : vector<1x8x8xf32> to vector<8x8xf32>
    %c0_8 = arith.constant 0 : index
    %c0_9 = arith.constant 0 : index
    %c1_10 = arith.constant 1 : index
    %9 = vector.load %arg1[%c0_8, %c0_9, %c1_10] : memref<1x8x686xf32, #tpu.memory_space<vmem>>, vector<1x8x640xf32>
    %10 = vector.shape_cast %9 : vector<1x8x640xf32> to vector<8x640xf32>
    %cst_11 = arith.constant dense<0.000000e+00> : vector<8x640xf32>
    %11 = tpu.matmul %8, %10, %cst_11 {dimension_numbers = #tpu.dot_dimension_numbers<[1], [0], [0], [1], [0, 0, 1, 1], [], []>} : vector<8x8xf32>, vector<8x640xf32>, vector<8x640xf32> -> vector<8x640xf32>
    %12 = arith.addf %6, %11 : vector<8x640xf32>
    %c2 = arith.constant 2 : index
    %c0_12 = arith.constant 0 : index
    %c0_13 = arith.constant 0 : index
    %13 = vector.load %arg3[%c2, %c0_12, %c0_13] : memref<9x8x8xf32, #tpu.memory_space<vmem>>, vector<1x8x8xf32>
    %14 = vector.shape_cast %13 : vector<1x8x8xf32> to vector<8x8xf32>
    %c0_14 = arith.constant 0 : index
    %c0_15 = arith.constant 0 : index
    %c2_16 = arith.constant 2 : index
    %15 = vector.load %arg1[%c0_14, %c0_15, %c2_16] : memref<1x8x686xf32, #tpu.memory_space<vmem>>, vector<1x8x640xf32>
    %16 = vector.shape_cast %15 : vector<1x8x640xf32> to vector<8x640xf32>
    %cst_17 = arith.constant dense<0.000000e+00> : vector<8x640xf32>
    %17 = tpu.matmul %14, %16, %cst_17 {dimension_numbers = #tpu.dot_dimension_numbers<[1], [0], [0], [1], [0, 0, 1, 1], [], []>} : vector<8x8xf32>, vector<8x640xf32>, vector<8x640xf32> -> vector<8x640xf32>
    %18 = arith.addf %12, %17 : vector<8x640xf32>
    %c3 = arith.constant 3 : index
    %c0_18 = arith.constant 0 : index
    %c0_19 = arith.constant 0 : index
    %19 = vector.load %arg3[%c3, %c0_18, %c0_19] : memref<9x8x8xf32, #tpu.memory_space<vmem>>, vector<1x8x8xf32>
    %20 = vector.shape_cast %19 : vector<1x8x8xf32> to vector<8x8xf32>
    %c0_20 = arith.constant 0 : index
    %c0_21 = arith.constant 0 : index
    %c22 = arith.constant 22 : index
    %21 = vector.load %arg1[%c0_20, %c0_21, %c22] : memref<1x8x686xf32, #tpu.memory_space<vmem>>, vector<1x8x640xf32>
    %22 = vector.shape_cast %21 : vector<1x8x640xf32> to vector<8x640xf32>
    %cst_22 = arith.constant dense<0.000000e+00> : vector<8x640xf32>
    %23 = tpu.matmul %20, %22, %cst_22 {dimension_numbers = #tpu.dot_dimension_numbers<[1], [0], [0], [1], [0, 0, 1, 1], [], []>} : vector<8x8xf32>, vector<8x640xf32>, vector<8x640xf32> -> vector<8x640xf32>
    %24 = arith.addf %18, %23 : vector<8x640xf32>
    %c4 = arith.constant 4 : index
    %c0_23 = arith.constant 0 : index
    %c0_24 = arith.constant 0 : index
    %25 = vector.load %arg3[%c4, %c0_23, %c0_24] : memref<9x8x8xf32, #tpu.memory_space<vmem>>, vector<1x8x8xf32>
    %26 = vector.shape_cast %25 : vector<1x8x8xf32> to vector<8x8xf32>
    %c0_25 = arith.constant 0 : index
    %c0_26 = arith.constant 0 : index
    %c23 = arith.constant 23 : index
    %27 = vector.load %arg1[%c0_25, %c0_26, %c23] : memref<1x8x686xf32, #tpu.memory_space<vmem>>, vector<1x8x640xf32>
    %28 = vector.shape_cast %27 : vector<1x8x640xf32> to vector<8x640xf32>
    %cst_27 = arith.constant dense<0.000000e+00> : vector<8x640xf32>
    %29 = tpu.matmul %26, %28, %cst_27 {dimension_numbers = #tpu.dot_dimension_numbers<[1], [0], [0], [1], [0, 0, 1, 1], [], []>} : vector<8x8xf32>, vector<8x640xf32>, vector<8x640xf32> -> vector<8x640xf32>
    %30 = arith.addf %24, %29 : vector<8x640xf32>
    %c5 = arith.constant 5 : index
    %c0_28 = arith.constant 0 : index
    %c0_29 = arith.constant 0 : index
    %31 = vector.load %arg3[%c5, %c0_28, %c0_29] : memref<9x8x8xf32, #tpu.memory_space<vmem>>, vector<1x8x8xf32>
    %32 = vector.shape_cast %31 : vector<1x8x8xf32> to vector<8x8xf32>
    %c0_30 = arith.constant 0 : index
    %c0_31 = arith.constant 0 : index
    %c24 = arith.constant 24 : index
    %33 = vector.load %arg1[%c0_30, %c0_31, %c24] : memref<1x8x686xf32, #tpu.memory_space<vmem>>, vector<1x8x640xf32>
    %34 = vector.shape_cast %33 : vector<1x8x640xf32> to vector<8x640xf32>
    %cst_32 = arith.constant dense<0.000000e+00> : vector<8x640xf32>
    %35 = tpu.matmul %32, %34, %cst_32 {dimension_numbers = #tpu.dot_dimension_numbers<[1], [0], [0], [1], [0, 0, 1, 1], [], []>} : vector<8x8xf32>, vector<8x640xf32>, vector<8x640xf32> -> vector<8x640xf32>
    %36 = arith.addf %30, %35 : vector<8x640xf32>
    %c6 = arith.constant 6 : index
    %c0_33 = arith.constant 0 : index
    %c0_34 = arith.constant 0 : index
    %37 = vector.load %arg3[%c6, %c0_33, %c0_34] : memref<9x8x8xf32, #tpu.memory_space<vmem>>, vector<1x8x8xf32>
    %38 = vector.shape_cast %37 : vector<1x8x8xf32> to vector<8x8xf32>
    %c0_35 = arith.constant 0 : index
    %c0_36 = arith.constant 0 : index
    %c44 = arith.constant 44 : index
    %39 = vector.load %arg1[%c0_35, %c0_36, %c44] : memref<1x8x686xf32, #tpu.memory_space<vmem>>, vector<1x8x640xf32>
    %40 = vector.shape_cast %39 : vector<1x8x640xf32> to vector<8x640xf32>
    %cst_37 = arith.constant dense<0.000000e+00> : vector<8x640xf32>
    %41 = tpu.matmul %38, %40, %cst_37 {dimension_numbers = #tpu.dot_dimension_numbers<[1], [0], [0], [1], [0, 0, 1, 1], [], []>} : vector<8x8xf32>, vector<8x640xf32>, vector<8x640xf32> -> vector<8x640xf32>
    %42 = arith.addf %36, %41 : vector<8x640xf32>
    %c7 = arith.constant 7 : index
    %c0_38 = arith.constant 0 : index
    %c0_39 = arith.constant 0 : index
    %43 = vector.load %arg3[%c7, %c0_38, %c0_39] : memref<9x8x8xf32, #tpu.memory_space<vmem>>, vector<1x8x8xf32>
    %44 = vector.shape_cast %43 : vector<1x8x8xf32> to vector<8x8xf32>
    %c0_40 = arith.constant 0 : index
    %c0_41 = arith.constant 0 : index
    %c45 = arith.constant 45 : index
    %45 = vector.load %arg1[%c0_40, %c0_41, %c45] : memref<1x8x686xf32, #tpu.memory_space<vmem>>, vector<1x8x640xf32>
    %46 = vector.shape_cast %45 : vector<1x8x640xf32> to vector<8x640xf32>
    %cst_42 = arith.constant dense<0.000000e+00> : vector<8x640xf32>
    %47 = tpu.matmul %44, %46, %cst_42 {dimension_numbers = #tpu.dot_dimension_numbers<[1], [0], [0], [1], [0, 0, 1, 1], [], []>} : vector<8x8xf32>, vector<8x640xf32>, vector<8x640xf32> -> vector<8x640xf32>
    %48 = arith.addf %42, %47 : vector<8x640xf32>
    %c8 = arith.constant 8 : index
    %c0_43 = arith.constant 0 : index
    %c0_44 = arith.constant 0 : index
    %49 = vector.load %arg3[%c8, %c0_43, %c0_44] : memref<9x8x8xf32, #tpu.memory_space<vmem>>, vector<1x8x8xf32>
    %50 = vector.shape_cast %49 : vector<1x8x8xf32> to vector<8x8xf32>
    %c0_45 = arith.constant 0 : index
    %c0_46 = arith.constant 0 : index
    %c46 = arith.constant 46 : index
    %51 = vector.load %arg1[%c0_45, %c0_46, %c46] : memref<1x8x686xf32, #tpu.memory_space<vmem>>, vector<1x8x640xf32>
    %52 = vector.shape_cast %51 : vector<1x8x640xf32> to vector<8x640xf32>
    %cst_47 = arith.constant dense<0.000000e+00> : vector<8x640xf32>
    %53 = tpu.matmul %50, %52, %cst_47 {dimension_numbers = #tpu.dot_dimension_numbers<[1], [0], [0], [1], [0, 0, 1, 1], [], []>} : vector<8x8xf32>, vector<8x640xf32>, vector<8x640xf32> -> vector<8x640xf32>
    %54 = arith.addf %48, %53 : vector<8x640xf32>
    %c0_48 = arith.constant 0 : index
    %c0_49 = arith.constant 0 : index
    %55 = vector.load %arg4[%c0_48, %c0_49] : memref<8x1xf32, #tpu.memory_space<vmem>>, vector<8x1xf32>
    %56 = vector.broadcast %55 : vector<8x1xf32> to vector<8x640xf32>
    %57 = arith.addf %54, %56 : vector<8x640xf32>
    %cst_50 = arith.constant 0.000000e+00 : f32
    %58 = vector.broadcast %cst_50 : f32 to vector<8x640xf32>
    %59 = arith.maximumf %57, %58 : vector<8x640xf32>
    %c0_51 = arith.constant 0 : index
    %c0_52 = arith.constant 0 : index
    %60 = vector.load %arg2[%c0_51, %c0_52] : memref<1x640xf32, #tpu.memory_space<vmem>>, vector<1x640xf32>
    %61 = vector.broadcast %60 : vector<1x640xf32> to vector<8x640xf32>
    %62 = arith.mulf %59, %61 : vector<8x640xf32>
    %c0_53 = arith.constant 0 : index
    %c0_54 = arith.constant 0 : index
    %63 = vector.load %arg9[%c0_53, %c0_54] : memref<8x640xf32, #tpu.memory_space<vmem>>, vector<8x640xf32>
    tpu.vector_store %arg9[%c0_53, %c0_54], %62 {strides = array<i32>} : memref<8x640xf32, #tpu.memory_space<vmem>>, vector<8x640xf32>,
    %c0_55 = arith.constant 0 : index
    %c0_56 = arith.constant 0 : index
    %64 = vector.load %arg5[%c0_55, %c0_56] : memref<8x49xf32, #tpu.memory_space<vmem>>, vector<8x49xf32>
    %cst_57 = arith.constant 0.000000e+00 : f32
    %65 = vector.broadcast %cst_57 : f32 to vector<8x384xf32>
    %c0_58 = arith.constant 0 : index
    %c0_59 = arith.constant 0 : index
    %66 = vector.load %arg9[%c0_58, %c0_59] : memref<8x640xf32, #tpu.memory_space<vmem>>, vector<8x390xf32>
    %67 = vector.extract_strided_slice %66 {offsets = [0, 0], sizes = [8, 384], strides = [1, 1]} : vector<8x390xf32> to vector<8x384xf32>
    %68 = vector.extract_strided_slice %64 {offsets = [0, 0], sizes = [8, 1], strides = [1, 1]} : vector<8x49xf32> to vector<8x1xf32>
    %69 = vector.broadcast %68 : vector<8x1xf32> to vector<8x384xf32>
    %70 = arith.mulf %67, %69 : vector<8x384xf32>
    %71 = arith.addf %65, %70 : vector<8x384xf32>
    %72 = vector.extract_strided_slice %66 {offsets = [0, 1], sizes = [8, 384], strides = [1, 1]} : vector<8x390xf32> to vector<8x384xf32>
    %73 = vector.extract_strided_slice %64 {offsets = [0, 1], sizes = [8, 1], strides = [1, 1]} : vector<8x49xf32> to vector<8x1xf32>
    %74 = vector.broadcast %73 : vector<8x1xf32> to vector<8x384xf32>
    %75 = arith.mulf %72, %74 : vector<8x384xf32>
    %76 = arith.addf %71, %75 : vector<8x384xf32>
    %77 = vector.extract_strided_slice %66 {offsets = [0, 2], sizes = [8, 384], strides = [1, 1]} : vector<8x390xf32> to vector<8x384xf32>
    %78 = vector.extract_strided_slice %64 {offsets = [0, 2], sizes = [8, 1], strides = [1, 1]} : vector<8x49xf32> to vector<8x1xf32>
    %79 = vector.broadcast %78 : vector<8x1xf32> to vector<8x384xf32>
    %80 = arith.mulf %77, %79 : vector<8x384xf32>
    %81 = arith.addf %76, %80 : vector<8x384xf32>
    %82 = vector.extract_strided_slice %66 {offsets = [0, 3], sizes = [8, 384], strides = [1, 1]} : vector<8x390xf32> to vector<8x384xf32>
    %83 = vector.extract_strided_slice %64 {offsets = [0, 3], sizes = [8, 1], strides = [1, 1]} : vector<8x49xf32> to vector<8x1xf32>
    %84 = vector.broadcast %83 : vector<8x1xf32> to vector<8x384xf32>
    %85 = arith.mulf %82, %84 : vector<8x384xf32>
    %86 = arith.addf %81, %85 : vector<8x384xf32>
    %87 = vector.extract_strided_slice %66 {offsets = [0, 4], sizes = [8, 384], strides = [1, 1]} : vector<8x390xf32> to vector<8x384xf32>
    %88 = vector.extract_strided_slice %64 {offsets = [0, 4], sizes = [8, 1], strides = [1, 1]} : vector<8x49xf32> to vector<8x1xf32>
    %89 = vector.broadcast %88 : vector<8x1xf32> to vector<8x384xf32>
    %90 = arith.mulf %87, %89 : vector<8x384xf32>
    %91 = arith.addf %86, %90 : vector<8x384xf32>
    %92 = vector.extract_strided_slice %66 {offsets = [0, 5], sizes = [8, 384], strides = [1, 1]} : vector<8x390xf32> to vector<8x384xf32>
    %93 = vector.extract_strided_slice %64 {offsets = [0, 5], sizes = [8, 1], strides = [1, 1]} : vector<8x49xf32> to vector<8x1xf32>
    %94 = vector.broadcast %93 : vector<8x1xf32> to vector<8x384xf32>
    %95 = arith.mulf %92, %94 : vector<8x384xf32>
    %96 = arith.addf %91, %95 : vector<8x384xf32>
    %97 = vector.extract_strided_slice %66 {offsets = [0, 6], sizes = [8, 384], strides = [1, 1]} : vector<8x390xf32> to vector<8x384xf32>
    %98 = vector.extract_strided_slice %64 {offsets = [0, 6], sizes = [8, 1], strides = [1, 1]} : vector<8x49xf32> to vector<8x1xf32>
    %99 = vector.broadcast %98 : vector<8x1xf32> to vector<8x384xf32>
    %100 = arith.mulf %97, %99 : vector<8x384xf32>
    %101 = arith.addf %96, %100 : vector<8x384xf32>
    %c0_60 = arith.constant 0 : index
    %c22_61 = arith.constant 22 : index
    %102 = vector.load %arg9[%c0_60, %c22_61] : memref<8x640xf32, #tpu.memory_space<vmem>>, vector<8x390xf32>
    %103 = vector.extract_strided_slice %102 {offsets = [0, 0], sizes = [8, 384], strides = [1, 1]} : vector<8x390xf32> to vector<8x384xf32>
    %104 = vector.extract_strided_slice %64 {offsets = [0, 7], sizes = [8, 1], strides = [1, 1]} : vector<8x49xf32> to vector<8x1xf32>
    %105 = vector.broadcast %104 : vector<8x1xf32> to vector<8x384xf32>
    %106 = arith.mulf %103, %105 : vector<8x384xf32>
    %107 = arith.addf %101, %106 : vector<8x384xf32>
    %108 = vector.extract_strided_slice %102 {offsets = [0, 1], sizes = [8, 384], strides = [1, 1]} : vector<8x390xf32> to vector<8x384xf32>
    %109 = vector.extract_strided_slice %64 {offsets = [0, 8], sizes = [8, 1], strides = [1, 1]} : vector<8x49xf32> to vector<8x1xf32>
    %110 = vector.broadcast %109 : vector<8x1xf32> to vector<8x384xf32>
    %111 = arith.mulf %108, %110 : vector<8x384xf32>
    %112 = arith.addf %107, %111 : vector<8x384xf32>
    %113 = vector.extract_strided_slice %102 {offsets = [0, 2], sizes = [8, 384], strides = [1, 1]} : vector<8x390xf32> to vector<8x384xf32>
    %114 = vector.extract_strided_slice %64 {offsets = [0, 9], sizes = [8, 1], strides = [1, 1]} : vector<8x49xf32> to vector<8x1xf32>
    %115 = vector.broadcast %114 : vector<8x1xf32> to vector<8x384xf32>
    %116 = arith.mulf %113, %115 : vector<8x384xf32>
    %117 = arith.addf %112, %116 : vector<8x384xf32>
    %118 = vector.extract_strided_slice %102 {offsets = [0, 3], sizes = [8, 384], strides = [1, 1]} : vector<8x390xf32> to vector<8x384xf32>
    %119 = vector.extract_strided_slice %64 {offsets = [0, 10], sizes = [8, 1], strides = [1, 1]} : vector<8x49xf32> to vector<8x1xf32>
    %120 = vector.broadcast %119 : vector<8x1xf32> to vector<8x384xf32>
    %121 = arith.mulf %118, %120 : vector<8x384xf32>
    %122 = arith.addf %117, %121 : vector<8x384xf32>
    %123 = vector.extract_strided_slice %102 {offsets = [0, 4], sizes = [8, 384], strides = [1, 1]} : vector<8x390xf32> to vector<8x384xf32>
    %124 = vector.extract_strided_slice %64 {offsets = [0, 11], sizes = [8, 1], strides = [1, 1]} : vector<8x49xf32> to vector<8x1xf32>
    %125 = vector.broadcast %124 : vector<8x1xf32> to vector<8x384xf32>
    %126 = arith.mulf %123, %125 : vector<8x384xf32>
    %127 = arith.addf %122, %126 : vector<8x384xf32>
    %128 = vector.extract_strided_slice %102 {offsets = [0, 5], sizes = [8, 384], strides = [1, 1]} : vector<8x390xf32> to vector<8x384xf32>
    %129 = vector.extract_strided_slice %64 {offsets = [0, 12], sizes = [8, 1], strides = [1, 1]} : vector<8x49xf32> to vector<8x1xf32>
    %130 = vector.broadcast %129 : vector<8x1xf32> to vector<8x384xf32>
    %131 = arith.mulf %128, %130 : vector<8x384xf32>
    %132 = arith.addf %127, %131 : vector<8x384xf32>
    %133 = vector.extract_strided_slice %102 {offsets = [0, 6], sizes = [8, 384], strides = [1, 1]} : vector<8x390xf32> to vector<8x384xf32>
    %134 = vector.extract_strided_slice %64 {offsets = [0, 13], sizes = [8, 1], strides = [1, 1]} : vector<8x49xf32> to vector<8x1xf32>
    %135 = vector.broadcast %134 : vector<8x1xf32> to vector<8x384xf32>
    %136 = arith.mulf %133, %135 : vector<8x384xf32>
    %137 = arith.addf %132, %136 : vector<8x384xf32>
    %c0_62 = arith.constant 0 : index
    %c44_63 = arith.constant 44 : index
    %138 = vector.load %arg9[%c0_62, %c44_63] : memref<8x640xf32, #tpu.memory_space<vmem>>, vector<8x390xf32>
    %139 = vector.extract_strided_slice %138 {offsets = [0, 0], sizes = [8, 384], strides = [1, 1]} : vector<8x390xf32> to vector<8x384xf32>
    %140 = vector.extract_strided_slice %64 {offsets = [0, 14], sizes = [8, 1], strides = [1, 1]} : vector<8x49xf32> to vector<8x1xf32>
    %141 = vector.broadcast %140 : vector<8x1xf32> to vector<8x384xf32>
    %142 = arith.mulf %139, %141 : vector<8x384xf32>
    %143 = arith.addf %137, %142 : vector<8x384xf32>
    %144 = vector.extract_strided_slice %138 {offsets = [0, 1], sizes = [8, 384], strides = [1, 1]} : vector<8x390xf32> to vector<8x384xf32>
    %145 = vector.extract_strided_slice %64 {offsets = [0, 15], sizes = [8, 1], strides = [1, 1]} : vector<8x49xf32> to vector<8x1xf32>
    %146 = vector.broadcast %145 : vector<8x1xf32> to vector<8x384xf32>
    %147 = arith.mulf %144, %146 : vector<8x384xf32>
    %148 = arith.addf %143, %147 : vector<8x384xf32>
    %149 = vector.extract_strided_slice %138 {offsets = [0, 2], sizes = [8, 384], strides = [1, 1]} : vector<8x390xf32> to vector<8x384xf32>
    %150 = vector.extract_strided_slice %64 {offsets = [0, 16], sizes = [8, 1], strides = [1, 1]} : vector<8x49xf32> to vector<8x1xf32>
    %151 = vector.broadcast %150 : vector<8x1xf32> to vector<8x384xf32>
    %152 = arith.mulf %149, %151 : vector<8x384xf32>
    %153 = arith.addf %148, %152 : vector<8x384xf32>
    %154 = vector.extract_strided_slice %138 {offsets = [0, 3], sizes = [8, 384], strides = [1, 1]} : vector<8x390xf32> to vector<8x384xf32>
    %155 = vector.extract_strided_slice %64 {offsets = [0, 17], sizes = [8, 1], strides = [1, 1]} : vector<8x49xf32> to vector<8x1xf32>
    %156 = vector.broadcast %155 : vector<8x1xf32> to vector<8x384xf32>
    %157 = arith.mulf %154, %156 : vector<8x384xf32>
    %158 = arith.addf %153, %157 : vector<8x384xf32>
    %159 = vector.extract_strided_slice %138 {offsets = [0, 4], sizes = [8, 384], strides = [1, 1]} : vector<8x390xf32> to vector<8x384xf32>
    %160 = vector.extract_strided_slice %64 {offsets = [0, 18], sizes = [8, 1], strides = [1, 1]} : vector<8x49xf32> to vector<8x1xf32>
    %161 = vector.broadcast %160 : vector<8x1xf32> to vector<8x384xf32>
    %162 = arith.mulf %159, %161 : vector<8x384xf32>
    %163 = arith.addf %158, %162 : vector<8x384xf32>
    %164 = vector.extract_strided_slice %138 {offsets = [0, 5], sizes = [8, 384], strides = [1, 1]} : vector<8x390xf32> to vector<8x384xf32>
    %165 = vector.extract_strided_slice %64 {offsets = [0, 19], sizes = [8, 1], strides = [1, 1]} : vector<8x49xf32> to vector<8x1xf32>
    %166 = vector.broadcast %165 : vector<8x1xf32> to vector<8x384xf32>
    %167 = arith.mulf %164, %166 : vector<8x384xf32>
    %168 = arith.addf %163, %167 : vector<8x384xf32>
    %169 = vector.extract_strided_slice %138 {offsets = [0, 6], sizes = [8, 384], strides = [1, 1]} : vector<8x390xf32> to vector<8x384xf32>
    %170 = vector.extract_strided_slice %64 {offsets = [0, 20], sizes = [8, 1], strides = [1, 1]} : vector<8x49xf32> to vector<8x1xf32>
    %171 = vector.broadcast %170 : vector<8x1xf32> to vector<8x384xf32>
    %172 = arith.mulf %169, %171 : vector<8x384xf32>
    %173 = arith.addf %168, %172 : vector<8x384xf32>
    %c0_64 = arith.constant 0 : index
    %c66 = arith.constant 66 : index
    %174 = vector.load %arg9[%c0_64, %c66] : memref<8x640xf32, #tpu.memory_space<vmem>>, vector<8x390xf32>
    %175 = vector.extract_strided_slice %174 {offsets = [0, 0], sizes = [8, 384], strides = [1, 1]} : vector<8x390xf32> to vector<8x384xf32>
    %176 = vector.extract_strided_slice %64 {offsets = [0, 21], sizes = [8, 1], strides = [1, 1]} : vector<8x49xf32> to vector<8x1xf32>
    %177 = vector.broadcast %176 : vector<8x1xf32> to vector<8x384xf32>
    %178 = arith.mulf %175, %177 : vector<8x384xf32>
    %179 = arith.addf %173, %178 : vector<8x384xf32>
    %180 = vector.extract_strided_slice %174 {offsets = [0, 1], sizes = [8, 384], strides = [1, 1]} : vector<8x390xf32> to vector<8x384xf32>
    %181 = vector.extract_strided_slice %64 {offsets = [0, 22], sizes = [8, 1], strides = [1, 1]} : vector<8x49xf32> to vector<8x1xf32>
    %182 = vector.broadcast %181 : vector<8x1xf32> to vector<8x384xf32>
    %183 = arith.mulf %180, %182 : vector<8x384xf32>
    %184 = arith.addf %179, %183 : vector<8x384xf32>
    %185 = vector.extract_strided_slice %174 {offsets = [0, 2], sizes = [8, 384], strides = [1, 1]} : vector<8x390xf32> to vector<8x384xf32>
    %186 = vector.extract_strided_slice %64 {offsets = [0, 23], sizes = [8, 1], strides = [1, 1]} : vector<8x49xf32> to vector<8x1xf32>
    %187 = vector.broadcast %186 : vector<8x1xf32> to vector<8x384xf32>
    %188 = arith.mulf %185, %187 : vector<8x384xf32>
    %189 = arith.addf %184, %188 : vector<8x384xf32>
    %190 = vector.extract_strided_slice %174 {offsets = [0, 3], sizes = [8, 384], strides = [1, 1]} : vector<8x390xf32> to vector<8x384xf32>
    %191 = vector.extract_strided_slice %64 {offsets = [0, 24], sizes = [8, 1], strides = [1, 1]} : vector<8x49xf32> to vector<8x1xf32>
    %192 = vector.broadcast %191 : vector<8x1xf32> to vector<8x384xf32>
    %193 = arith.mulf %190, %192 : vector<8x384xf32>
    %194 = arith.addf %189, %193 : vector<8x384xf32>
    %195 = vector.extract_strided_slice %174 {offsets = [0, 4], sizes = [8, 384], strides = [1, 1]} : vector<8x390xf32> to vector<8x384xf32>
    %196 = vector.extract_strided_slice %64 {offsets = [0, 25], sizes = [8, 1], strides = [1, 1]} : vector<8x49xf32> to vector<8x1xf32>
    %197 = vector.broadcast %196 : vector<8x1xf32> to vector<8x384xf32>
    %198 = arith.mulf %195, %197 : vector<8x384xf32>
    %199 = arith.addf %194, %198 : vector<8x384xf32>
    %200 = vector.extract_strided_slice %174 {offsets = [0, 5], sizes = [8, 384], strides = [1, 1]} : vector<8x390xf32> to vector<8x384xf32>
    %201 = vector.extract_strided_slice %64 {offsets = [0, 26], sizes = [8, 1], strides = [1, 1]} : vector<8x49xf32> to vector<8x1xf32>
    %202 = vector.broadcast %201 : vector<8x1xf32> to vector<8x384xf32>
    %203 = arith.mulf %200, %202 : vector<8x384xf32>
    %204 = arith.addf %199, %203 : vector<8x384xf32>
    %205 = vector.extract_strided_slice %174 {offsets = [0, 6], sizes = [8, 384], strides = [1, 1]} : vector<8x390xf32> to vector<8x384xf32>
    %206 = vector.extract_strided_slice %64 {offsets = [0, 27], sizes = [8, 1], strides = [1, 1]} : vector<8x49xf32> to vector<8x1xf32>
    %207 = vector.broadcast %206 : vector<8x1xf32> to vector<8x384xf32>
    %208 = arith.mulf %205, %207 : vector<8x384xf32>
    %209 = arith.addf %204, %208 : vector<8x384xf32>
    %c0_65 = arith.constant 0 : index
    %c88 = arith.constant 88 : index
    %210 = vector.load %arg9[%c0_65, %c88] : memref<8x640xf32, #tpu.memory_space<vmem>>, vector<8x390xf32>
    %211 = vector.extract_strided_slice %210 {offsets = [0, 0], sizes = [8, 384], strides = [1, 1]} : vector<8x390xf32> to vector<8x384xf32>
    %212 = vector.extract_strided_slice %64 {offsets = [0, 28], sizes = [8, 1], strides = [1, 1]} : vector<8x49xf32> to vector<8x1xf32>
    %213 = vector.broadcast %212 : vector<8x1xf32> to vector<8x384xf32>
    %214 = arith.mulf %211, %213 : vector<8x384xf32>
    %215 = arith.addf %209, %214 : vector<8x384xf32>
    %216 = vector.extract_strided_slice %210 {offsets = [0, 1], sizes = [8, 384], strides = [1, 1]} : vector<8x390xf32> to vector<8x384xf32>
    %217 = vector.extract_strided_slice %64 {offsets = [0, 29], sizes = [8, 1], strides = [1, 1]} : vector<8x49xf32> to vector<8x1xf32>
    %218 = vector.broadcast %217 : vector<8x1xf32> to vector<8x384xf32>
    %219 = arith.mulf %216, %218 : vector<8x384xf32>
    %220 = arith.addf %215, %219 : vector<8x384xf32>
    %221 = vector.extract_strided_slice %210 {offsets = [0, 2], sizes = [8, 384], strides = [1, 1]} : vector<8x390xf32> to vector<8x384xf32>
    %222 = vector.extract_strided_slice %64 {offsets = [0, 30], sizes = [8, 1], strides = [1, 1]} : vector<8x49xf32> to vector<8x1xf32>
    %223 = vector.broadcast %222 : vector<8x1xf32> to vector<8x384xf32>
    %224 = arith.mulf %221, %223 : vector<8x384xf32>
    %225 = arith.addf %220, %224 : vector<8x384xf32>
    %226 = vector.extract_strided_slice %210 {offsets = [0, 3], sizes = [8, 384], strides = [1, 1]} : vector<8x390xf32> to vector<8x384xf32>
    %227 = vector.extract_strided_slice %64 {offsets = [0, 31], sizes = [8, 1], strides = [1, 1]} : vector<8x49xf32> to vector<8x1xf32>
    %228 = vector.broadcast %227 : vector<8x1xf32> to vector<8x384xf32>
    %229 = arith.mulf %226, %228 : vector<8x384xf32>
    %230 = arith.addf %225, %229 : vector<8x384xf32>
    %231 = vector.extract_strided_slice %210 {offsets = [0, 4], sizes = [8, 384], strides = [1, 1]} : vector<8x390xf32> to vector<8x384xf32>
    %232 = vector.extract_strided_slice %64 {offsets = [0, 32], sizes = [8, 1], strides = [1, 1]} : vector<8x49xf32> to vector<8x1xf32>
    %233 = vector.broadcast %232 : vector<8x1xf32> to vector<8x384xf32>
    %234 = arith.mulf %231, %233 : vector<8x384xf32>
    %235 = arith.addf %230, %234 : vector<8x384xf32>
    %236 = vector.extract_strided_slice %210 {offsets = [0, 5], sizes = [8, 384], strides = [1, 1]} : vector<8x390xf32> to vector<8x384xf32>
    %237 = vector.extract_strided_slice %64 {offsets = [0, 33], sizes = [8, 1], strides = [1, 1]} : vector<8x49xf32> to vector<8x1xf32>
    %238 = vector.broadcast %237 : vector<8x1xf32> to vector<8x384xf32>
    %239 = arith.mulf %236, %238 : vector<8x384xf32>
    %240 = arith.addf %235, %239 : vector<8x384xf32>
    %241 = vector.extract_strided_slice %210 {offsets = [0, 6], sizes = [8, 384], strides = [1, 1]} : vector<8x390xf32> to vector<8x384xf32>
    %242 = vector.extract_strided_slice %64 {offsets = [0, 34], sizes = [8, 1], strides = [1, 1]} : vector<8x49xf32> to vector<8x1xf32>
    %243 = vector.broadcast %242 : vector<8x1xf32> to vector<8x384xf32>
    %244 = arith.mulf %241, %243 : vector<8x384xf32>
    %245 = arith.addf %240, %244 : vector<8x384xf32>
    %c0_66 = arith.constant 0 : index
    %c110 = arith.constant 110 : index
    %246 = vector.load %arg9[%c0_66, %c110] : memref<8x640xf32, #tpu.memory_space<vmem>>, vector<8x390xf32>
    %247 = vector.extract_strided_slice %246 {offsets = [0, 0], sizes = [8, 384], strides = [1, 1]} : vector<8x390xf32> to vector<8x384xf32>
    %248 = vector.extract_strided_slice %64 {offsets = [0, 35], sizes = [8, 1], strides = [1, 1]} : vector<8x49xf32> to vector<8x1xf32>
    %249 = vector.broadcast %248 : vector<8x1xf32> to vector<8x384xf32>
    %250 = arith.mulf %247, %249 : vector<8x384xf32>
    %251 = arith.addf %245, %250 : vector<8x384xf32>
    %252 = vector.extract_strided_slice %246 {offsets = [0, 1], sizes = [8, 384], strides = [1, 1]} : vector<8x390xf32> to vector<8x384xf32>
    %253 = vector.extract_strided_slice %64 {offsets = [0, 36], sizes = [8, 1], strides = [1, 1]} : vector<8x49xf32> to vector<8x1xf32>
    %254 = vector.broadcast %253 : vector<8x1xf32> to vector<8x384xf32>
    %255 = arith.mulf %252, %254 : vector<8x384xf32>
    %256 = arith.addf %251, %255 : vector<8x384xf32>
    %257 = vector.extract_strided_slice %246 {offsets = [0, 2], sizes = [8, 384], strides = [1, 1]} : vector<8x390xf32> to vector<8x384xf32>
    %258 = vector.extract_strided_slice %64 {offsets = [0, 37], sizes = [8, 1], strides = [1, 1]} : vector<8x49xf32> to vector<8x1xf32>
    %259 = vector.broadcast %258 : vector<8x1xf32> to vector<8x384xf32>
    %260 = arith.mulf %257, %259 : vector<8x384xf32>
    %261 = arith.addf %256, %260 : vector<8x384xf32>
    %262 = vector.extract_strided_slice %246 {offsets = [0, 3], sizes = [8, 384], strides = [1, 1]} : vector<8x390xf32> to vector<8x384xf32>
    %263 = vector.extract_strided_slice %64 {offsets = [0, 38], sizes = [8, 1], strides = [1, 1]} : vector<8x49xf32> to vector<8x1xf32>
    %264 = vector.broadcast %263 : vector<8x1xf32> to vector<8x384xf32>
    %265 = arith.mulf %262, %264 : vector<8x384xf32>
    %266 = arith.addf %261, %265 : vector<8x384xf32>
    %267 = vector.extract_strided_slice %246 {offsets = [0, 4], sizes = [8, 384], strides = [1, 1]} : vector<8x390xf32> to vector<8x384xf32>
    %268 = vector.extract_strided_slice %64 {offsets = [0, 39], sizes = [8, 1], strides = [1, 1]} : vector<8x49xf32> to vector<8x1xf32>
    %269 = vector.broadcast %268 : vector<8x1xf32> to vector<8x384xf32>
    %270 = arith.mulf %267, %269 : vector<8x384xf32>
    %271 = arith.addf %266, %270 : vector<8x384xf32>
    %272 = vector.extract_strided_slice %246 {offsets = [0, 5], sizes = [8, 384], strides = [1, 1]} : vector<8x390xf32> to vector<8x384xf32>
    %273 = vector.extract_strided_slice %64 {offsets = [0, 40], sizes = [8, 1], strides = [1, 1]} : vector<8x49xf32> to vector<8x1xf32>
    %274 = vector.broadcast %273 : vector<8x1xf32> to vector<8x384xf32>
    %275 = arith.mulf %272, %274 : vector<8x384xf32>
    %276 = arith.addf %271, %275 : vector<8x384xf32>
    %277 = vector.extract_strided_slice %246 {offsets = [0, 6], sizes = [8, 384], strides = [1, 1]} : vector<8x390xf32> to vector<8x384xf32>
    %278 = vector.extract_strided_slice %64 {offsets = [0, 41], sizes = [8, 1], strides = [1, 1]} : vector<8x49xf32> to vector<8x1xf32>
    %279 = vector.broadcast %278 : vector<8x1xf32> to vector<8x384xf32>
    %280 = arith.mulf %277, %279 : vector<8x384xf32>
    %281 = arith.addf %276, %280 : vector<8x384xf32>
    %c0_67 = arith.constant 0 : index
    %c132 = arith.constant 132 : index
    %282 = vector.load %arg9[%c0_67, %c132] : memref<8x640xf32, #tpu.memory_space<vmem>>, vector<8x390xf32>
    %283 = vector.extract_strided_slice %282 {offsets = [0, 0], sizes = [8, 384], strides = [1, 1]} : vector<8x390xf32> to vector<8x384xf32>
    %284 = vector.extract_strided_slice %64 {offsets = [0, 42], sizes = [8, 1], strides = [1, 1]} : vector<8x49xf32> to vector<8x1xf32>
    %285 = vector.broadcast %284 : vector<8x1xf32> to vector<8x384xf32>
    %286 = arith.mulf %283, %285 : vector<8x384xf32>
    %287 = arith.addf %281, %286 : vector<8x384xf32>
    %288 = vector.extract_strided_slice %282 {offsets = [0, 1], sizes = [8, 384], strides = [1, 1]} : vector<8x390xf32> to vector<8x384xf32>
    %289 = vector.extract_strided_slice %64 {offsets = [0, 43], sizes = [8, 1], strides = [1, 1]} : vector<8x49xf32> to vector<8x1xf32>
    %290 = vector.broadcast %289 : vector<8x1xf32> to vector<8x384xf32>
    %291 = arith.mulf %288, %290 : vector<8x384xf32>
    %292 = arith.addf %287, %291 : vector<8x384xf32>
    %293 = vector.extract_strided_slice %282 {offsets = [0, 2], sizes = [8, 384], strides = [1, 1]} : vector<8x390xf32> to vector<8x384xf32>
    %294 = vector.extract_strided_slice %64 {offsets = [0, 44], sizes = [8, 1], strides = [1, 1]} : vector<8x49xf32> to vector<8x1xf32>
    %295 = vector.broadcast %294 : vector<8x1xf32> to vector<8x384xf32>
    %296 = arith.mulf %293, %295 : vector<8x384xf32>
    %297 = arith.addf %292, %296 : vector<8x384xf32>
    %298 = vector.extract_strided_slice %282 {offsets = [0, 3], sizes = [8, 384], strides = [1, 1]} : vector<8x390xf32> to vector<8x384xf32>
    %299 = vector.extract_strided_slice %64 {offsets = [0, 45], sizes = [8, 1], strides = [1, 1]} : vector<8x49xf32> to vector<8x1xf32>
    %300 = vector.broadcast %299 : vector<8x1xf32> to vector<8x384xf32>
    %301 = arith.mulf %298, %300 : vector<8x384xf32>
    %302 = arith.addf %297, %301 : vector<8x384xf32>
    %303 = vector.extract_strided_slice %282 {offsets = [0, 4], sizes = [8, 384], strides = [1, 1]} : vector<8x390xf32> to vector<8x384xf32>
    %304 = vector.extract_strided_slice %64 {offsets = [0, 46], sizes = [8, 1], strides = [1, 1]} : vector<8x49xf32> to vector<8x1xf32>
    %305 = vector.broadcast %304 : vector<8x1xf32> to vector<8x384xf32>
    %306 = arith.mulf %303, %305 : vector<8x384xf32>
    %307 = arith.addf %302, %306 : vector<8x384xf32>
    %308 = vector.extract_strided_slice %282 {offsets = [0, 5], sizes = [8, 384], strides = [1, 1]} : vector<8x390xf32> to vector<8x384xf32>
    %309 = vector.extract_strided_slice %64 {offsets = [0, 47], sizes = [8, 1], strides = [1, 1]} : vector<8x49xf32> to vector<8x1xf32>
    %310 = vector.broadcast %309 : vector<8x1xf32> to vector<8x384xf32>
    %311 = arith.mulf %308, %310 : vector<8x384xf32>
    %312 = arith.addf %307, %311 : vector<8x384xf32>
    %313 = vector.extract_strided_slice %282 {offsets = [0, 6], sizes = [8, 384], strides = [1, 1]} : vector<8x390xf32> to vector<8x384xf32>
    %314 = vector.extract_strided_slice %64 {offsets = [0, 48], sizes = [8, 1], strides = [1, 1]} : vector<8x49xf32> to vector<8x1xf32>
    %315 = vector.broadcast %314 : vector<8x1xf32> to vector<8x384xf32>
    %316 = arith.mulf %313, %315 : vector<8x384xf32>
    %317 = arith.addf %312, %316 : vector<8x384xf32>
    %c0_68 = arith.constant 0 : index
    %c0_69 = arith.constant 0 : index
    %318 = vector.load %arg6[%c0_68, %c0_69] : memref<8x8xf32, #tpu.memory_space<vmem>>, vector<8x8xf32>
    %cst_70 = arith.constant dense<0.000000e+00> : vector<8x384xf32>
    %319 = tpu.matmul %318, %317, %cst_70 {dimension_numbers = #tpu.dot_dimension_numbers<[1], [0], [0], [1], [0, 0, 1, 1], [], []>} : vector<8x8xf32>, vector<8x384xf32>, vector<8x384xf32> -> vector<8x384xf32>
    %c0_71 = arith.constant 0 : index
    %c0_72 = arith.constant 0 : index
    %320 = vector.load %arg7[%c0_71, %c0_72] : memref<8x1xf32, #tpu.memory_space<vmem>>, vector<8x1xf32>
    %321 = vector.broadcast %320 : vector<8x1xf32> to vector<8x384xf32>
    %322 = arith.addf %319, %321 : vector<8x384xf32>
    %323 = vector.shape_cast %322 : vector<8x384xf32> to vector<1x8x384xf32>
    %c0_73 = arith.constant 0 : index
    %c0_74 = arith.constant 0 : index
    %c0_75 = arith.constant 0 : index
    %324 = vector.load %arg8[%c0_73, %c0_74, %c0_75] : memref<1x8x384xf32, #tpu.memory_space<vmem>>, vector<1x8x384xf32>
    tpu.vector_store %arg8[%c0_73, %c0_74, %c0_75], %323 {strides = array<i32>} : memref<1x8x384xf32, #tpu.memory_space<vmem>>, vector<1x8x384xf32>,
    return
  }
  func.func @transform_0(%arg0: i32) -> (i32, i32, i32) {
    %c0_i32 = arith.constant 0 : i32
    %c0_i32_0 = arith.constant 0 : i32
    %c0_i32_1 = arith.constant 0 : i32
    return %arg0, %c0_i32, %c0_i32_0 : i32, i32, i32
  }
  func.func @transform_1(%arg0: i32) -> (i32, i32) {
    %c0_i32 = arith.constant 0 : i32
    %c0_i32_0 = arith.constant 0 : i32
    %c0_i32_1 = arith.constant 0 : i32
    return %c0_i32, %c0_i32_0 : i32, i32
  }
  func.func @transform_2(%arg0: i32) -> (i32, i32, i32) {
    %c0_i32 = arith.constant 0 : i32
    %c0_i32_0 = arith.constant 0 : i32
    %c0_i32_1 = arith.constant 0 : i32
    %c0_i32_2 = arith.constant 0 : i32
    return %c0_i32, %c0_i32_0, %c0_i32_1 : i32, i32, i32
  }
  func.func @transform_3(%arg0: i32) -> (i32, i32) {
    %c0_i32 = arith.constant 0 : i32
    %c0_i32_0 = arith.constant 0 : i32
    %c0_i32_1 = arith.constant 0 : i32
    return %c0_i32, %c0_i32_0 : i32, i32
  }
  func.func @transform_4(%arg0: i32) -> (i32, i32) {
    %c0_i32 = arith.constant 0 : i32
    %c0_i32_0 = arith.constant 0 : i32
    %c0_i32_1 = arith.constant 0 : i32
    return %c0_i32, %c0_i32_0 : i32, i32
  }
  func.func @transform_5(%arg0: i32) -> (i32, i32) {
    %c0_i32 = arith.constant 0 : i32
    %c0_i32_0 = arith.constant 0 : i32
    %c0_i32_1 = arith.constant 0 : i32
    return %c0_i32, %c0_i32_0 : i32, i32
  }
  func.func @transform_6(%arg0: i32) -> (i32, i32) {
    %c0_i32 = arith.constant 0 : i32
    %c0_i32_0 = arith.constant 0 : i32
    %c0_i32_1 = arith.constant 0 : i32
    return %c0_i32, %c0_i32_0 : i32, i32
  }
  func.func @transform_7(%arg0: i32) -> (i32, i32, i32) {
    %c0_i32 = arith.constant 0 : i32
    %c0_i32_0 = arith.constant 0 : i32
    %c0_i32_1 = arith.constant 0 : i32
    return %arg0, %c0_i32, %c0_i32_0 : i32, i32, i32
  }
}

</mosaic_0001>

<bundles_post_ra>
// kernel: tpu_custom_call.1
= control target key start
LH: loop header
LB: loop body
LE: loop exit
PB: predicated region body
PF: predicated region fallthrough
CT: control target
= control target key end

     0   :  { %12 = vsyncpa [#allocation4], 0  ;;  %s6412_s0 = inlined_call_operand.vmem [shape: f32[2,8,686], index: 0, kind: input, shape index: {}]   ;;  %s6413_s1 = inlined_call_operand.vmem [shape: f32[1,640], index: 1, kind: input, shape index: {}]   ;;  %s6414_s2 = inlined_call_operand.vmem [shape: f32[9,8,8], index: 2, kind: input, shape index: {}]   ;;  %s6415_s3 = inlined_call_operand.vmem [shape: f32[8,1], index: 3, kind: input, shape index: {}]   ;;  %s6416_s4 = inlined_call_operand.vmem [shape: f32[8,49], index: 4, kind: input, shape index: {}]   ;;  %s6417_s5 = inlined_call_operand.vmem [shape: f32[8,8], index: 5, kind: input, shape index: {}]   ;;  %s6418_s6 = inlined_call_operand.vmem [shape: f32[8,1], index: 6, kind: input, shape index: {}]   ;;  %s6419_s7 = inlined_call_operand.hbm [shape: f32[2,8,384], index: 7, kind: output, shape index: {}]  }
   0x1   :  { %14 = vsyncpa [#allocation4 + $0x1], 0  ;;  %s4727_s24 = smov 0   ;;  %s4729_s25 = smov 0  }
   0x2   :  { %s4731_s26 = smov 0   ;;  %s4733_s27 = smov 0  }
   0x3 LB: > { %s4748_s28 = sadd.s32 4294967295, %s4588_s27   ;;  %s4191_s29 = sadd.s32 4294967294, %s4588_s27   ;;  %s4588_s27 = sphi %s4733_s27, %s6679_s27   ;;  %s4584_s26 = sphi %s4731_s26, %s6678_s26   ;;  %s4580_s25 = sphi %s4729_s25, %s6677_s25   ;;  %s4576_s24 = sphi %s4727_s24, %s6676_s24  }
   0x4   : > { %s4752_s30 = sadd.s32 1, %s4588_s27   ;;  %s179_s8 = sadd.s32 1, %s4584_s26 }
   0x5   : > { %s176_s9 = ssub.s32 %s4588_s27, %s4752_s30  ;;  %p189_p0 = scmp.ne.s32.totalorder %s4584_s26, %s4580_s25 }
   0x6   : > { %p177_p1 = scmp.eq.s32.totalorder %s176_s9, 0  ;;  %p190_p2 = scmp.eq.s32.totalorder %s4748_s28, 1 }
   0x7   : > { %p195_p3 = scmp.ne.s32.totalorder %s4580_s25, %s4576_s24  ;;  %p196_p4 = scmp.eq.s32.totalorder %s4191_s29, 1 }
   0x8   : > { %s4763_s10 = scalar_select %p177_p1, %s4584_s26, %s179_s8  }
   0x9   : > { %p4765_p5 = por %p190_p2, %p189_p0  ;;  %p4769_p6 = por %p196_p4, %p195_p3 }
   0xa   : > { %p4194_p7 = scmp.ge.s32.totalorder %s4588_s27, 1  ;;  %p240_p8 = scmp.lt.s32.totalorder %s4588_s27, 3 }
   0xc   : > { %p241_p9 = pnand %p4194_p7, %p240_p8 }
   0xe   : > { %244 = sbr.rel (%p241_p9) target bundleno = 1237 (0x4d5), region = 48 }
  0x15   : > { %p272_p10 = scmp.lt.s32.totalorder %s4748_s28, 1  ;;  %v4590_v0 = vmov 0.0   ;;  %s4591_s18 = smov 127   ;;  %v4594_v7 = vmov 2   ;;  %v4597_v8 = vmov 0   ;;  %v4884_v9 = vld [vmem:[%s6416_s4] sm:$0xff] }
  0x16   : > { %383 = vmatprep.mubr.f32.mxu0 %v4590_v0  ;;  %454 = vmatprep.mubr.f32.mxu1 %v4590_v0  ;;  %s4592_s19 = smov 126   ;;  %s4593_s20 = smov 106   ;;  %v4601_v10 = vmov 3   ;;  %v4602_v11 = vmov 1   ;;  %v4603_v12 = vmov 4   ;;  %v4604_v13 = vmov 16  }
  0x17   : > { %s273_s13 = scalar_select %p272_p10, %s4748_s28, 1  ;;  %4478 = vset.pattern.permute.xlu0 %v4594_v7  ;;  %4476 = vset.pattern.permute.xlu1 %v4597_v8  ;;  %v4605_v14 = vmov 5   ;;  %v4606_v15 = vmov 17   ;;  %v4607_v18 = vmov 6   ;;  %v4608_v19 = vmov 19   ;;  %v4196_v23 = vld [vmem:[%s6414_s2 + $0x8] sm:$0xff] }
  0x18   : > { %s6420_s21 = smov 105   ;;  %s6422_s22 = smov 104   ;;  %vm304_vm0 = vcmask 1039360   ;;  %vm6501_vm1 = vcmask 64512   ;;  %v4609_v25 = vmov 7   ;;  %vm4610_vm2 = vmmov 0  }
  0x19   : > { %s4339_s14 = smul.u32 48, %s273_s13  ;;  %s6426_s23 = smov 84   ;;  %v4611_v30 = vmov 20   ;;  %vm760_vm3 = vcmask 1031168   ;;  %v277_v35 = vld [vmem:[%s6414_s2] sm:$0xff]  ;;  %v4612_v39 = vmov 8  }
  0x1a   : > { %s6428_s29 = smov 83   ;;  %s4600_s8 = smov 82   ;;  %v4203_v43 = vld [vmem:[%s6414_s2 + $0x10] sm:$0xff]  ;;  %vm1005_vm4 = vcmask 867328   ;;  %v4613_v44 = vmov 9   ;;  %v4614_v45 = vmov 22  }
  0x1b   : > { %s276_s17 = scalar_lea.vmem %s6412_s0, %s4339_s14  ;;  %v4615_v51 = vmov 10   ;;  %v4207_v55 = vld [vmem:[%s6414_s2 + $0x18] sm:$0xff]  ;;  %vm1250_vm5 = vcmask 859136   ;;  %v4616_v60 = vmov 11   ;;  %vm1495_vm6 = vcmask 850944   ;;  %s4649_s9 = smov 125  }
  0x1c   : > { %v4782_v1 = vld [vmem:[%s276_s17 + $0x8] sm:$0xff]  ;;  %v4784_v2 = vld [vmem:[%s276_s17] sm:$0xff]  ;;  %v4790_v3 = vld [vmem:[%s276_s17 + $0x10] sm:$0xff]  ;;  %vm6504_vm7 = vcmask 687104   ;;  %vm6505_vm8 = vcmask 678912   ;;  %vm6506_vm9 = vcmask 670720  }
  0x1d   : > { %294 = vrot.lane.b32.xlu0 %v4782_v1, %s4591_s18  ;;  %292 = vrot.lane.b32.xlu1 %v4784_v2, %s4591_s18  ;;  %v4792_v4 = vld [vmem:[%s276_s17 + $0x18] sm:$0xff]  ;;  %v4798_v5 = vld [vmem:[%s276_s17 + $0x20] sm:$0xff]  ;;  %s6441_s13 = smov 124   ;;  %s6436_s14 = smov 123   ;;  %vm2608_vm10 = vcmask 1022976   ;;  %vm6510_vm11 = vcmask 1014784  }
  0x1e   : > { %v285_v6 = vld [vmem:[%s276_s17 + $0x28] sm:$0xff]  ;;  %s6434_s15 = smov 122   ;;  %s4653_s16 = smov 103   ;;  %vm6511_vm12 = vcmask 1006592   ;;  %vm6512_vm13 = vcmask 998400   ;;  %vm2815_vm14 = vcmask 842752  }
  0x1f   : > { %s6432_s17 = smov 102   ;;  %vm2845_vm15 = vcmask 834560  }
  0x21   : > { %296 = vrot.lane.b32.xlu0 %v4790_v3, %s4591_s18  ;;  %298 = vrot.lane.b32.xlu1 %v4792_v4, %s4591_s18 }
  0x25   : > { %300 = vrot.lane.b32.xlu0 %v4798_v5, %s4591_s18  ;;  %302 = vrot.lane.b32.xlu1 %v285_v6, %s4591_s18 }
  0x29   : > { %750 = vrot.lane.b32.xlu0 %v4782_v1, %s4592_s19  ;;  %752 = vrot.lane.b32.xlu1 %v4790_v3, %s4592_s19 }
  0x2d   : > { %748 = vrot.lane.b32.xlu0 %v4784_v2, %s4592_s19  ;;  %754 = vrot.lane.b32.xlu1 %v4792_v4, %s4592_s19 }
  0x31   : > { %756 = vrot.lane.b32.xlu0 %v4798_v5, %s4592_s19  ;;  %758 = vrot.lane.b32.xlu1 %v285_v6, %s4592_s19 }
  0x35   : > { %995 = vrot.lane.b32.xlu0 %v4782_v1, %s4593_s20  ;;  %997 = vrot.lane.b32.xlu1 %v4790_v3, %s4593_s20 }
  0x39   : > { %993 = vrot.lane.b32.xlu0 %v4784_v2, %s4593_s20  ;;  %999 = vrot.lane.b32.xlu1 %v4792_v4, %s4593_s20 }
  0x3d   : > { %1001 = vrot.lane.b32.xlu0 %v4798_v5, %s4593_s20  ;;  %1003 = vrot.lane.b32.xlu1 %v285_v6, %s4593_s20 }
  0x41   : > { %1240 = vrot.lane.b32.xlu0 %v4782_v1, %s6420_s21  ;;  %1242 = vrot.lane.b32.xlu1 %v4790_v3, %s6420_s21 }
  0x45   : > { %1238 = vrot.lane.b32.xlu0 %v4784_v2, %s6420_s21  ;;  %1244 = vrot.lane.b32.xlu1 %v4792_v4, %s6420_s21 }
  0x49   : > { %1246 = vrot.lane.b32.xlu0 %v4798_v5, %s6420_s21  ;;  %1248 = vrot.lane.b32.xlu1 %v285_v6, %s6420_s21 }
  0x4d   : > { %1485 = vrot.lane.b32.xlu0 %v4782_v1, %s6422_s22  ;;  %1487 = vrot.lane.b32.xlu1 %v4790_v3, %s6422_s22 }
  0x51   : > { %1483 = vrot.lane.b32.xlu0 %v4784_v2, %s6422_s22  ;;  %1489 = vrot.lane.b32.xlu1 %v4792_v4, %s6422_s22 }
  0x55   : > { %1491 = vrot.lane.b32.xlu0 %v4798_v5, %s6422_s22  ;;  %1493 = vrot.lane.b32.xlu1 %v285_v6, %s6422_s22 }
  0x59   : > { %1730 = vrot.lane.b32.xlu0 %v4782_v1, %s6426_s23  ;;  %1732 = vrot.lane.b32.xlu1 %v4790_v3, %s6426_s23 }
  0x5d   : > { %1728 = vrot.lane.b32.xlu0 %v4784_v2, %s6426_s23  ;;  %1734 = vrot.lane.b32.xlu1 %v4792_v4, %s6426_s23 }
  0x61   : > { %1736 = vrot.lane.b32.xlu0 %v4798_v5, %s6426_s23  ;;  %1738 = vrot.lane.b32.xlu1 %v285_v6, %s6426_s23 }
  0x65   : > { %1975 = vrot.lane.b32.xlu0 %v4782_v1, %s6428_s29  ;;  %1977 = vrot.lane.b32.xlu1 %v4790_v3, %s6428_s29 }
  0x69   : > { %1973 = vrot.lane.b32.xlu0 %v4784_v2, %s6428_s29  ;;  %1979 = vrot.lane.b32.xlu1 %v4792_v4, %s6428_s29 }
  0x6d   : > { %1981 = vrot.lane.b32.xlu0 %v4798_v5, %s6428_s29  ;;  %1983 = vrot.lane.b32.xlu1 %v285_v6, %s6428_s29 }
  0x71   : > { %2220 = vrot.lane.b32.xlu0 %v4782_v1, %s4600_s8  ;;  %2222 = vrot.lane.b32.xlu1 %v4790_v3, %s4600_s8 }
  0x75   : > { %2218 = vrot.lane.b32.xlu0 %v4784_v2, %s4600_s8  ;;  %2224 = vrot.lane.b32.xlu1 %v4792_v4, %s4600_s8 }
  0x79   : > { %2226 = vrot.lane.b32.xlu0 %v4798_v5, %s4600_s8  ;;  %2228 = vrot.lane.b32.xlu1 %v285_v6, %s4600_s8  ;;  %v4211_v6 = vld [vmem:[%s6414_s2 + $0x20] sm:$0xff] }
  0x7d   : > { %2560 = vperm.xlu0 %4478, %v4884_v9   ;;  %2521 = vperm.xlu1 %4476, %v4884_v9  }
  0x81   : > { %4479 = vset.pattern.permute.xlu0 %v4601_v10  ;;  %4477 = vset.pattern.permute.xlu1 %v4602_v11 }
  0x82   : > { %2589 = vperm.xlu0 %4479, %v4884_v9   ;;  %2531 = vperm.xlu1 %4477, %v4884_v9  }
  0x86   : > { %4480 = vset.pattern.permute.xlu0 %v4603_v12  ;;  %4492 = vset.pattern.permute.xlu1 %v4604_v13  ;;  %v4619_v12 = vmov 13  }
  0x87   : > { %2619 = vperm.xlu0 %4480, %v4884_v9   ;;  %2974 = vperm.xlu1 %4492, %v4884_v9  }
  0x8b   : > { %4481 = vset.pattern.permute.xlu0 %v4605_v14  ;;  %4493 = vset.pattern.permute.xlu1 %v4606_v15  ;;  %v4620_v15 = vmov 25  }
  0x8c   : > { %2649 = vperm.xlu0 %4481, %v4884_v9   ;;  %3003 = vperm.xlu1 %4493, %v4884_v9  }
  0x8f   : > { %v295_v16 = vpop.permute.xlu0 %294  ;;  %v293_v17 = vpop.permute.xlu1 %292 }
  0x90   : > { %4482 = vset.pattern.permute.xlu0 %v4607_v18  ;;  %4495 = vset.pattern.permute.xlu1 %v4608_v19  ;;  %v305_v24 = vsel %vm304_vm0, %v293_v17, %v295_v16 }
  0x91   : > { %2679 = vperm.xlu0 %4482, %v4884_v9   ;;  %3063 = vperm.xlu1 %4495, %v4884_v9  }
  0x93   : > { %v297_v20 = vpop.permute.xlu0 %296  ;;  %v299_v21 = vpop.permute.xlu1 %298 }
  0x94   : > { %v306_v22 = vsel %vm304_vm0, %v295_v16, %v297_v20  ;;  %v307_v31 = vsel %vm304_vm0, %v297_v20, %v299_v21  ;;  %v4621_v20 = vmov 14  }
  0x95   : > { %319 = vmatprep.subr.mxu0 %v306_v22  ;;  %4483 = vset.pattern.permute.xlu0 %v4609_v25  ;;  %v4622_v25 = vmov 26  }
  0x96   : > { %320 = vmatpush1.msra.mxu0 %v305_v24  ;;  %2709 = vperm.xlu0 %4483, %v4884_v9  }
  0x97   : > { %v301_v26 = vpop.permute.xlu0 %300  ;;  %4197 = vmatmul.mubr.msk.f32.vlgmr.msra.gmra.mrb[0].mxu0 %vm6501_vm1, %v4196_v23  ;;  %v303_v27 = vpop.permute.xlu1 %302  ;;  %4256 = vmatprep.subr.mxu0 %v4590_v0 }
  0x98   : > { %v309_v28 = vsel %vm304_vm0, %v301_v26, %v303_v27  ;;  %v308_v29 = vsel %vm304_vm0, %v299_v21, %v301_v26  ;;  %4258 = vmatprep.mubr.msk.f32.mxu0 %vm4610_vm2, %v4590_v0  ;;  %4496 = vset.pattern.permute.xlu1 %v4611_v30  ;;  %v4623_v26 = vmov 15  }
  0x99   : > { %390 = vmatprep.subr.mxu1 %v308_v29  ;;  %4257 = vmatpush3.msra.mxu0 %v309_v28 }
  0x9a   : > { %391 = vmatpush1.msra.mxu1 %v307_v31  ;;  %534 = vmatprep.subr.mxu0 %v4782_v1  ;;  %v4624_v31 = vmov 28  }
  0x9b   : > { %v751_v32 = vpop.permute.xlu0 %750  ;;  %4198 = vmatmul.mubr.msk.f32.vlgmr.msra.gmra.mrb[0].mxu1 %vm6501_vm1, %v4196_v23  ;;  %4259 = vmatmul.mubr.msk.f32.vlgmr.msra.gmra.mrb[2].mxu0 %vm6501_vm1, %v4196_v23  ;;  %v753_v33 = vpop.permute.xlu1 %752  ;;  %v4215_v23 = vld [vmem:[%s6414_s2 + $0x28] sm:$0xff] }
  0x9c   : > { %535 = vmatpush1.msra.mxu0 %v4784_v2  ;;  %v762_v34 = vsel %vm760_vm3, %v751_v32, %v753_v33  ;;  %598 = vmatprep.mubr.f32.mxu0 %v4590_v0  ;;  %v4617_v2 = vmov 23  }
  0x9d   : > { %774 = vmatprep.subr.mxu0 %v762_v34  ;;  %605 = vmatprep.subr.mxu1 %v4792_v4 }
  0x9e   : > { %606 = vmatpush1.msra.mxu1 %v4790_v3  ;;  %669 = vmatprep.mubr.f32.mxu1 %v4590_v0  ;;  %v4618_v3 = vmov 12  }
  0x9f   : > { %v749_v36 = vpop.permute.xlu0 %748  ;;  %4200 = vmatmul.mubr.msk.f32.vlgmr.msra.gmra.mrb[0].mxu0 %vm6501_vm1, %v277_v35  ;;  %v755_v37 = vpop.permute.xlu1 %754  ;;  %4261 = vmatprep.subr.mxu1 %v4590_v0 }
  0xa0   : > { %v761_v38 = vsel %vm760_vm3, %v749_v36, %v751_v32  ;;  %838 = vmatprep.mubr.f32.mxu0 %v4590_v0  ;;  %4484 = vset.pattern.permute.xlu0 %v4612_v39  ;;  %v763_v48 = vsel %vm760_vm3, %v753_v33, %v755_v37  ;;  %v4625_v36 = vmov 18  }
  0xa1   : > { %775 = vmatpush1.msra.mxu0 %v761_v38  ;;  %2738 = vperm.xlu0 %4484, %v4884_v9  }
  0xa2   : > { %4266 = vmatprep.subr.mxu0 %v4590_v0  ;;  %3093 = vperm.xlu1 %4496, %v4884_v9  }
  0xa3   : > { %v757_v40 = vpop.permute.xlu0 %756  ;;  %4201 = vmatmul.mubr.msk.f32.vlgmr.msra.gmra.mrb[0].mxu1 %vm6501_vm1, %v277_v35  ;;  %v759_v41 = vpop.permute.xlu1 %758 }
  0xa4   : > { %4262 = vmatpush3.msra.mxu1 %v4798_v5  ;;  %v764_v42 = vsel %vm760_vm3, %v755_v37, %v757_v40  ;;  %4263 = vmatprep.mubr.msk.f32.mxu1 %vm4610_vm2, %v4590_v0  ;;  %v765_v46 = vsel %vm760_vm3, %v757_v40, %v759_v41  ;;  %v4626_v37 = vmov 29   ;;  %v4219_v40 = vld [vmem:[%s6414_s2 + $0x30] sm:$0xff] }
  0xa5   : > { %845 = vmatprep.subr.mxu1 %v764_v42  ;;  %4485 = vset.pattern.permute.xlu0 %v4613_v44  ;;  %v4627_v44 = vmov 21  }
  0xa6   : > { %2767 = vperm.xlu0 %4485, %v4884_v9   ;;  %4498 = vset.pattern.permute.xlu1 %v4614_v45 }
  0xa7   : > { %v996_v47 = vpop.permute.xlu0 %995  ;;  %4264 = vmatmul.mubr.msk.f32.vlgmr.msra.gmra.mrb[2].mxu1 %vm6501_vm1, %v277_v35  ;;  %4204 = vmatmul.mubr.msk.f32.vlgmr.msra.gmra.mrb[0].mxu0 %vm6501_vm1, %v4203_v43  ;;  %v998_v49 = vpop.permute.xlu1 %997 }
  0xa8   : > { %846 = vmatpush1.msra.mxu1 %v763_v48  ;;  %4267 = vmatpush3.msra.mxu0 %v765_v46  ;;  %v1007_v50 = vsel %vm1005_vm4, %v996_v47, %v998_v49 }
  0xa9   : > { %1019 = vmatprep.subr.mxu0 %v1007_v50  ;;  %909 = vmatprep.mubr.f32.mxu1 %v4590_v0 }
  0xaa   : > { %4268 = vmatprep.mubr.msk.f32.mxu0 %vm4610_vm2, %v4590_v0  ;;  %4486 = vset.pattern.permute.xlu0 %v4615_v51 }
  0xab   : > { %v994_v52 = vpop.permute.xlu0 %993  ;;  %4205 = vmatmul.mubr.msk.f32.vlgmr.msra.gmra.mrb[0].mxu1 %vm6501_vm1, %v4203_v43  ;;  %v1000_v53 = vpop.permute.xlu1 %999  ;;  %4269 = vmatmul.mubr.msk.f32.vlgmr.msra.gmra.mrb[4].mxu0 %vm6501_vm1, %v4203_v43 }
  0xac   : > { %v1006_v54 = vsel %vm1005_vm4, %v994_v52, %v996_v47  ;;  %1083 = vmatprep.mubr.f32.mxu0 %v4590_v0  ;;  %1154 = vmatprep.mubr.f32.mxu1 %v4590_v0  ;;  %v1008_v59 = vsel %vm1005_vm4, %v998_v49, %v1000_v53  ;;  %v4628_v47 = vmov 31   ;;  %v4629_v52 = vmov 24  }
  0xad   : > { %1020 = vmatpush1.msra.mxu0 %v1006_v54  ;;  %2796 = vperm.xlu0 %4486, %v4884_v9  }
  0xae   : > { %3153 = vperm.xlu1 %4498, %v4884_v9  }
  0xaf   : > { %v1002_v56 = vpop.permute.xlu0 %1001  ;;  %v1004_v57 = vpop.permute.xlu1 %1003  ;;  %4208 = vmatmul.mubr.msk.f32.vlgmr.msra.gmra.mrb[0].mxu0 %vm6501_vm1, %v4207_v55 }
  0xb0   : > { %v1009_v58 = vsel %vm1005_vm4, %v1000_v53, %v1002_v56  ;;  %1328 = vmatprep.mubr.f32.mxu0 %v4590_v0  ;;  %v1010_v61 = vsel %vm1005_vm4, %v1002_v56, %v1004_v57  ;;  %v4630_v57 = vmov 32  }
  0xb1   : > { %1090 = vmatprep.subr.mxu1 %v1009_v58  ;;  %4487 = vset.pattern.permute.xlu0 %v4616_v60  ;;  %v4631_v58 = vmov 27  }
  0xb2   : > { %1091 = vmatpush1.msra.mxu1 %v1008_v59  ;;  %2826 = vperm.xlu0 %4487, %v4884_v9  }
  0xb3   : > { %v1241_v62 = vpop.permute.xlu0 %1240  ;;  %4209 = vmatmul.mubr.msk.f32.vlgmr.msra.gmra.mrb[0].mxu1 %vm6501_vm1, %v4207_v55  ;;  %4271 = vmatprep.subr.mxu1 %v4590_v0  ;;  %v1243_v63 = vpop.permute.xlu1 %1242 }
  0xb4   : > { %4272 = vmatpush3.msra.mxu1 %v1010_v61  ;;  %v1252_v1 = vsel %vm1250_vm5, %v1241_v62, %v1243_v63  ;;  %4273 = vmatprep.mubr.msk.f32.mxu1 %vm4610_vm2, %v4590_v0 }
  0xb5   : > { %1264 = vmatprep.subr.mxu0 %v1252_v1  ;;  %4499 = vset.pattern.permute.xlu1 %v4617_v2 }
  0xb6   : > { %4488 = vset.pattern.permute.xlu0 %v4618_v3  ;;  %3183 = vperm.xlu1 %4499, %v4884_v9  }
  0xb7   : > { %v1239_v4 = vpop.permute.xlu0 %1238  ;;  %4274 = vmatmul.mubr.msk.f32.vlgmr.msra.gmra.mrb[4].mxu1 %vm6501_vm1, %v4207_v55  ;;  %v1245_v5 = vpop.permute.xlu1 %1244  ;;  %2856 = vperm.xlu0 %4488, %v4884_v9   ;;  %v4223_v55 = vld [vmem:[%s6414_s2 + $0x38] sm:$0xff] }
  0xb8   : > { %v1251_v7 = vsel %vm1250_vm5, %v1239_v4, %v1241_v62  ;;  %1399 = vmatprep.mubr.f32.mxu1 %v4590_v0  ;;  %v1253_v16 = vsel %vm1250_vm5, %v1243_v63, %v1245_v5  ;;  %v4632_v63 = vmov 34  }
  0xb9   : > { %1265 = vmatpush1.msra.mxu0 %v1251_v7 }
  0xba   : > { %4212 = vmatmul.mubr.msk.f32.vlgmr.msra.gmra.mrb[0].mxu0 %vm6501_vm1, %v4211_v6  ;;  %4276 = vmatprep.subr.mxu0 %v4590_v0 }
  0xbb   : > { %v1247_v10 = vpop.permute.xlu0 %1246  ;;  %v1249_v11 = vpop.permute.xlu1 %1248  ;;  %4278 = vmatprep.mubr.msk.f32.mxu0 %vm4610_vm2, %v4590_v0  ;;  %4489 = vset.pattern.permute.xlu0 %v4619_v12 }
  0xbc   : > { %v1255_v13 = vsel %vm1250_vm5, %v1247_v10, %v1249_v11  ;;  %v1254_v14 = vsel %vm1250_vm5, %v1245_v5, %v1247_v10  ;;  %2886 = vperm.xlu0 %4489, %v4884_v9   ;;  %4501 = vset.pattern.permute.xlu1 %v4620_v15  ;;  %v4633_v5 = vmov 30   ;;  %v4227_v11 = vld [vmem:[%s6414_s2 + $0x40] sm:$0xff]  ;;  %v4635_v15 = vmov 33  }
  0xbd   : > { %1335 = vmatprep.subr.mxu1 %v1254_v14  ;;  %4277 = vmatpush3.msra.mxu0 %v1255_v13 }
  0xbe   : > { %1336 = vmatpush1.msra.mxu1 %v1253_v16  ;;  %4279 = vmatmul.mubr.msk.f32.vlgmr.msra.gmra.mrb[6].mxu0 %vm6501_vm1, %v4211_v6 }
  0xbf   : > { %v1486_v17 = vpop.permute.xlu0 %1485  ;;  %v1488_v18 = vpop.permute.xlu1 %1487  ;;  %4213 = vmatmul.mubr.msk.f32.vlgmr.msra.gmra.mrb[0].mxu1 %vm6501_vm1, %v4211_v6  ;;  %1573 = vmatprep.mubr.f32.mxu0 %v4590_v0  ;;  %v4634_v6 = vmov 35  }
  0xc0   : > { %v1497_v19 = vsel %vm1495_vm6, %v1486_v17, %v1488_v18  ;;  %1644 = vmatprep.mubr.f32.mxu1 %v4590_v0  ;;  %3243 = vperm.xlu1 %4501, %v4884_v9  }
  0xc1   : > { %1509 = vmatprep.subr.mxu0 %v1497_v19  ;;  %4490 = vset.pattern.permute.xlu0 %v4621_v20  ;;  %v4637_v20 = vmov 36  }
  0xc2   : > { %2916 = vperm.xlu0 %4490, %v4884_v9  }
  0xc3   : > { %v1484_v21 = vpop.permute.xlu0 %1483  ;;  %v1490_v22 = vpop.permute.xlu1 %1489 }
  0xc4   : > { %v1496_v24 = vsel %vm1495_vm6, %v1484_v21, %v1486_v17  ;;  %4502 = vset.pattern.permute.xlu1 %v4622_v25  ;;  %v1498_v30 = vsel %vm1495_vm6, %v1488_v18, %v1490_v22  ;;  %v4636_v18 = vmov 37   ;;  %v4638_v21 = vmov 38  }
  0xc5   : > { %1510 = vmatpush1.msra.mxu0 %v1496_v24  ;;  %3273 = vperm.xlu1 %4502, %v4884_v9   ;;  %v4641_v24 = vmov 42   ;;  %v4642_v25 = vmov 41  }
  0xc6   : > { %4216 = vmatmul.mubr.msk.f32.vlgmr.msra.gmra.mrb[0].mxu0 %vm6501_vm1, %v4215_v23  ;;  %4491 = vset.pattern.permute.xlu0 %v4623_v26  ;;  %v4644_v26 = vmov 43  }
  0xc7   : > { %v1492_v27 = vpop.permute.xlu0 %1491  ;;  %v1494_v28 = vpop.permute.xlu1 %1493  ;;  %1818 = vmatprep.mubr.f32.mxu0 %v4590_v0  ;;  %2945 = vperm.xlu0 %4491, %v4884_v9  }
  0xc8   : > { %v1499_v29 = vsel %vm1495_vm6, %v1490_v22, %v1492_v27  ;;  %v1500_v32 = vsel %vm1495_vm6, %v1492_v27, %v1494_v28  ;;  %v4639_v22 = vmov 39   ;;  %v4645_v27 = vmov 48  }
  0xc9   : > { %1580 = vmatprep.subr.mxu1 %v1499_v29  ;;  %4504 = vset.pattern.permute.xlu1 %v4624_v31  ;;  %v4646_v28 = vmov 44   ;;  %v2461_v29 = vld [vmem:[%s6415_s3] sm:$0xff]  ;;  %v4648_v31 = vmov 47  }
  0xca   : > { %1581 = vmatpush1.msra.mxu1 %v1498_v30  ;;  %3333 = vperm.xlu1 %4504, %v4884_v9   ;;  %v4647_v30 = vmov 46  }
  0xcb   : > { %v1731_v33 = vpop.permute.xlu0 %1730  ;;  %4217 = vmatmul.mubr.msk.f32.vlgmr.msra.gmra.mrb[0].mxu1 %vm6501_vm1, %v4215_v23  ;;  %4281 = vmatprep.subr.mxu1 %v4590_v0  ;;  %v1733_v34 = vpop.permute.xlu1 %1732 }
  0xcc   : > { %4282 = vmatpush3.msra.mxu1 %v1500_v32  ;;  %v1742_v35 = vsel %vm6504_vm7, %v1731_v33, %v1733_v34  ;;  %4283 = vmatprep.mubr.msk.f32.mxu1 %vm4610_vm2, %v4590_v0 }
  0xcd   : > { %1754 = vmatprep.subr.mxu0 %v1742_v35  ;;  %4494 = vset.pattern.permute.xlu0 %v4625_v36  ;;  %v2479_v36 = vlaneseq }
  0xce   : > { %3033 = vperm.xlu0 %4494, %v4884_v9   ;;  %4505 = vset.pattern.permute.xlu1 %v4626_v37 }
  0xcf   : > { %v1729_v38 = vpop.permute.xlu0 %1728  ;;  %4284 = vmatmul.mubr.msk.f32.vlgmr.msra.gmra.mrb[6].mxu1 %vm6501_vm1, %v4215_v23  ;;  %v1735_v39 = vpop.permute.xlu1 %1734  ;;  %3363 = vperm.xlu1 %4505, %v4884_v9   ;;  %v4640_v23 = vmov 40  }
  0xd0   : > { %v1741_v41 = vsel %vm6504_vm7, %v1729_v38, %v1731_v33  ;;  %1889 = vmatprep.mubr.f32.mxu1 %v4590_v0  ;;  %v1743_v48 = vsel %vm6504_vm7, %v1733_v34, %v1735_v39  ;;  %v5100_v38 = vld [vmem:[%s6413_s1] sm:$0x1f] }
  0xd1   : > { %1755 = vmatpush1.msra.mxu0 %v1741_v41 }
  0xd2   : > { %4220 = vmatmul.mubr.msk.f32.vlgmr.msra.gmra.mrb[0].mxu0 %vm6501_vm1, %v4219_v40  ;;  %4286 = vmatprep.subr.mxu0 %v4590_v0 }
  0xd3   : > { %v1737_v42 = vpop.permute.xlu0 %1736  ;;  %v1739_v43 = vpop.permute.xlu1 %1738  ;;  %4288 = vmatprep.mubr.msk.f32.mxu0 %vm4610_vm2, %v4590_v0  ;;  %4497 = vset.pattern.permute.xlu0 %v4627_v44 }
  0xd4   : > { %v1745_v45 = vsel %vm6504_vm7, %v1737_v42, %v1739_v43  ;;  %v1744_v46 = vsel %vm6504_vm7, %v1735_v39, %v1737_v42  ;;  %3123 = vperm.xlu0 %4497, %v4884_v9   ;;  %4507 = vset.pattern.permute.xlu1 %v4628_v47 }
  0xd5   : > { %1825 = vmatprep.subr.mxu1 %v1744_v46  ;;  %4287 = vmatpush3.msra.mxu0 %v1745_v45 }
  0xd6   : > { %1826 = vmatpush1.msra.mxu1 %v1743_v48  ;;  %4289 = vmatmul.mubr.msk.f32.vlgmr.msra.gmra.mrb[8].mxu0 %vm6501_vm1, %v4219_v40 }
  0xd7   : > { %v1976_v49 = vpop.permute.xlu0 %1975  ;;  %v1978_v50 = vpop.permute.xlu1 %1977  ;;  %4221 = vmatmul.mubr.msk.f32.vlgmr.msra.gmra.mrb[0].mxu1 %vm6501_vm1, %v4219_v40  ;;  %2063 = vmatprep.mubr.f32.mxu0 %v4590_v0 }
  0xd8   : > { %v1987_v51 = vsel %vm6505_vm8, %v1976_v49, %v1978_v50  ;;  %2134 = vmatprep.mubr.f32.mxu1 %v4590_v0  ;;  %3423 = vperm.xlu1 %4507, %v4884_v9  }
  0xd9   : > { %1999 = vmatprep.subr.mxu0 %v1987_v51  ;;  %4500 = vset.pattern.permute.xlu0 %v4629_v52 }
  0xda   : > { %3213 = vperm.xlu0 %4500, %v4884_v9  }
  0xdb   : > { %v1974_v53 = vpop.permute.xlu0 %1973  ;;  %v1980_v54 = vpop.permute.xlu1 %1979 }
  0xdc   : > { %v1986_v56 = vsel %vm6505_vm8, %v1974_v53, %v1976_v49  ;;  %4508 = vset.pattern.permute.xlu1 %v4630_v57  ;;  %v1988_v62 = vsel %vm6505_vm8, %v1978_v50, %v1980_v54 }
  0xdd   : > { %2000 = vmatpush1.msra.mxu0 %v1986_v56  ;;  %3453 = vperm.xlu1 %4508, %v4884_v9  }
  0xde   : > { %4224 = vmatmul.mubr.msk.f32.vlgmr.msra.gmra.mrb[0].mxu0 %vm6501_vm1, %v4223_v55  ;;  %4503 = vset.pattern.permute.xlu0 %v4631_v58 }
  0xdf   : > { %v1982_v59 = vpop.permute.xlu0 %1981  ;;  %v1984_v60 = vpop.permute.xlu1 %1983  ;;  %2308 = vmatprep.mubr.f32.mxu0 %v4590_v0  ;;  %3303 = vperm.xlu0 %4503, %v4884_v9  }
  0xe0   : > { %v1989_v61 = vsel %vm6505_vm8, %v1980_v54, %v1982_v59  ;;  %v1990_v1 = vsel %vm6505_vm8, %v1982_v59, %v1984_v60 }
  0xe1   : > { %2070 = vmatprep.subr.mxu1 %v1989_v61  ;;  %4510 = vset.pattern.permute.xlu1 %v4632_v63 }
  0xe2   : > { %2071 = vmatpush1.msra.mxu1 %v1988_v62  ;;  %3513 = vperm.xlu1 %4510, %v4884_v9  }
  0xe3   : > { %v2221_v2 = vpop.permute.xlu0 %2220  ;;  %4225 = vmatmul.mubr.msk.f32.vlgmr.msra.gmra.mrb[0].mxu1 %vm6501_vm1, %v4223_v55  ;;  %4291 = vmatprep.subr.mxu1 %v4590_v0  ;;  %v2223_v3 = vpop.permute.xlu1 %2222 }
  0xe4   : > { %4292 = vmatpush3.msra.mxu1 %v1990_v1  ;;  %v2232_v4 = vsel %vm6506_vm9, %v2221_v2, %v2223_v3  ;;  %4293 = vmatprep.mubr.msk.f32.mxu1 %vm4610_vm2, %v4590_v0 }
  0xe5   : > { %2244 = vmatprep.subr.mxu0 %v2232_v4  ;;  %4506 = vset.pattern.permute.xlu0 %v4633_v5 }
  0xe6   : > { %3393 = vperm.xlu0 %4506, %v4884_v9   ;;  %4511 = vset.pattern.permute.xlu1 %v4634_v6 }
  0xe7   : > { %v2219_v7 = vpop.permute.xlu0 %2218  ;;  %4294 = vmatmul.mubr.msk.f32.vlgmr.msra.gmra.mrb[8].mxu1 %vm6501_vm1, %v4223_v55  ;;  %v2225_v10 = vpop.permute.xlu1 %2224  ;;  %3543 = vperm.xlu1 %4511, %v4884_v9  }
  0xe8   : > { %v2231_v12 = vsel %vm6506_vm9, %v2219_v7, %v2221_v2  ;;  %2379 = vmatprep.mubr.f32.mxu1 %v4590_v0  ;;  %v2233_v19 = vsel %vm6506_vm9, %v2223_v3, %v2225_v10 }
  0xe9   : > { %2245 = vmatpush1.msra.mxu0 %v2231_v12 }
  0xea   : > { %4228 = vmatmul.mubr.msk.f32.vlgmr.msra.gmra.mrb[0].mxu0 %vm6501_vm1, %v4227_v11  ;;  %4296 = vmatprep.subr.mxu0 %v4590_v0 }
  0xeb   : > { %v2227_v13 = vpop.permute.xlu0 %2226  ;;  %v2229_v14 = vpop.permute.xlu1 %2228  ;;  %4298 = vmatprep.mubr.msk.f32.mxu0 %vm4610_vm2, %v4590_v0  ;;  %4509 = vset.pattern.permute.xlu0 %v4635_v15 }
  0xec   : > { %v2235_v16 = vsel %vm6506_vm9, %v2227_v13, %v2229_v14  ;;  %v2234_v17 = vsel %vm6506_vm9, %v2225_v10, %v2227_v13  ;;  %3483 = vperm.xlu0 %4509, %v4884_v9   ;;  %4513 = vset.pattern.permute.xlu1 %v4636_v18 }
  0xed   : > { %2315 = vmatprep.subr.mxu1 %v2234_v17  ;;  %4297 = vmatpush3.msra.mxu0 %v2235_v16 }
  0xee   : > { %2316 = vmatpush1.msra.mxu1 %v2233_v19  ;;  %4299 = vmatmul.mubr.msk.f32.vlgmr.msra.gmra.mrb[10].mxu0 %vm6501_vm1, %v4227_v11 }
  0xef   : > { %4229 = vmatmul.mubr.msk.f32.vlgmr.msra.gmra.mrb[0].mxu1 %vm6501_vm1, %v4227_v11  ;;  %3603 = vperm.xlu1 %4513, %v4884_v9   ;;  %vm2905_vm1 = vcmask 818176  }
  0xf0   : > { %4512 = vset.pattern.permute.xlu0 %v4637_v20  ;;  %4037 = vmatprep.mubr.f32.mxu1 %v4590_v0 }
  0xf1   : > { %3573 = vperm.xlu0 %4512, %v4884_v9   ;;  %4301 = vmatprep.subr.mxu0 %v4590_v0 }
  0xf2   : > { %4303 = vmatprep.mubr.msk.f32.mxu0 %vm4610_vm2, %v4590_v0  ;;  %v4643_v0 = vmov 45   ;;  %vm2875_vm2 = vcmask 826368  }
  0xf3   : > { %4514 = vset.pattern.permute.xlu1 %v4638_v21 }
  0xf4   : > { %3633 = vperm.xlu1 %4514, %v4884_v9  }
  0xf5   : > { %4515 = vset.pattern.permute.xlu0 %v4639_v22 }
  0xf6   : > { %3663 = vperm.xlu0 %4515, %v4884_v9  }
  0xf8   : > { %4516 = vset.pattern.permute.xlu1 %v4640_v23 }
  0xf9   : > { %3693 = vperm.xlu1 %4516, %v4884_v9  }
  0xfa   : > { %4518 = vset.pattern.permute.xlu0 %v4641_v24 }
  0xfb   : > { %3757 = vperm.xlu0 %4518, %v4884_v9  }
  0xfc   : > { %v5085_v32 = vpop.permute.xlu0 %2560  ;;  %v5148_v17 = vpop.permute.xlu1 %2521 }
  0xfd   : > { %4517 = vset.pattern.permute.xlu1 %v4642_v25 }
  0xfe   : > { %3723 = vperm.xlu1 %4517, %v4884_v9  }
  0xff   : > { %4521 = vset.pattern.permute.xlu0 %v4643_v0 }
 0x100   : > { %3844 = vperm.xlu0 %4521, %v4884_v9  }
 0x101   : > { %v5087_v33 = vpop.permute.xlu0 %2589  ;;  %v5152_v22 = vpop.permute.xlu1 %2531 }
 0x102   : > { %4519 = vset.pattern.permute.xlu1 %v4644_v26 }
 0x103   : > { %3786 = vperm.xlu1 %4519, %v4884_v9  }
 0x104   : > { %4524 = vset.pattern.permute.xlu0 %v4645_v27 }
 0x105   : > { %3934 = vperm.xlu0 %4524, %v4884_v9  }
 0x106   : > { %v5089_v34 = vpop.permute.xlu0 %2619  ;;  %v5156_v24 = vpop.permute.xlu1 %2974 }
 0x107   : > { %4520 = vset.pattern.permute.xlu1 %v4646_v28 }
 0x108   : > { %3815 = vperm.xlu1 %4520, %v4884_v9  }
 0x109   : > { %4525 = vset.pattern.permute.xlu0 %v4597_v8  ;;  %v5095_v8 = vshrl.u32 %v2479_v36, 7 }
 0x10a   : > { %2464 = vperm.xlu0 %4525, %v2461_v29  }
 0x10b   : > { %v5091_v35 = vpop.permute.xlu0 %2649  ;;  %v2493_v41 = vsub.s32 3, %v5095_v8  ;;  %v2497_v42 = vsub.s32 4, %v5095_v8  ;;  %v5160_v0 = vpop.permute.xlu1 %3003  ;;  %v2481_v27 = vsub.s32 0, %v5095_v8 }
 0x10c   : > { %4522 = vset.pattern.permute.xlu1 %v4647_v30 }
 0x10d   : > { %3874 = vperm.xlu1 %4522, %v4884_v9   ;;  %v5111_v43 = vrot.slane %v5100_v38, %v2493_v41  ;;  %v5114_v44 = vrot.slane %v5100_v38, %v2497_v42 }
 0x110   : > { %v5093_v37 = vpop.permute.xlu0 %2679 }
 0x111   : > { %4523 = vset.pattern.permute.xlu1 %v4648_v31 }
 0x112   : > { %3904 = vperm.xlu1 %4523, %v4884_v9   ;;  %v2485_v9 = vsub.s32 1, %v5095_v8 }
 0x114   : > { %v5104_v39 = vrot.slane %v5100_v38, %v2485_v9  ;;  %v2482_v9 = vrot.slane %v5100_v38, %v2481_v27 }
 0x115   : > { %v5106_v40 = vpop.permute.xlu0 %2709 }
 0x120   : > { %v5116_v45 = vpop.permute.xlu0 %2738 }
 0x125   : > { %v5118_v46 = vpop.permute.xlu0 %2767 }
 0x12c   : > { %v5120_v47 = vpop.permute.xlu0 %2796 }
 0x131   : > { %v5122_v48 = vpop.permute.xlu0 %2826 }
 0x136   : > { %v5124_v49 = vpop.permute.xlu0 %2856 }
 0x13b   : > { %v5126_v50 = vpop.permute.xlu0 %2886 }
 0x141   : > { %v5128_v51 = vpop.permute.xlu0 %2916 }
 0x146   : > { %v5130_v54 = vpop.permute.xlu0 %2945 }
 0x14d   : > { %v5132_v55 = vpop.permute.xlu0 %3033 }
 0x153   : > { %v5134_v61 = vpop.permute.xlu0 %3123 }
 0x159   : > { %v5136_v63 = vpop.permute.xlu0 %3213 }
 0x15e   : > { %v5138_v3 = vpop.permute.xlu0 %3303 }
 0x165   : > { %v5140_v6 = vpop.permute.xlu0 %3393 }
 0x16b   : > { %v5142_v11 = vpop.permute.xlu0 %3483 }
 0x16e   : > { %v527_v52 = vpop.f32.mrb[2].mxu0 }
 0x16f   : > { %v4260_v53 = vpop.f32.mrb[3].mxu0 }
 0x170   : > { %v5144_v12 = vpop.permute.xlu0 %3573 }
 0x171   : > { %6521 = vst [vmem:[#allocation6_spill] sm:$0xff] %v5144_v12 }
 0x175   : > { %v5146_v15 = vpop.permute.xlu0 %3663 }
 0x176   : > { %6522 = vst [vmem:[#allocation7_spill] sm:$0xff] %v5146_v15 }
 0x17a   : > { %v742_v56 = vpop.f32.mrb[2].mxu1  ;;  %v5150_v19 = vpop.permute.xlu0 %3757 }
 0x17b   : > { %v743_v57 = vadd.f32 %v742_v56, %v527_v52  ;;  %v4265_v58 = vpop.f32.mrb[3].mxu1  ;;  %6523 = vst [vmem:[#allocation8_spill] sm:$0xff] %v5150_v19  ;;  %v2489_v52 = vsub.s32 2, %v5095_v8  ;;  %v5165_v56 = vpop.permute.xlu1 %3063 }
 0x17e   : > { %v982_v59 = vpop.f32.mrb[4].mxu0 }
 0x17f   : > { %v990_v60 = vadd.f32 %v982_v59, %v743_v57  ;;  %v4270_v62 = vpop.f32.mrb[5].mxu0  ;;  %v5154_v23 = vpop.permute.xlu0 %3844 }
 0x180   : > { %6524 = vst [vmem:[#allocation9_spill] sm:$0xff] %v5154_v23 }
 0x184   : > { %v5158_v25 = vpop.permute.xlu0 %3934 }
 0x185   : > { %6525 = vst [vmem:[#allocation10_spill] sm:$0xff] %v5158_v25 }
 0x189   : > { %v2465_v29 = vpop.permute.xlu0 %2464 }
 0x18a   : > { %v1227_v1 = vpop.f32.mrb[4].mxu1 }
 0x18b   : > { %v1235_v2 = vadd.f32 %v1227_v1, %v990_v60  ;;  %v4275_v4 = vpop.f32.mrb[5].mxu1 }
 0x18c   : > { %v2490_v4 = vrot.slane %v5100_v38, %v2489_v52  ;;  %v5181_v38 = vpop.permute.xlu1 %3093 }
 0x191   : > { %v1472_v5 = vpop.f32.mrb[6].mxu0 }
 0x192   : > { %v1480_v7 = vadd.f32 %v1472_v5, %v1235_v2  ;;  %v4280_v10 = vpop.f32.mrb[7].mxu0 }
 0x1a2   : > { %v1717_v13 = vpop.f32.mrb[6].mxu1 }
 0x1a3   : > { %v1725_v14 = vadd.f32 %v1717_v13, %v1480_v7  ;;  %v4285_v16 = vpop.f32.mrb[7].mxu1 }
 0x1a9   : > { %v1962_v18 = vpop.f32.mrb[8].mxu0 }
 0x1aa   : > { %v1970_v20 = vadd.f32 %v1962_v18, %v1725_v14  ;;  %v4290_v21 = vpop.f32.mrb[9].mxu0 }
 0x1ba   : > { %v2207_v26 = vpop.f32.mrb[8].mxu1 }
 0x1bb   : > { %v2215_v28 = vadd.f32 %v2207_v26, %v1970_v20  ;;  %v4295_v30 = vpop.f32.mrb[9].mxu1 }
 0x1bc   : > { %v5199_v30 = vpop.permute.xlu1 %3153 }
 0x1bd   : > { %v2310_v31 = vpop.f32.mrb[0].mxu0 }
 0x1be   : > { %v2467_v36 = vadd.f32 %v2465_v29, %v2310_v31  ;;  %v2312_v41 = vpop.f32.mrb[1].mxu0 }
 0x1bf   : > { %v2468_v42 = vadd.f32 %v2465_v29, %v2312_v41 }
 0x1c0   : > { %v2472_v53 = vmax.f32 %v2467_v36, 0.0  ;;  %v5209_v36 = vpop.permute.xlu1 %3183 }
 0x1c1   : > { %v2473_v57 = vmax.f32 %v2468_v42, 0.0  ;;  %v2452_v58 = vpop.f32.mrb[10].mxu0 }
 0x1c2   : > { %v5167_v59 = vmul.f32 %v2482_v9, %v2472_v53  ;;  %v2460_v60 = vadd.f32 %v2452_v58, %v2215_v28  ;;  %v2381_v62 = vpop.f32.mrb[0].mxu1  ;;  %v4300_v1 = vpop.f32.mrb[11].mxu0 }
 0x1c3   : > { %v5170_v2 = vmul.f32 %v5104_v39, %v2473_v57  ;;  %v2469_v5 = vadd.f32 %v2465_v29, %v2381_v62  ;;  %v2383_v7 = vpop.f32.mrb[1].mxu1 }
 0x1c4   : > { %v2471_v10 = vadd.f32 %v2465_v29, %v2460_v60  ;;  %v2470_v13 = vadd.f32 %v2465_v29, %v2383_v7  ;;  %v2563_v8 = vmul.f32 %v5085_v32, %v5167_v59  ;;  %v2534_v16 = vmul.f32 %v5152_v22, %v5167_v59  ;;  %v5221_v53 = vpop.permute.xlu1 %3243 }
 0x1c5   : > { %v2474_v14 = vmax.f32 %v2469_v5, 0.0  ;;  %v2592_v27 = vmul.f32 %v5087_v33, %v5167_v59  ;;  %v2622_v29 = vmul.f32 %v5089_v34, %v5167_v59  ;;  %v2682_v9 = vmul.f32 %v5093_v37, %v5167_v59 }
 0x1c6   : > { %v2476_v18 = vmax.f32 %v2471_v10, 0.0  ;;  %v2475_v20 = vmax.f32 %v2470_v13, 0.0  ;;  %2571 = vrot.lane.b32.xlu1 %v2563_v8, %s4592_s19  ;;  %2542 = vrot.lane.b32.xlu0 %v2534_v16, %s4591_s18  ;;  %v2712_v42 = vmul.f32 %v5106_v40, %v5167_v59  ;;  %v2741_v57 = vmul.f32 %v5116_v45, %v5167_v59 }
 0x1c7   : > { %v5178_v21 = vmul.f32 %v2490_v4, %v2474_v14  ;;  %v2770_v62 = vmul.f32 %v5118_v46, %v5167_v59  ;;  %v2799_v4 = vmul.f32 %v5120_v47, %v5167_v59  ;;  %v2829_v10 = vmul.f32 %v5122_v48, %v5167_v59 }
 0x1c8   : > { %v5184_v39 = vmul.f32 %v5114_v44, %v2476_v18  ;;  %v5187_v26 = vmul.f32 %v5111_v43, %v2475_v20  ;;  %v2652_v43 = vmul.f32 %v5091_v35, %v5167_v59  ;;  %v5231_v60 = vpop.permute.xlu1 %3273  ;;  %v2859_v14 = vmul.f32 %v5124_v49, %v5167_v59 }
 0x1c9   : > { %v2536_v28 = vmul.f32 %v5152_v22, %v5178_v21  ;;  %v2565_v44 = vmul.f32 %v5085_v32, %v5178_v21  ;;  %v2594_v31 = vmul.f32 %v5087_v33, %v5178_v21  ;;  %v2624_v41 = vmul.f32 %v5089_v34, %v5178_v21 }
 0x1ca   : > { %6526 = vst [vmem:[#allocation11_spill] sm:$0xff] %v5184_v39  ;;  %2600 = vrot.lane.b32.xlu1 %v2592_v27, %s4649_s9  ;;  %v2654_v52 = vmul.f32 %v5091_v35, %v5178_v21  ;;  %v2684_v58 = vmul.f32 %v5093_v37, %v5178_v21  ;;  %v2714_v1 = vmul.f32 %v5106_v40, %v5178_v21 }
 0x1cb   : > { %2546 = vrot.lane.b32.xlu0 %v2536_v28, %s4591_s18  ;;  %v2743_v5 = vmul.f32 %v5116_v45, %v5178_v21  ;;  %v2772_v13 = vmul.f32 %v5118_v46, %v5178_v21  ;;  %v2801_v16 = vmul.f32 %v5120_v47, %v5178_v21  ;;  %v2889_v18 = vmul.f32 %v5126_v50, %v5167_v59 }
 0x1cc   : > { %v5243_v7 = vpop.permute.xlu1 %3333  ;;  %v2831_v20 = vmul.f32 %v5122_v48, %v5178_v21  ;;  %v2919_v28 = vmul.f32 %v5128_v51, %v5167_v59  ;;  %v3246_v39 = vmul.f32 %v5221_v53, %v5167_v59 }
 0x1ce   : > { %2630 = vrot.lane.b32.xlu1 %v2622_v29, %s6441_s13  ;;  %v2861_v29 = vmul.f32 %v5124_v49, %v5178_v21 }
 0x1cf   : > { %2575 = vrot.lane.b32.xlu0 %v2565_v44, %s4592_s19 }
 0x1d0   : > { %v5253_v8 = vpop.permute.xlu1 %3363 }
 0x1d2   : > { %2660 = vrot.lane.b32.xlu1 %v2652_v43, %s6436_s14  ;;  %v2950_v43 = vmul.f32 %v5130_v54, %v5178_v21 }
 0x1d3   : > { %2604 = vrot.lane.b32.xlu0 %v2594_v31, %s4649_s9  ;;  %v2891_v31 = vmul.f32 %v5126_v50, %v5178_v21 }
 0x1d4   : > { %v5265_v27 = vpop.permute.xlu1 %3423 }
 0x1d6   : > { %2690 = vrot.lane.b32.xlu1 %v2682_v9, %s6434_s15  ;;  %v2979_v9 = vmul.f32 %v5156_v24, %v5178_v21 }
 0x1d7   : > { %2634 = vrot.lane.b32.xlu0 %v2624_v41, %s6441_s13  ;;  %v2921_v41 = vmul.f32 %v5128_v51, %v5178_v21 }
 0x1d8   : > { %v5275_v44 = vpop.permute.xlu1 %3453 }
 0x1da   : > { %2720 = vrot.lane.b32.xlu1 %v2712_v42, %s4593_s20 }
 0x1db   : > { %2664 = vrot.lane.b32.xlu0 %v2654_v52, %s6436_s14  ;;  %v3008_v52 = vmul.f32 %v5160_v0, %v5178_v21 }
 0x1dc   : > { %v5287_v42 = vpop.permute.xlu1 %3513 }
 0x1dd   : > { %6527 = vst [vmem:[#allocation12_spill] sm:$0xff] %v5287_v42 }
 0x1de   : > { %2749 = vrot.lane.b32.xlu1 %v2741_v57, %s6420_s21  ;;  %v2948_v57 = vmul.f32 %v5130_v54, %v5167_v59 }
 0x1df   : > { %2694 = vrot.lane.b32.xlu0 %v2684_v58, %s6434_s15 }
 0x1e0   : > { %v5297_v58 = vpop.permute.xlu1 %3543 }
 0x1e1   : > { %6528 = vst [vmem:[#allocation13_spill] sm:$0xff] %v5297_v58 }
 0x1e2   : > { %2778 = vrot.lane.b32.xlu1 %v2770_v62, %s6422_s22  ;;  %v3038_v62 = vmul.f32 %v5132_v55, %v5178_v21 }
 0x1e3   : > { %2724 = vrot.lane.b32.xlu0 %v2714_v1, %s4593_s20  ;;  %v2977_v1 = vmul.f32 %v5156_v24, %v5167_v59 }
 0x1e6   : > { %2807 = vrot.lane.b32.xlu1 %v2799_v4, %s4653_s16  ;;  %v3068_v4 = vmul.f32 %v5165_v56, %v5178_v21 }
 0x1e7   : > { %2753 = vrot.lane.b32.xlu0 %v2743_v5, %s6420_s21  ;;  %s6424_s21 = smov 101   ;;  %v3006_v5 = vmul.f32 %v5160_v0, %v5167_v59 }
 0x1ea   : > { %2837 = vrot.lane.b32.xlu1 %v2829_v10, %s6432_s17  ;;  %v5309_v10 = vpop.permute.xlu1 %3603 }
 0x1eb   : > { %2782 = vrot.lane.b32.xlu0 %v2772_v13, %s6422_s22  ;;  %s6430_s22 = smov 100   ;;  %6529 = vst [vmem:[#allocation14_spill] sm:$0xff] %v5309_v10  ;;  %v3098_v13 = vmul.f32 %v5181_v38, %v5178_v21 }
 0x1ee   : > { %2867 = vrot.lane.b32.xlu1 %v2859_v14, %s6424_s21  ;;  %v3036_v14 = vmul.f32 %v5132_v55, %v5167_v59 }
 0x1ef   : > { %2811 = vrot.lane.b32.xlu0 %v2801_v16, %s4653_s16  ;;  %v5319_v16 = vpop.permute.xlu1 %3633 }
 0x1f0   : > { %6530 = vst [vmem:[#allocation15_spill] sm:$0xff] %v5319_v16 }
 0x1f2   : > { %2897 = vrot.lane.b32.xlu1 %v2889_v18, %s6430_s22  ;;  %v3128_v18 = vmul.f32 %v5134_v61, %v5178_v21 }
 0x1f3   : > { %2841 = vrot.lane.b32.xlu0 %v2831_v20, %s6432_s17  ;;  %v3066_v20 = vmul.f32 %v5165_v56, %v5167_v59  ;;  %s4661_s17 = smov 62  }
 0x1f6   : > { %2927 = vrot.lane.b32.xlu1 %v2919_v28, %s6426_s23  ;;  %v2535_v28 = vmul.f32 %v5152_v22, %v5170_v2 }
 0x1f7   : > { %2871 = vrot.lane.b32.xlu0 %v2861_v29, %s6424_s21  ;;  %s4657_s21 = smov 81   ;;  %v3096_v29 = vmul.f32 %v5181_v38, %v5167_v59 }
 0x1fa   : > { %2960 = vrot.lane.b32.xlu1 %v2950_v43, %s6428_s29  ;;  %v5331_v43 = vpop.permute.xlu1 %3693 }
 0x1fb   : > { %2901 = vrot.lane.b32.xlu0 %v2891_v31, %s6430_s22  ;;  %s4660_s22 = smov 78   ;;  %6531 = vst [vmem:[#allocation16_spill] sm:$0xff] %v5331_v43  ;;  %v2537_v31 = vmul.f32 %v5152_v22, %v5187_v26  ;;  %v2566_v22 = vmul.f32 %v5085_v32, %v5187_v26 }
 0x1fe   : > { %2989 = vrot.lane.b32.xlu1 %v2979_v9, %s4600_s8  ;;  %v2978_v9 = vmul.f32 %v5156_v24, %v5170_v2 }
 0x1ff   : > { %2931 = vrot.lane.b32.xlu0 %v2921_v41, %s6426_s23  ;;  %s4658_s23 = smov 80   ;;  %v5341_v41 = vpop.permute.xlu1 %3723 }
 0x200   : > { %6532 = vst [vmem:[#allocation17_spill] sm:$0xff] %v5341_v41 }
 0x202   : > { %3018 = vrot.lane.b32.xlu1 %v3008_v52, %s4657_s21  ;;  %v2564_v52 = vmul.f32 %v5085_v32, %v5170_v2 }
 0x203   : > { %2956 = vrot.lane.b32.xlu0 %v2948_v57, %s6428_s29  ;;  %s4659_s29 = smov 79   ;;  %v3007_v57 = vmul.f32 %v5160_v0, %v5170_v2 }
 0x206   : > { %3048 = vrot.lane.b32.xlu1 %v3038_v62, %s4658_s23  ;;  %v3037_v62 = vmul.f32 %v5132_v55, %v5170_v2 }
 0x207   : > { %2985 = vrot.lane.b32.xlu0 %v2977_v1, %s4600_s8  ;;  %v5353_v1 = vpop.permute.xlu1 %3786 }
 0x20a   : > { %3078 = vrot.lane.b32.xlu1 %v3068_v4, %s4659_s29  ;;  %v2593_v4 = vmul.f32 %v5087_v33, %v5170_v2 }
 0x20b   : > { %3014 = vrot.lane.b32.xlu0 %v3006_v5, %s4657_s21  ;;  %v3067_v5 = vmul.f32 %v5165_v56, %v5170_v2  ;;  %v5363_v32 = vpop.permute.xlu1 %3815 }
 0x20e   : > { %3108 = vrot.lane.b32.xlu1 %v3098_v13, %s4660_s22  ;;  %v2595_v13 = vmul.f32 %v5087_v33, %v5187_v26  ;;  %v2625_v33 = vmul.f32 %v5089_v34, %v5187_v26 }
 0x20f   : > { %3044 = vrot.lane.b32.xlu0 %v3036_v14, %s4658_s23  ;;  %v3097_v14 = vmul.f32 %v5181_v38, %v5170_v2 }
 0x212   : > { %3138 = vrot.lane.b32.xlu1 %v3128_v18, %s4661_s17  ;;  %v2623_v18 = vmul.f32 %v5089_v34, %v5170_v2 }
 0x213   : > { %3074 = vrot.lane.b32.xlu0 %v3066_v20, %s4659_s29  ;;  %v3127_v20 = vmul.f32 %v5134_v61, %v5170_v2 }
 0x216   : > { %2544 = vrot.lane.b32.xlu1 %v2535_v28, %s4591_s18  ;;  %v5375_v28 = vpop.permute.xlu1 %3874 }
 0x217   : > { %3104 = vrot.lane.b32.xlu0 %v3096_v29, %s4660_s22  ;;  %6533 = vst [vmem:[#allocation18_spill] sm:$0xff] %v5375_v28  ;;  %v3126_v29 = vmul.f32 %v5134_v61, %v5167_v59 }
 0x21a   : > { %2548 = vrot.lane.b32.xlu1 %v2537_v31, %s4591_s18  ;;  %v5385_v31 = vpop.permute.xlu1 %3904  ;;  %s4662_s18 = smov 61  }
 0x21b   : > { %2987 = vrot.lane.b32.xlu0 %v2978_v9, %s4600_s8  ;;  %6534 = vst [vmem:[#allocation19_spill] sm:$0xff] %v5385_v31  ;;  %v2653_v9 = vmul.f32 %v5091_v35, %v5170_v2  ;;  %v3277_v31 = vmul.f32 %v5231_v60, %v5170_v2 }
 0x21e   : > { %2573 = vrot.lane.b32.xlu1 %v2564_v52, %s4592_s19  ;;  %v3157_v52 = vmul.f32 %v5199_v30, %v5170_v2 }
 0x21f   : > { %3016 = vrot.lane.b32.xlu0 %v3007_v57, %s4657_s21  ;;  %v2655_v57 = vmul.f32 %v5091_v35, %v5187_v26 }
 0x222   : > { %2577 = vrot.lane.b32.xlu1 %v2566_v22, %s4592_s19  ;;  %s4663_s19 = smov 60  }
 0x223   : > { %3046 = vrot.lane.b32.xlu0 %v3037_v62, %s4658_s23  ;;  %v3156_v62 = vmul.f32 %v5199_v30, %v5167_v59 }
 0x226   : > { %2602 = vrot.lane.b32.xlu1 %v2593_v4, %s4649_s9 }
 0x227   : > { %3076 = vrot.lane.b32.xlu0 %v3067_v5, %s4659_s29  ;;  %v2683_v5 = vmul.f32 %v5093_v37, %v5170_v2 }
 0x22a   : > { %2606 = vrot.lane.b32.xlu1 %v2595_v13, %s4649_s9  ;;  %s4664_s9 = smov 59  }
 0x22b   : > { %3106 = vrot.lane.b32.xlu0 %v3097_v14, %s4660_s22  ;;  %v3187_v14 = vmul.f32 %v5209_v36, %v5170_v2 }
 0x22e   : > { %2632 = vrot.lane.b32.xlu1 %v2623_v18, %s6441_s13  ;;  %v2685_v18 = vmul.f32 %v5093_v37, %v5187_v26 }
 0x22f   : > { %3136 = vrot.lane.b32.xlu0 %v3127_v20, %s4661_s17 }
 0x232   : > { %2636 = vrot.lane.b32.xlu1 %v2625_v33, %s6441_s13  ;;  %v3186_v33 = vmul.f32 %v5209_v36, %v5167_v59  ;;  %s6449_s13 = smov 57  }
 0x233   : > { %3134 = vrot.lane.b32.xlu0 %v3126_v29, %s4661_s17 }
 0x236   : > { %2662 = vrot.lane.b32.xlu1 %v2653_v9, %s6436_s14  ;;  %v2713_v9 = vmul.f32 %v5106_v40, %v5170_v2 }
 0x237   : > { %3166 = vrot.lane.b32.xlu0 %v3157_v52, %s4662_s18 }
 0x238   : > { %v5393_v34 = vpop.permute.xlu1 %2571  ;;  %v5397_v22 = vpop.permute.xlu0 %2542 }
 0x23a   : > { %2666 = vrot.lane.b32.xlu1 %v2655_v57, %s6436_s14  ;;  %v3217_v57 = vmul.f32 %v5136_v63, %v5170_v2  ;;  %s4665_s14 = smov 58  }
 0x23b   : > { %3164 = vrot.lane.b32.xlu0 %v3156_v62, %s4662_s18  ;;  %v2715_v62 = vmul.f32 %v5106_v40, %v5187_v26 }
 0x23c   : > { %v5403_v4 = vpop.permute.xlu1 %2600 }
 0x23d   : > { %v5407_v13 = vpop.permute.xlu0 %2546 }
 0x23e   : > { %2692 = vrot.lane.b32.xlu1 %v2683_v5, %s6434_s15 }
 0x23f   : > { %3196 = vrot.lane.b32.xlu0 %v3187_v14, %s4663_s19  ;;  %v3216_v14 = vmul.f32 %v5136_v63, %v5167_v59 }
 0x240   : > { %v5413_v35 = vpop.permute.xlu1 %2630 }
 0x241   : > { %v5417_v20 = vpop.permute.xlu0 %2575 }
 0x242   : > { %2696 = vrot.lane.b32.xlu1 %v2685_v18, %s6434_s15  ;;  %s6538_s15 = smov 105  }
 0x243   : > { %3194 = vrot.lane.b32.xlu0 %v3186_v33, %s4663_s19  ;;  %v2742_v33 = vmul.f32 %v5116_v45, %v5170_v2 }
 0x244   : > { %v5423_v29 = vpop.permute.xlu1 %2660 }
 0x245   : > { %v5427_v52 = vpop.permute.xlu0 %2604 }
 0x246   : > { %6535 = vst [vmem:[#allocation20_spill] sm:$0xff] %v5427_v52  ;;  %2722 = vrot.lane.b32.xlu1 %v2713_v9, %s4593_s20  ;;  %v3367_v52 = vmul.f32 %v5253_v8, %v5170_v2 }
 0x247   : > { %3226 = vrot.lane.b32.xlu0 %v3217_v57, %s4664_s9  ;;  %v3247_v57 = vmul.f32 %v5221_v53, %v5170_v2 }
 0x248   : > { %v5433_v37 = vpop.permute.xlu1 %2690 }
 0x249   : > { %v5437_v5 = vpop.permute.xlu0 %2634 }
 0x24a   : > { %6536 = vst [vmem:[#allocation21_spill] sm:$0xff] %v5437_v5  ;;  %2726 = vrot.lane.b32.xlu1 %v2715_v62, %s4593_s20  ;;  %v2744_v62 = vmul.f32 %v5116_v45, %v5187_v26  ;;  %s6541_s20 = smov 104   ;;  %v3337_v5 = vmul.f32 %v5243_v7, %v5170_v2 }
 0x24b   : > { %3224 = vrot.lane.b32.xlu0 %v3216_v14, %s4664_s9 }
 0x24c   : > { %v5443_v18 = vpop.permute.xlu1 %2720 }
 0x24d   : > { %v5447_v9 = vpop.permute.xlu0 %2664 }
 0x24e   : > { %6537 = vst [vmem:[#allocation22_spill] sm:$0xff] %v5447_v9  ;;  %2751 = vrot.lane.b32.xlu1 %v2742_v33, %s6538_s15  ;;  %v2771_v33 = vmul.f32 %v5118_v46, %v5170_v2  ;;  %v3307_v9 = vmul.f32 %v5138_v3, %v5170_v2 }
 0x24f   : > { %3256 = vrot.lane.b32.xlu0 %v3247_v57, %s4665_s14 }
 0x250   : > { %v5453_v40 = vpop.permute.xlu1 %2749 }
 0x251   : > { %v5457_v14 = vpop.permute.xlu0 %2694 }
 0x252   : > { %6539 = vst [vmem:[#allocation23_spill] sm:$0xff] %v5457_v14  ;;  %2755 = vrot.lane.b32.xlu1 %v2744_v62, %s6538_s15  ;;  %v3276_v14 = vmul.f32 %v5231_v60, %v5167_v59  ;;  %s6454_s15 = smov 56  }
 0x253   : > { %3254 = vrot.lane.b32.xlu0 %v3246_v39, %s4665_s14  ;;  %v2773_v39 = vmul.f32 %v5118_v46, %v5187_v26 }
 0x254   : > { %v5463_v25 = vpop.permute.xlu1 %2778 }
 0x255   : > { %v5467_v57 = vpop.permute.xlu0 %2724 }
 0x256   : > { %6540 = vst [vmem:[#allocation24_spill] sm:$0xff] %v5467_v57  ;;  %2780 = vrot.lane.b32.xlu1 %v2771_v33, %s6541_s20  ;;  %v2800_v33 = vmul.f32 %v5120_v47, %v5170_v2 }
 0x257   : > { %3286 = vrot.lane.b32.xlu0 %v3277_v31, %s6449_s13 }
 0x258   : > { %v5473_v45 = vpop.permute.xlu1 %2807 }
 0x259   : > { %v5477_v62 = vpop.permute.xlu0 %2753 }
 0x25a   : > { %6542 = vst [vmem:[#allocation25_spill] sm:$0xff] %v5477_v62  ;;  %2784 = vrot.lane.b32.xlu1 %v2773_v39, %s6541_s20  ;;  %v3306_v62 = vmul.f32 %v5138_v3, %v5167_v59  ;;  %s6546_s20 = smov 102  }
 0x25b   : > { %3284 = vrot.lane.b32.xlu0 %v3276_v14, %s6449_s13  ;;  %v2802_v14 = vmul.f32 %v5120_v47, %v5187_v26  ;;  %s6459_s13 = smov 40  }
 0x25c   : > { %v5483_v57 = vpop.permute.xlu1 %2837 }
 0x25d   : > { %v5487_v31 = vpop.permute.xlu0 %2782 }
 0x25e   : > { %6543 = vst [vmem:[#allocation26_spill] sm:$0xff] %v5487_v31  ;;  %2809 = vrot.lane.b32.xlu1 %v2800_v33, %s4653_s16  ;;  %v2830_v33 = vmul.f32 %v5122_v48, %v5170_v2 }
 0x25f   : > { %3316 = vrot.lane.b32.xlu0 %v3307_v9, %s6454_s15 }
 0x260   : > { %v5493_v46 = vpop.permute.xlu1 %2867 }
 0x261   : > { %v5497_v39 = vpop.permute.xlu0 %2811 }
 0x262   : > { %6544 = vst [vmem:[#allocation27_spill] sm:$0xff] %v5497_v39  ;;  %2813 = vrot.lane.b32.xlu1 %v2802_v14, %s4653_s16  ;;  %v3336_v39 = vmul.f32 %v5243_v7, %v5167_v59  ;;  %s6550_s16 = smov 101  }
 0x263   : > { %3314 = vrot.lane.b32.xlu0 %v3306_v62, %s6454_s15  ;;  %v2832_v62 = vmul.f32 %v5122_v48, %v5187_v26  ;;  %s6464_s15 = smov 39  }
 0x264   : > { %v5503_v31 = vpop.permute.xlu1 %2897 }
 0x265   : > { %v5507_v9 = vpop.permute.xlu0 %2841 }
 0x266   : > { %6545 = vst [vmem:[#allocation28_spill] sm:$0xff] %v5507_v9  ;;  %2839 = vrot.lane.b32.xlu1 %v2830_v33, %s6546_s20  ;;  %v2860_v33 = vmul.f32 %v5124_v49, %v5170_v2 }
 0x267   : > { %3346 = vrot.lane.b32.xlu0 %v3337_v5, %s6459_s13 }
 0x268   : > { %v5513_v47 = vpop.permute.xlu1 %2927 }
 0x269   : > { %v5517_v14 = vpop.permute.xlu0 %2871 }
 0x26a   : > { %6547 = vst [vmem:[#allocation29_spill] sm:$0xff] %v5517_v14  ;;  %2843 = vrot.lane.b32.xlu1 %v2832_v62, %s6546_s20  ;;  %s6554_s20 = smov 100  }
 0x26b   : > { %3344 = vrot.lane.b32.xlu0 %v3336_v39, %s6459_s13  ;;  %v2862_v39 = vmul.f32 %v5124_v49, %v5187_v26  ;;  %s6469_s13 = smov 38  }
 0x26c   : > { %v5523_v9 = vpop.permute.xlu1 %2960 }
 0x26d   : > { %6548 = vst [vmem:[#allocation30_spill] sm:$0xff] %v5523_v9  ;;  %v5527_v5 = vpop.permute.xlu0 %2901  ;;  %v3366_v9 = vmul.f32 %v5253_v8, %v5167_v59 }
 0x26e   : > { %6549 = vst [vmem:[#allocation31_spill] sm:$0xff] %v5527_v5  ;;  %2869 = vrot.lane.b32.xlu1 %v2860_v33, %s6550_s16  ;;  %v2890_v33 = vmul.f32 %v5126_v50, %v5170_v2 }
 0x26f   : > { %3376 = vrot.lane.b32.xlu0 %v3367_v52, %s6464_s15 }
 0x270   : > { %v5533_v48 = vpop.permute.xlu1 %2989 }
 0x271   : > { %6551 = vst [vmem:[#allocation32_spill] sm:$0xff] %v5533_v48  ;;  %v5537_v62 = vpop.permute.xlu0 %2931  ;;  %v3397_v48 = vmul.f32 %v5140_v6, %v5170_v2 }
 0x272   : > { %6552 = vst [vmem:[#allocation33_spill] sm:$0xff] %v5537_v62  ;;  %2873 = vrot.lane.b32.xlu1 %v2862_v39, %s6550_s16  ;;  %s6558_s16 = smov 84  }
 0x273   : > { %3374 = vrot.lane.b32.xlu0 %v3366_v9, %s6464_s15  ;;  %v2892_v9 = vmul.f32 %v5126_v50, %v5187_v26  ;;  %s4671_s15 = smov 37  }
 0x274   : > { %v5543_v5 = vpop.permute.xlu1 %3018 }
 0x275   : > { %6553 = vst [vmem:[#allocation34_spill] sm:$0xff] %v5543_v5  ;;  %v5547_v52 = vpop.permute.xlu0 %2956  ;;  %v3396_v5 = vmul.f32 %v5140_v6, %v5167_v59 }
 0x276   : > { %2899 = vrot.lane.b32.xlu1 %v2890_v33, %s6554_s20  ;;  %v2920_v33 = vmul.f32 %v5128_v51, %v5170_v2 }
 0x277   : > { %3406 = vrot.lane.b32.xlu0 %v3397_v48, %s6469_s13 }
 0x278   : > { %v5553_v49 = vpop.permute.xlu1 %3048 }
 0x279   : > { %6555 = vst [vmem:[#allocation35_spill] sm:$0xff] %v5553_v49  ;;  %v5557_v39 = vpop.permute.xlu0 %2985  ;;  %v3427_v49 = vmul.f32 %v5265_v27, %v5170_v2 }
 0x27a   : > { %2903 = vrot.lane.b32.xlu1 %v2892_v9, %s6554_s20  ;;  %s6563_s20 = smov 83  }
 0x27b   : > { %3404 = vrot.lane.b32.xlu0 %v3396_v5, %s6469_s13  ;;  %v2922_v5 = vmul.f32 %v5128_v51, %v5187_v26  ;;  %s4672_s13 = smov 36  }
 0x27c   : > { %v5563_v62 = vpop.permute.xlu1 %3078 }
 0x27d   : > { %6556 = vst [vmem:[#allocation36_spill] sm:$0xff] %v5563_v62  ;;  %v5567_v48 = vpop.permute.xlu0 %3014  ;;  %v3426_v62 = vmul.f32 %v5265_v27, %v5167_v59 }
 0x27e   : > { %6557 = vst [vmem:[#allocation37_spill] sm:$0xff] %v5567_v48  ;;  %2929 = vrot.lane.b32.xlu1 %v2920_v33, %s6558_s16  ;;  %v2949_v33 = vmul.f32 %v5130_v54, %v5170_v2  ;;  %v3517_v48 = vmul.f32 %v5287_v42, %v5170_v2 }
 0x27f   : > { %3436 = vrot.lane.b32.xlu0 %v3427_v49, %s4671_s15 }
 0x280   : > { %v5573_v50 = vpop.permute.xlu1 %3108 }
 0x281   : > { %6559 = vst [vmem:[#allocation38_spill] sm:$0xff] %v5573_v50  ;;  %v5577_v9 = vpop.permute.xlu0 %3044  ;;  %v3457_v50 = vmul.f32 %v5275_v44, %v5170_v2 }
 0x282   : > { %6560 = vst [vmem:[#allocation39_spill] sm:$0xff] %v5577_v9  ;;  %2933 = vrot.lane.b32.xlu1 %v2922_v5, %s6558_s16  ;;  %v3487_v9 = vmul.f32 %v5142_v11, %v5170_v2  ;;  %s4673_s16 = smov 35  }
 0x283   : > { %3434 = vrot.lane.b32.xlu0 %v3426_v62, %s4671_s15  ;;  %v2951_v62 = vmul.f32 %v5130_v54, %v5187_v26 }
 0x284   : > { %v5583_v14 = vpop.permute.xlu1 %3138 }
 0x285   : > { %6561 = vst [vmem:[#allocation40_spill] sm:$0xff] %v5583_v14  ;;  %v5587_v49 = vpop.permute.xlu0 %3074  ;;  %v3456_v14 = vmul.f32 %v5275_v44, %v5167_v59 }
 0x286   : > { %6562 = vst [vmem:[#allocation41_spill] sm:$0xff] %v5587_v49  ;;  %2958 = vrot.lane.b32.xlu1 %v2949_v33, %s6563_s20  ;;  %v2980_v33 = vmul.f32 %v5156_v24, %v5187_v26  ;;  %v3486_v24 = vmul.f32 %v5142_v11, %v5167_v59 }
 0x287   : > { %3466 = vrot.lane.b32.xlu0 %v3457_v50, %s4672_s13 }
 0x288   : > { %v5593_v51 = vpop.permute.xlu1 %2544 }
 0x289   : > { %v5597_v5 = vpop.permute.xlu0 %3104 }
 0x28a   : > { %6564 = vst [vmem:[#allocation42_spill] sm:$0xff] %v5597_v5  ;;  %2962 = vrot.lane.b32.xlu1 %v2951_v62, %s6563_s20  ;;  %s6583_s20 = smov 40  }
 0x28b   : > { %3464 = vrot.lane.b32.xlu0 %v3456_v14, %s4672_s13  ;;  %v3009_v14 = vmul.f32 %v5160_v0, %v5187_v26 }
 0x28c   : > { %v5603_v49 = vpop.permute.xlu1 %2548 }
 0x28d   : > { %v5607_v50 = vpop.permute.xlu0 %2987 }
 0x28e   : > { %2991 = vrot.lane.b32.xlu1 %v2980_v33, %s4600_s8  ;;  %v3039_v33 = vmul.f32 %v5132_v55, %v5187_v26  ;;  %s4674_s8 = smov 34   ;;  %v3516_v55 = vmul.f32 %v5287_v42, %v5167_v59  ;;  %v3577_v42 = vmul.f32 %v5144_v12, %v5170_v2 }
 0x28f   : > { %3496 = vrot.lane.b32.xlu0 %v3487_v9, %s4673_s16 }
 0x290   : > { %v5613_v54 = vpop.permute.xlu1 %2573 }
 0x291   : > { %v5617_v62 = vpop.permute.xlu0 %3016 }
 0x292   : > { %3020 = vrot.lane.b32.xlu1 %v3009_v14, %s4657_s21  ;;  %v3069_v14 = vmul.f32 %v5165_v56, %v5187_v26  ;;  %s4675_s21 = smov 18  }
 0x293   : > { %3494 = vrot.lane.b32.xlu0 %v3486_v24, %s4673_s16 }
 0x294   : > { %v5623_v5 = vpop.permute.xlu1 %2577 }
 0x295   : > { %6565 = vst [vmem:[#allocation43_spill] sm:$0xff] %v5623_v5  ;;  %v5627_v9 = vpop.permute.xlu0 %3046  ;;  %v3547_v5 = vmul.f32 %v5297_v58, %v5170_v2 }
 0x296   : > { %6566 = vst [vmem:[#allocation44_spill] sm:$0xff] %v5627_v9  ;;  %3050 = vrot.lane.b32.xlu1 %v3039_v33, %s4658_s23  ;;  %v3099_v33 = vmul.f32 %v5181_v38, %v5187_v26  ;;  %v3546_v38 = vmul.f32 %v5297_v58, %v5167_v59  ;;  %v3576_v58 = vmul.f32 %v5144_v12, %v5167_v59  ;;  %s4677_s23 = smov 16  }
 0x297   : > { %3526 = vrot.lane.b32.xlu0 %v3517_v48, %s4674_s8  ;;  %v3606_v12 = vmul.f32 %v5309_v10, %v5167_v59 }
 0x298   : > { %v5633_v0 = vpop.permute.xlu1 %2602 }
 0x299   : > { %v5637_v24 = vpop.permute.xlu0 %3076 }
 0x29a   : > { %3080 = vrot.lane.b32.xlu1 %v3069_v14, %s4659_s29  ;;  %v3129_v14 = vmul.f32 %v5134_v61, %v5187_v26  ;;  %s4678_s29 = smov 15  }
 0x29b   : > { %3524 = vrot.lane.b32.xlu0 %v3516_v55, %s4674_s8 }
 0x29c   : > { %v5643_v9 = vpop.permute.xlu1 %2606 }
 0x29d   : > { %v5647_v48 = vpop.permute.xlu0 %3106 }
 0x29e   : > { %6567 = vst [vmem:[#allocation45_spill] sm:$0xff] %v5647_v48  ;;  %3110 = vrot.lane.b32.xlu1 %v3099_v33, %s4660_s22  ;;  %v3158_v33 = vmul.f32 %v5199_v30, %v5178_v21  ;;  %s4676_s22 = smov 17  }
 0x29f   : > { %3556 = vrot.lane.b32.xlu0 %v3547_v5, %s4675_s21 }
 0x2a0   : > { %v5653_v56 = vpop.permute.xlu1 %2632 }
 0x2a1   : > { %v5657_v55 = vpop.permute.xlu0 %3136 }
 0x2a2   : > { %6568 = vst [vmem:[#allocation46_spill] sm:$0xff] %v5657_v55  ;;  %3140 = vrot.lane.b32.xlu1 %v3129_v14, %s4661_s17  ;;  %v3159_v14 = vmul.f32 %v5199_v30, %v5187_v26  ;;  %v3607_v55 = vmul.f32 %v5309_v10, %v5170_v2  ;;  %v3636_v10 = vmul.f32 %v5319_v16, %v5167_v59  ;;  %s4679_s17 = smov 14  }
 0x2a3   : > { %3554 = vrot.lane.b32.xlu0 %v3546_v38, %s4675_s21 }
 0x2a4   : > { %v5663_v48 = vpop.permute.xlu1 %2636 }
 0x2a5   : > { %v5667_v5 = vpop.permute.xlu0 %3134 }
 0x2a6   : > { %6569 = vst [vmem:[#allocation47_spill] sm:$0xff] %v5667_v5  ;;  %3168 = vrot.lane.b32.xlu1 %v3158_v33, %s4662_s18  ;;  %v3188_v33 = vmul.f32 %v5209_v36, %v5178_v21 }
 0x2a7   : > { %3586 = vrot.lane.b32.xlu0 %v3577_v42, %s4676_s22 }
 0x2a8   : > { %v5673_v61 = vpop.permute.xlu1 %2662 }
 0x2a9   : > { %v5677_v38 = vpop.permute.xlu0 %3166 }
 0x2aa   : > { %6570 = vst [vmem:[#allocation48_spill] sm:$0xff] %v5677_v38  ;;  %3170 = vrot.lane.b32.xlu1 %v3159_v14, %s4662_s18  ;;  %v3637_v38 = vmul.f32 %v5319_v16, %v5170_v2  ;;  %v3666_v16 = vmul.f32 %v5146_v15, %v5167_v59  ;;  %s6578_s18 = smov 57  }
 0x2ab   : > { %3584 = vrot.lane.b32.xlu0 %v3576_v58, %s4676_s22  ;;  %v3189_v58 = vmul.f32 %v5209_v36, %v5187_v26 }
 0x2ac   : > { %v5683_v5 = vpop.permute.xlu1 %2666 }
 0x2ad   : > { %v5687_v42 = vpop.permute.xlu0 %3164 }
 0x2ae   : > { %6571 = vst [vmem:[#allocation49_spill] sm:$0xff] %v5687_v42  ;;  %3198 = vrot.lane.b32.xlu1 %v3188_v33, %s4663_s19  ;;  %v3218_v33 = vmul.f32 %v5136_v63, %v5178_v21 }
 0x2af   : > { %3616 = vrot.lane.b32.xlu0 %v3607_v55, %s4677_s23 }
 0x2b0   : > { %v5693_v30 = vpop.permute.xlu1 %2692 }
 0x2b1   : > { %v5697_v14 = vpop.permute.xlu0 %3196 }
 0x2b2   : > { %6572 = vst [vmem:[#allocation50_spill] sm:$0xff] %v5697_v14  ;;  %3200 = vrot.lane.b32.xlu1 %v3189_v58, %s4663_s19  ;;  %v3667_v14 = vmul.f32 %v5146_v15, %v5170_v2  ;;  %s4680_s19 = smov 13   ;;  %v3696_v15 = vmul.f32 %v5331_v43, %v5167_v59 }
 0x2b3   : > { %3614 = vrot.lane.b32.xlu0 %v3606_v12, %s4677_s23  ;;  %v3219_v12 = vmul.f32 %v5136_v63, %v5187_v26 }
 0x2b4   : > { %v5703_v42 = vpop.permute.xlu1 %2696 }
 0x2b5   : > { %v5707_v55 = vpop.permute.xlu0 %3194 }
 0x2b6   : > { %6573 = vst [vmem:[#allocation51_spill] sm:$0xff] %v5707_v55  ;;  %3228 = vrot.lane.b32.xlu1 %v3218_v33, %s4664_s9  ;;  %v3248_v33 = vmul.f32 %v5221_v53, %v5178_v21 }
 0x2b7   : > { %3646 = vrot.lane.b32.xlu0 %v3637_v38, %s4678_s29 }
 0x2b8   : > { %v5713_v36 = vpop.permute.xlu1 %2722 }
 0x2b9   : > { %v5717_v58 = vpop.permute.xlu0 %3226 }
 0x2ba   : > { %6574 = vst [vmem:[#allocation52_spill] sm:$0xff] %v5717_v58  ;;  %3230 = vrot.lane.b32.xlu1 %v3219_v12, %s4664_s9  ;;  %v3697_v58 = vmul.f32 %v5331_v43, %v5170_v2  ;;  %s6499_s9 = smov 12   ;;  %v3726_v43 = vmul.f32 %v5341_v41, %v5167_v59 }
 0x2bb   : > { %3644 = vrot.lane.b32.xlu0 %v3636_v10, %s4678_s29  ;;  %v3249_v10 = vmul.f32 %v5221_v53, %v5187_v26 }
 0x2bc   : > { %v5723_v55 = vpop.permute.xlu1 %2726 }
 0x2bd   : > { %v5727_v38 = vpop.permute.xlu0 %3224 }
 0x2be   : > { %6575 = vst [vmem:[#allocation53_spill] sm:$0xff] %v5727_v38  ;;  %3258 = vrot.lane.b32.xlu1 %v3248_v33, %s4665_s14  ;;  %v3278_v33 = vmul.f32 %v5231_v60, %v5178_v21 }
 0x2bf   : > { %3676 = vrot.lane.b32.xlu0 %v3667_v14, %s4679_s17 }
 0x2c0   : > { %v5733_v63 = vpop.permute.xlu1 %2751 }
 0x2c1   : > { %v5737_v12 = vpop.permute.xlu0 %3256 }
 0x2c2   : > { %6576 = vst [vmem:[#allocation54_spill] sm:$0xff] %v5737_v12  ;;  %3260 = vrot.lane.b32.xlu1 %v3249_v10, %s4665_s14  ;;  %v3727_v12 = vmul.f32 %v5341_v41, %v5170_v2  ;;  %s6581_s14 = smov 56   ;;  %v3760_v41 = vmul.f32 %v5150_v19, %v5170_v2 }
 0x2c3   : > { %3674 = vrot.lane.b32.xlu0 %v3666_v16, %s4679_s17  ;;  %v3279_v16 = vmul.f32 %v5231_v60, %v5187_v26 }
 0x2c4   : > { %v5743_v38 = vpop.permute.xlu1 %2755 }
 0x2c5   : > { %v5747_v14 = vpop.permute.xlu0 %3254 }
 0x2c6   : > { %6577 = vst [vmem:[#allocation55_spill] sm:$0xff] %v5747_v14  ;;  %3288 = vrot.lane.b32.xlu1 %v3278_v33, %s6578_s18  ;;  %v3308_v33 = vmul.f32 %v5138_v3, %v5178_v21 }
 0x2c7   : > { %3706 = vrot.lane.b32.xlu0 %v3697_v58, %s4680_s19 }
 0x2c8   : > { %v5753_v53 = vpop.permute.xlu1 %2780 }
 0x2c9   : > { %v5757_v10 = vpop.permute.xlu0 %3286 }
 0x2ca   : > { %6579 = vst [vmem:[#allocation56_spill] sm:$0xff] %v5757_v10  ;;  %3290 = vrot.lane.b32.xlu1 %v3279_v16, %s6578_s18  ;;  %v3761_v10 = vmul.f32 %v5150_v19, %v5178_v21  ;;  %s6584_s18 = smov 124   ;;  %v2579_v19 = vsel %vm760_vm3, %v5393_v34, %v5613_v54  ;;  %v3369_v34 = vmul.f32 %v5253_v8, %v5187_v26 }
 0x2cb   : > { %3704 = vrot.lane.b32.xlu0 %v3696_v15, %s4680_s19  ;;  %v3309_v15 = vmul.f32 %v5138_v3, %v5187_v26 }
 0x2cc   : > { %v5763_v14 = vpop.permute.xlu1 %2784 }
 0x2cd   : > { %v5767_v58 = vpop.permute.xlu0 %3284 }
 0x2ce   : > { %6580 = vst [vmem:[#allocation57_spill] sm:$0xff] %v5767_v58  ;;  %3318 = vrot.lane.b32.xlu1 %v3308_v33, %s6581_s14  ;;  %v3338_v33 = vmul.f32 %v5243_v7, %v5178_v21 }
 0x2cf   : > { %3736 = vrot.lane.b32.xlu0 %v3727_v12, %s6499_s9 }
 0x2d0   : > { %v5773_v60 = vpop.permute.xlu1 %2809 }
 0x2d1   : > { %v5777_v16 = vpop.permute.xlu0 %3316 }
 0x2d2   : > { %3320 = vrot.lane.b32.xlu1 %v3309_v15, %s6581_s14  ;;  %v3339_v15 = vmul.f32 %v5243_v7, %v5187_v26  ;;  %v3368_v7 = vmul.f32 %v5253_v8, %v5178_v21  ;;  %s6588_s14 = smov 39  }
 0x2d3   : > { %3734 = vrot.lane.b32.xlu0 %v3726_v43, %s6499_s9  ;;  %s6591_s9 = smov 122  }
 0x2d4   : > { %v5783_v58 = vpop.permute.xlu1 %2813 }
 0x2d5   : > { %v5787_v12 = vpop.permute.xlu0 %3314 }
 0x2d6   : > { %6582 = vst [vmem:[#allocation58_spill] sm:$0xff] %v5787_v12  ;;  %3348 = vrot.lane.b32.xlu1 %v3338_v33, %s6583_s20  ;;  %v2550_v12 = vsel %vm304_vm0, %v5397_v22, %v5593_v51  ;;  %v3790_v22 = vmul.f32 %v5353_v1, %v5178_v21 }
 0x2d7   : > { %3770 = vrot.lane.b32.xlu0 %v3761_v10, %s6584_s18  ;;  %v2524_v10 = vmul.f32 %v5148_v17, %v5167_v59  ;;  %v2609_v59 = vsel %vm2608_vm10, %v5403_v4, %v5633_v0 }
 0x2d8   : > { %v5793_v3 = vpop.permute.xlu1 %2839 }
 0x2d9   : > { %v5797_v43 = vpop.permute.xlu0 %3346 }
 0x2da   : > { %6585 = vst [vmem:[#allocation59_spill] sm:$0xff] %v5797_v43  ;;  %3350 = vrot.lane.b32.xlu1 %v3339_v15, %s6583_s20  ;;  %v2556_v43 = vadd.f32 %v2550_v12, %v2524_v10  ;;  %s6589_s20 = smov 123   ;;  %v2639_v12 = vsel %vm6510_vm11, %v5413_v35, %v5653_v56  ;;  %v3398_v35 = vmul.f32 %v5140_v6, %v5178_v21 }
 0x2db   : > { %3768 = vrot.lane.b32.xlu0 %v3760_v41, %s6584_s18 }
 0x2dc   : > { %v5808_v33 = vpop.permute.xlu1 %2843  ;;  %v2585_v41 = vadd.f32 %v2579_v19, %v2556_v43  ;;  %v2669_v19 = vsel %vm6511_vm12, %v5423_v29, %v5673_v61  ;;  %v2699_v43 = vsel %vm6512_vm13, %v5433_v37, %v5693_v30  ;;  %v2728_v29 = vsel %vm1005_vm4, %v5443_v18, %v5713_v36 }
 0x2dd   : > { %6586 = vst [vmem:[#allocation60_spill] sm:$0xff] %v5808_v33  ;;  %v5815_v15 = vpop.permute.xlu0 %3344  ;;  %v3399_v37 = vmul.f32 %v5140_v6, %v5187_v26  ;;  %v2786_v18 = vsel %vm1495_vm6, %v5463_v25, %v5753_v53  ;;  %v2846_v25 = vsel %vm2845_vm15, %v5483_v57, %v5793_v3 }
 0x2de   : > { %6587 = vst [vmem:[#allocation61_spill] sm:$0xff] %v5815_v15  ;;  %3378 = vrot.lane.b32.xlu1 %v3368_v7, %s6588_s14  ;;  %v3789_v7 = vmul.f32 %v5353_v1, %v5170_v2  ;;  %v2615_v15 = vadd.f32 %v2609_v59, %v2585_v41  ;;  %v3819_v59 = vmul.f32 %v5363_v32, %v5178_v21 }
 0x2df   : > { %3799 = vrot.lane.b32.xlu0 %v3790_v22, %s6589_s20 }
 0x2e0   : > { %v5824_v33 = vpop.permute.xlu1 %2869  ;;  %v2645_v8 = vadd.f32 %v2639_v12, %v2615_v15  ;;  %v2757_v12 = vsel %vm1250_vm5, %v5453_v40, %v5733_v63  ;;  %v3428_v40 = vmul.f32 %v5265_v27, %v5178_v21 }
 0x2e1   : > { %v5831_v10 = vpop.permute.xlu0 %3376 }
 0x2e2   : > { %3380 = vrot.lane.b32.xlu1 %v3369_v34, %s6588_s14  ;;  %v2675_v41 = vadd.f32 %v2669_v19, %v2645_v8  ;;  %s6590_s14 = smov 38   ;;  %v3818_v19 = vmul.f32 %v5363_v32, %v5170_v2 }
 0x2e3   : > { %3797 = vrot.lane.b32.xlu0 %v3789_v7, %s6589_s20 }
 0x2e4   : > { %v5840_v4 = vpop.permute.xlu1 %2873  ;;  %v2705_v15 = vadd.f32 %v2699_v43, %v2675_v41  ;;  %v2816_v43 = vsel %vm2815_vm14, %v5473_v45, %v5773_v60  ;;  %v3848_v41 = vmul.f32 %v5154_v23, %v5178_v21  ;;  %v3429_v45 = vmul.f32 %v5265_v27, %v5187_v26 }
 0x2e5   : > { %v5847_v22 = vpop.permute.xlu0 %3374 }
 0x2e6   : > { %3408 = vrot.lane.b32.xlu1 %v3398_v35, %s6590_s14  ;;  %v2734_v8 = vadd.f32 %v2728_v29, %v2705_v15 }
 0x2e7   : > { %3828 = vrot.lane.b32.xlu0 %v3819_v59, %s6591_s9 }
 0x2e8   : > { %v5856_v34 = vpop.permute.xlu1 %2899  ;;  %v2763_v6 = vadd.f32 %v2757_v12, %v2734_v8  ;;  %v2876_v12 = vsel %vm2875_vm2, %v5493_v46, %v5824_v33  ;;  %v3847_v8 = vmul.f32 %v5154_v23, %v5170_v2  ;;  %v2525_v46 = vmul.f32 %v5148_v17, %v5170_v2  ;;  %v6593_v23 = vld [vmem:[#allocation21_spill] sm:$0xff] }
 0x2e9   : > { %v5863_v7 = vpop.permute.xlu0 %3406  ;;  %v2906_v27 = vsel %vm2905_vm1, %v5503_v31, %v5856_v34 }
 0x2ea   : > { %3410 = vrot.lane.b32.xlu1 %v3399_v37, %s6590_s14  ;;  %v2792_v29 = vadd.f32 %v2786_v18, %v2763_v6  ;;  %s4682_s14 = smov 121   ;;  %v2551_v18 = vsel %vm304_vm0, %v5593_v51, %v5407_v13 }
 0x2eb   : > { %3826 = vrot.lane.b32.xlu0 %v3818_v19, %s6591_s9 }
 0x2ec   : > { %v5872_v35 = vpop.permute.xlu1 %2903  ;;  %v2822_v15 = vadd.f32 %v2816_v43, %v2792_v29  ;;  %v3458_v43 = vmul.f32 %v5275_v44, %v5178_v21  ;;  %v3878_v29 = vmul.f32 %v5375_v28, %v5178_v21 }
 0x2ed   : > { %v5879_v59 = vpop.permute.xlu0 %3404 }
 0x2ee   : > { %3438 = vrot.lane.b32.xlu1 %v3428_v40, %s4671_s15  ;;  %v2852_v57 = vadd.f32 %v2846_v25, %v2822_v15  ;;  %v2557_v25 = vadd.f32 %v2551_v18, %v2525_v46  ;;  %v2640_v18 = vsel %vm6510_vm11, %v5653_v56, %v6593_v23 }
 0x2ef   : > { %3857 = vrot.lane.b32.xlu0 %v3848_v41, %s4682_s14  ;;  %v2580_v41 = vsel %vm760_vm3, %v5613_v54, %v5417_v20 }
 0x2f0   : > { %v5888_v37 = vpop.permute.xlu1 %2929  ;;  %v2882_v6 = vadd.f32 %v2876_v12, %v2852_v57  ;;  %v2586_v54 = vadd.f32 %v2580_v41, %v2557_v25  ;;  %v6594_v41 = vld [vmem:[#allocation22_spill] sm:$0xff]  ;;  %v3488_v25 = vmul.f32 %v5142_v11, %v5178_v21 }
 0x2f1   : > { %v5895_v19 = vpop.permute.xlu0 %3436  ;;  %v2935_v51 = vsel %vm6504_vm7, %v5513_v47, %v5888_v37  ;;  %v3459_v47 = vmul.f32 %v5275_v44, %v5187_v26  ;;  %vm3022_vm7 = vcmask 662528   ;;  %v2993_v44 = vsel %vm6506_vm9, %v5557_v39, %v5607_v50  ;;  %v6595_v39 = vld [vmem:[#allocation37_spill] sm:$0xff] }
 0x2f2   : > { %3440 = vrot.lane.b32.xlu1 %v3429_v45, %s4671_s15  ;;  %v2912_v15 = vadd.f32 %v2906_v27, %v2882_v6  ;;  %v6592_v45 = vld [vmem:[#allocation20_spill] sm:$0xff]  ;;  %s4683_s15 = smov 120   ;;  %v2670_v56 = vsel %vm6511_vm12, %v5673_v61, %v6594_v41  ;;  %vm3082_vm9 = vcmask 646144  }
 0x2f3   : > { %3855 = vrot.lane.b32.xlu0 %v3847_v8, %s4682_s14  ;;  %v2610_v12 = vsel %vm2608_vm10, %v5633_v0, %v6592_v45  ;;  %v3877_v0 = vmul.f32 %v5375_v28, %v5170_v2 }
 0x2f4   : > { %v5909_v40 = vpop.permute.xlu1 %2933  ;;  %v2941_v8 = vadd.f32 %v2935_v51, %v2912_v15  ;;  %v2616_v6 = vadd.f32 %v2610_v12, %v2586_v54  ;;  %v2552_v15 = vsel %vm304_vm0, %v5407_v13, %v5603_v49  ;;  %v3023_v12 = vsel %vm3022_vm7, %v6595_v39, %v5617_v62  ;;  %v6596_v54 = vld [vmem:[#allocation23_spill] sm:$0xff]  ;;  %v6601_v39 = vld [vmem:[#allocation24_spill] sm:$0xff] }
 0x2f5   : > { %v5919_v31 = vpop.permute.xlu0 %3434  ;;  %v2700_v61 = vsel %vm6512_vm13, %v5693_v30, %v6596_v54  ;;  %v6598_v13 = vld [vmem:[#allocation43_spill] sm:$0xff]  ;;  %v2729_v28 = vsel %vm1005_vm4, %v5713_v36, %v6601_v39  ;;  %vm3112_vm0 = vcmask 637952   ;;  %v2611_v36 = vsel %vm2608_vm10, %v6592_v45, %v5643_v9  ;;  %v6607_v45 = vld [vmem:[#allocation26_spill] sm:$0xff] }
 0x2f6   : > { %3468 = vrot.lane.b32.xlu1 %v3458_v43, %s4672_s13  ;;  %v2581_v49 = vsel %vm760_vm3, %v5417_v20, %v6598_v13  ;;  %v6602_v20 = vld [vmem:[#allocation41_spill] sm:$0xff]  ;;  %vm3142_vm3 = vcmask 506880   ;;  %vm3172_vm10 = vcmask 498688  }
 0x2f7   : > { %3887 = vrot.lane.b32.xlu0 %v3878_v29, %s4683_s15  ;;  %v6603_v13 = vld [vmem:[#allocation25_spill] sm:$0xff] }
 0x2f8   : > { %v5928_v57 = vpop.permute.xlu1 %2958 }
 0x2f9   : > { %v2964_v27 = vsel %vm6505_vm8, %v5547_v52, %v5928_v57  ;;  %v5938_v46 = vpop.permute.xlu0 %3466  ;;  %vm3052_vm8 = vcmask 654336   ;;  %v2646_v52 = vadd.f32 %v2640_v18, %v2616_v6 }
 0x2fa   : > { %v2970_v43 = vadd.f32 %v2964_v27, %v2941_v8  ;;  %3470 = vrot.lane.b32.xlu1 %v3459_v47, %s4672_s13  ;;  %v6597_v47 = vld [vmem:[#allocation19_spill] sm:$0xff]  ;;  %v2526_v27 = vmul.f32 %v5148_v17, %v5178_v21  ;;  %s6513_s13 = smov 119   ;;  %v3489_v17 = vmul.f32 %v5142_v11, %v5187_v26 }
 0x2fb   : > { %3885 = vrot.lane.b32.xlu0 %v3877_v0, %s4683_s15  ;;  %v3908_v18 = vmul.f32 %v6597_v47, %v5178_v21  ;;  %v2676_v0 = vadd.f32 %v2670_v56, %v2646_v52  ;;  %v3907_v11 = vmul.f32 %v6597_v47, %v5170_v2 }
 0x2fc   : > { %v2999_v51 = vadd.f32 %v2993_v44, %v2970_v43  ;;  %v5950_v29 = vpop.permute.xlu1 %2962  ;;  %v6599_v43 = vld [vmem:[#allocation44_spill] sm:$0xff]  ;;  %v6600_v44 = vld [vmem:[#allocation39_spill] sm:$0xff]  ;;  %v2558_v56 = vadd.f32 %v2552_v15, %v2526_v27 }
 0x2fd   : > { %v5963_v8 = vpop.permute.xlu0 %3464  ;;  %v3053_v30 = vsel %vm3052_vm8, %v6600_v44, %v6599_v43  ;;  %v2706_v52 = vadd.f32 %v2700_v61, %v2676_v0  ;;  %v6604_v0 = vld [vmem:[#allocation12_spill] sm:$0xff] }
 0x2fe   : > { %v3029_v6 = vadd.f32 %v3023_v12, %v2999_v51  ;;  %3498 = vrot.lane.b32.xlu1 %v3488_v25, %s4673_s16  ;;  %v3083_v12 = vsel %vm3082_vm9, %v6602_v20, %v5637_v24  ;;  %v2587_v15 = vadd.f32 %v2581_v49, %v2558_v56  ;;  %v6606_v20 = vld [vmem:[#allocation42_spill] sm:$0xff]  ;;  %v2787_v49 = vsel %vm1495_vm6, %v5753_v53, %v6607_v45 }
 0x2ff   : > { %3917 = vrot.lane.b32.xlu0 %v3908_v18, %s6513_s13  ;;  %v2758_v18 = vsel %vm1250_vm5, %v5733_v63, %v6603_v13  ;;  %v2735_v61 = vadd.f32 %v2729_v28, %v2706_v52  ;;  %v2641_v63 = vsel %vm6510_vm11, %v6593_v23, %v5663_v48  ;;  %v2671_v23 = vsel %vm6511_vm12, %v6594_v41, %v5683_v5  ;;  %v6610_v48 = vld [vmem:[#allocation27_spill] sm:$0xff] }
 0x300   : > { %v3059_v51 = vadd.f32 %v3053_v30, %v3029_v6  ;;  %v5982_v25 = vpop.permute.xlu1 %2991  ;;  %v3518_v6 = vmul.f32 %v6604_v0, %v5178_v21  ;;  %v6605_v30 = vld [vmem:[#allocation45_spill] sm:$0xff]  ;;  %v2617_v28 = vadd.f32 %v2611_v36, %v2587_v15  ;;  %v2817_v53 = vsel %vm2815_vm14, %v5773_v60, %v6610_v48  ;;  %v6611_v36 = vld [vmem:[#allocation10_spill] sm:$0xff]  ;;  %v6614_v60 = vld [vmem:[#allocation28_spill] sm:$0xff] }
 0x301   : > { %v5993_v44 = vpop.permute.xlu0 %3496  ;;  %v3113_v9 = vsel %vm3112_vm0, %v6606_v20, %v6605_v30  ;;  %vm3202_vm11 = vcmask 490496   ;;  %v2701_v5 = vsel %vm6512_vm13, %v6596_v54, %v5703_v42  ;;  %v2847_v41 = vsel %vm2845_vm15, %v5793_v3, %v6614_v60  ;;  %v6617_v54 = vld [vmem:[#allocation29_spill] sm:$0xff] }
 0x302   : > { %v3089_v27 = vadd.f32 %v3083_v12, %v3059_v51  ;;  %3500 = vrot.lane.b32.xlu1 %v3489_v17, %s4673_s16  ;;  %v2764_v17 = vadd.f32 %v2758_v18, %v2735_v61  ;;  %v6608_v51 = vld [vmem:[#allocation46_spill] sm:$0xff]  ;;  %v6609_v12 = vld [vmem:[#allocation47_spill] sm:$0xff]  ;;  %v3938_v18 = vmul.f32 %v6611_v36, %v5178_v21  ;;  %s4685_s16 = smov 118   ;;  %vm6515_vm12 = vcmask 482304  }
 0x303   : > { %3915 = vrot.lane.b32.xlu0 %v3907_v11, %s6513_s13  ;;  %v3143_v20 = vsel %vm3142_vm3, %v6609_v12, %v6608_v51  ;;  %v2647_v11 = vadd.f32 %v2641_v63, %v2617_v28  ;;  %v3519_v63 = vmul.f32 %v6604_v0, %v5187_v26  ;;  %v2730_v3 = vsel %vm1005_vm4, %v6601_v39, %v5723_v55 }
 0x304   : > { %v3119_v56 = vadd.f32 %v3113_v9, %v3089_v27  ;;  %v6010_v52 = vpop.permute.xlu1 %3020  ;;  %v2793_v15 = vadd.f32 %v2787_v49, %v2764_v17  ;;  %v6612_v27 = vld [vmem:[#allocation48_spill] sm:$0xff]  ;;  %v6613_v9 = vld [vmem:[#allocation49_spill] sm:$0xff]  ;;  %v3937_v0 = vmul.f32 %v6611_v36, %v5170_v2  ;;  %vm3262_vm13 = vcmask 474112  }
 0x305   : > { %v6021_v47 = vpop.permute.xlu0 %3494  ;;  %v3173_v12 = vsel %vm3172_vm10, %v6613_v9, %v6612_v27  ;;  %v2677_v49 = vadd.f32 %v2671_v23, %v2647_v11  ;;  %v2759_v55 = vsel %vm1250_vm5, %v6603_v13, %v5743_v38  ;;  %v6621_v2 = vld [vmem:[#allocation13_spill] sm:$0xff]  ;;  %vm3292_vm4 = vcmask 465920   ;;  %v6622_v38 = vld [vmem:[#allocation54_spill] sm:$0xff]  ;;  %v6623_v13 = vld [vmem:[#allocation55_spill] sm:$0xff] }
 0x306   : > { %v3149_v61 = vadd.f32 %v3143_v20, %v3119_v56  ;;  %3528 = vrot.lane.b32.xlu1 %v3518_v6, %s4674_s8  ;;  %v2823_v6 = vadd.f32 %v2817_v53, %v2793_v15  ;;  %v6615_v56 = vld [vmem:[#allocation50_spill] sm:$0xff]  ;;  %v6616_v20 = vld [vmem:[#allocation51_spill] sm:$0xff]  ;;  %v6618_v15 = vld [vmem:[#allocation52_spill] sm:$0xff]  ;;  %vm6625_vm5 = vcmask 687104  }
 0x307   : > { %3947 = vrot.lane.b32.xlu0 %v3938_v18, %s4685_s16  ;;  %v3203_v42 = vsel %vm3202_vm11, %v6616_v20, %v6615_v56  ;;  %v2877_v18 = vsel %vm2875_vm2, %v5824_v33, %v6617_v54  ;;  %v2707_v23 = vadd.f32 %v2701_v5, %v2677_v49  ;;  %v6620_v33 = vld [vmem:[#allocation31_spill] sm:$0xff]  ;;  %v3548_v5 = vmul.f32 %v6621_v2, %v5178_v21 }
 0x308   : > { %v3179_v28 = vadd.f32 %v3173_v12, %v3149_v61  ;;  %v6038_v17 = vpop.permute.xlu1 %3050  ;;  %v2853_v53 = vadd.f32 %v2847_v41, %v2823_v6  ;;  %v6619_v61 = vld [vmem:[#allocation53_spill] sm:$0xff]  ;;  %v2907_v39 = vsel %vm2905_vm1, %v5856_v34, %v6620_v33  ;;  %v3263_v20 = vsel %vm3262_vm13, %v6623_v13, %v6622_v38 }
 0x309   : > { %v6049_v9 = vpop.permute.xlu0 %3526  ;;  %v3233_v12 = vsel %vm6515_vm12, %v6619_v61, %v6618_v15  ;;  %v2736_v41 = vadd.f32 %v2730_v3, %v2707_v23  ;;  %v2788_v34 = vsel %vm1495_vm6, %v6607_v45, %v5763_v14  ;;  %vm3322_vm12 = vcmask 457728   ;;  %v6627_v61 = vld [vmem:[#allocation57_spill] sm:$0xff]  ;;  %v6628_v45 = vld [vmem:[#allocation30_spill] sm:$0xff] }
 0x30a   : > { %v3209_v11 = vadd.f32 %v3203_v42, %v3179_v28  ;;  %3530 = vrot.lane.b32.xlu1 %v3519_v63, %s4674_s8  ;;  %v2883_v63 = vadd.f32 %v2877_v18, %v2853_v53  ;;  %v3964_v28 = vld [vmem:[%s6418_s6] sm:$0xff]  ;;  %v6624_v42 = vld [vmem:[#allocation33_spill] sm:$0xff]  ;;  %v2818_v14 = vsel %vm2815_vm14, %v6610_v48, %v5783_v58  ;;  %vm6629_vm6 = vcmask 678912   ;;  %s4686_s8 = smov [#allocation3]  }
 0x30b   : > { %3945 = vrot.lane.b32.xlu0 %v3937_v0, %s4685_s16  ;;  %v2936_v3 = vsel %vm6625_vm5, %v5888_v37, %v6624_v42  ;;  %v2765_v0 = vadd.f32 %v2759_v55, %v2736_v41  ;;  %v2965_v37 = vsel %vm6629_vm6, %v5928_v57, %v6628_v45  ;;  %v3549_v55 = vmul.f32 %v6621_v2, %v5187_v26 }
 0x30c   : > { %v3239_v49 = vadd.f32 %v3233_v12, %v3209_v11  ;;  %v6066_v6 = vpop.permute.xlu1 %3080  ;;  %v2913_v23 = vadd.f32 %v2907_v39, %v2883_v63  ;;  %v6626_v11 = vld [vmem:[#allocation56_spill] sm:$0xff]  ;;  %vm3352_vm5 = vcmask 326656   ;;  %vm6516_vm14 = vcmask 318464  }
 0x30d   : > { %v6080_v18 = vpop.permute.xlu0 %3524  ;;  %v3293_v12 = vsel %vm3292_vm4, %v6627_v61, %v6626_v11  ;;  %v2794_v39 = vadd.f32 %v2788_v34, %v2765_v0  ;;  %v6632_v34 = vld [vmem:[#allocation59_spill] sm:$0xff]  ;;  %vm6517_vm6 = vcmask 310272  }
 0x30e   : > { %v3269_v53 = vadd.f32 %v3263_v20, %v3239_v49  ;;  %3558 = vrot.lane.b32.xlu1 %v3548_v5, %s4675_s21  ;;  %v2942_v41 = vadd.f32 %v2936_v3, %v2913_v23  ;;  %v6630_v49 = vld [vmem:[#allocation58_spill] sm:$0xff]  ;;  %v6631_v20 = vld [vmem:[#allocation60_spill] sm:$0xff]  ;;  %v6633_v3 = vld [vmem:[#allocation61_spill] sm:$0xff]  ;;  %v2878_v23 = vsel %vm2875_vm2, %v6617_v54, %v5840_v4  ;;  %v2908_v4 = vsel %vm2905_vm1, %v6620_v33, %v5872_v35 }
 0x30f   : > { %3967 = vperm.xlu0 %4525, %v3964_v28   ;;  %v3323_v13 = vsel %vm3322_vm12, %v6630_v49, %v5777_v16  ;;  %v2848_v58 = vsel %vm2845_vm15, %v6614_v60, %v6631_v20  ;;  %v2824_v57 = vadd.f32 %v2818_v14, %v2794_v39  ;;  %v3353_v0 = vsel %vm3352_vm5, %v6633_v3, %v6632_v34  ;;  %v6638_v33 = vld [vmem:[#allocation34_spill] sm:$0xff] }
 0x310   : > { %v3299_v5 = vadd.f32 %v3293_v12, %v3269_v53  ;;  %v6094_v63 = vpop.permute.xlu1 %3110  ;;  %v2971_v28 = vadd.f32 %v2965_v37, %v2942_v41  ;;  %v6634_v12 = vld [vmem:[#allocation6_spill] sm:$0xff]  ;;  %v6635_v37 = vld [vmem:[#allocation32_spill] sm:$0xff]  ;;  %vm6636_vm15 = vcmask 670720   ;;  %v3383_v39 = vsel %vm6516_vm14, %v5847_v22, %v5831_v10 }
 0x311   : > { %v6102_v48 = vpop.permute.xlu0 %3556  ;;  %v2854_v53 = vadd.f32 %v2848_v58, %v2824_v57  ;;  %v3578_v14 = vmul.f32 %v6634_v12, %v5178_v21  ;;  %vm6518_vm2 = vcmask 302080   ;;  %vm3472_vm14 = vcmask 293888  }
 0x312   : > { %v3329_v2 = vadd.f32 %v3323_v13, %v3299_v5  ;;  %3560 = vrot.lane.b32.xlu1 %v3549_v55, %s4675_s21  ;;  %v2994_v55 = vsel %vm6636_vm15, %v5607_v50, %v6635_v37  ;;  %v3413_v13 = vsel %vm6517_vm6, %v5879_v59, %v5863_v7  ;;  %vm6637_vm15 = vcmask 687104   ;;  %s6652_s21 = smov 12  }
 0x313   : > { %v2884_v41 = vadd.f32 %v2878_v23, %v2854_v53  ;;  %v3000_v5 = vadd.f32 %v2994_v55, %v2971_v28  ;;  %v2937_v50 = vsel %vm6637_vm15, %v6624_v42, %v5909_v40  ;;  %v3579_v35 = vmul.f32 %v6634_v12, %v5187_v26 }
 0x314   : > { %v3359_v61 = vadd.f32 %v3353_v0, %v3329_v2  ;;  %v6111_v60 = vpop.permute.xlu1 %3140  ;;  %v3024_v57 = vsel %vm3022_vm7, %v5617_v62, %v6638_v33  ;;  %v3443_v59 = vsel %vm6518_vm2, %v5919_v31, %v5895_v19  ;;  %vm6639_vm1 = vcmask 678912  }
 0x315   : > { %v3555_v54 = vpop.permute.xlu0 %3554  ;;  %v2914_v22 = vadd.f32 %v2908_v4, %v2884_v41  ;;  %v2966_v40 = vsel %vm6639_vm1, %v6628_v45, %v5950_v29  ;;  %v3030_v2 = vadd.f32 %v3024_v57, %v3000_v5  ;;  %vm3502_vm15 = vcmask 285696   ;;  %v6641_v45 = vld [vmem:[#allocation14_spill] sm:$0xff] }
 0x316   : > { %v3389_v49 = vadd.f32 %v3383_v39, %v3359_v61  ;;  %3588 = vrot.lane.b32.xlu1 %v3578_v14, %s4676_s22  ;;  %v3473_v62 = vsel %vm3472_vm14, %v5963_v8, %v5938_v46  ;;  %vm6640_vm6 = vcmask 670720   ;;  %vm3532_vm2 = vcmask 277504   ;;  %v6642_v61 = vld [vmem:[#allocation35_spill] sm:$0xff] }
 0x317   : > { %v2943_v28 = vadd.f32 %v2937_v50, %v2914_v22  ;;  %v2995_v31 = vsel %vm6640_vm6, %v6635_v37, %v5982_v25  ;;  %v3608_v53 = vmul.f32 %v6641_v45, %v5178_v21  ;;  %v3054_v12 = vsel %vm3052_vm8, %v6599_v43, %v6642_v61 }
 0x318   : > { %v3419_v20 = vadd.f32 %v3413_v13, %v3389_v49  ;;  %v6131_v58 = vpop.permute.xlu1 %3168  ;;  %v3025_v14 = vsel %vm3022_vm7, %v6638_v33, %v6010_v52  ;;  %v3503_v8 = vsel %vm3502_vm15, %v6021_v47, %v5993_v44  ;;  %v3060_v37 = vadd.f32 %v3054_v12, %v3030_v2  ;;  %v6643_v49 = vld [vmem:[#allocation36_spill] sm:$0xff]  ;;  %v6644_v33 = vld [vmem:[#allocation38_spill] sm:$0xff] }
 0x319   : > { %v6144_v42 = vpop.permute.xlu0 %3586  ;;  %v2972_v0 = vadd.f32 %v2966_v40, %v2943_v28  ;;  %vm3562_vm6 = vcmask 146432   ;;  %v3055_v4 = vsel %vm3052_vm8, %v6642_v61, %v6038_v17  ;;  %v3533_v43 = vsel %vm3532_vm2, %v6080_v18, %v6049_v9 }
 0x31a   : > { %v3449_v3 = vadd.f32 %v3443_v59, %v3419_v20  ;;  %3590 = vrot.lane.b32.xlu1 %v3579_v35, %s4676_s22  ;;  %vm3592_vm7 = vcmask 138240   ;;  %v3609_v47 = vmul.f32 %v6641_v45, %v5187_v26  ;;  %v3084_v13 = vsel %vm3082_vm9, %v5637_v24, %v6643_v49  ;;  %s6664_s22 = smov 119  }
 0x31b   : > { %v3001_v55 = vadd.f32 %v2995_v31, %v2972_v0  ;;  %v3085_v50 = vsel %vm3082_vm9, %v6643_v49, %v6066_v6  ;;  %v3563_v17 = vsel %vm3562_vm6, %v3555_v54, %v6102_v48  ;;  %v3090_v35 = vadd.f32 %v3084_v13, %v3060_v37  ;;  %v6645_v54 = vld [vmem:[#allocation15_spill] sm:$0xff] }
 0x31c   : > { %v3479_v23 = vadd.f32 %v3473_v62, %v3449_v3  ;;  %v3171_v29 = vpop.permute.xlu1 %3170  ;;  %v3115_v57 = vsel %vm3112_vm0, %v6644_v33, %v6094_v63  ;;  %vm3622_vm8 = vcmask 130048   ;;  %v3638_v28 = vmul.f32 %v6645_v54, %v5178_v21  ;;  %v6646_v3 = vld [vmem:[#allocation40_spill] sm:$0xff] }
 0x31d   : > { %v3585_v25 = vpop.permute.xlu0 %3584  ;;  %v3031_v52 = vadd.f32 %v3025_v14, %v3001_v55  ;;  %v3114_v2 = vsel %vm3112_vm0, %v6605_v30, %v6644_v33  ;;  %v3145_v62 = vsel %vm3142_vm3, %v6646_v3, %v6111_v60  ;;  %v3175_v45 = vsel %vm3172_vm10, %v6131_v58, %v3171_v29 }
 0x31e   : > { %v3509_v39 = vadd.f32 %v3503_v8, %v3479_v23  ;;  %3618 = vrot.lane.b32.xlu1 %v3608_v53, %s4677_s23  ;;  %v3593_v24 = vsel %vm3592_vm7, %v3585_v25, %v6144_v42  ;;  %v3120_v0 = vadd.f32 %v3114_v2, %v3090_v35  ;;  %v3639_v30 = vmul.f32 %v6645_v54, %v5187_v26  ;;  %v6650_v35 = vld [vmem:[#allocation16_spill] sm:$0xff] }
 0x31f   : > { %v3061_v18 = vadd.f32 %v3055_v4, %v3031_v52  ;;  %v3144_v60 = vsel %vm3142_vm3, %v6608_v51, %v6646_v3  ;;  %v3174_v14 = vsel %vm3172_vm10, %v6612_v27, %v6131_v58  ;;  %vm3652_vm9 = vcmask 121856   ;;  %v6647_v51 = vld [vmem:[#allocation7_spill] sm:$0xff] }
 0x320   : > { %v3539_v41 = vadd.f32 %v3533_v43, %v3509_v39  ;;  %v3199_v5 = vpop.permute.xlu1 %3198  ;;  %v3150_v37 = vadd.f32 %v3144_v60, %v3120_v0  ;;  %v3668_v52 = vmul.f32 %v6647_v51, %v5178_v21  ;;  %vm6648_vm0 = vcmask 482304  }
 0x321   : > { %v6181_v22 = vpop.permute.xlu0 %3616  ;;  %v3091_v59 = vadd.f32 %v3085_v50, %v3061_v18  ;;  %v3204_v55 = vsel %vm3202_vm11, %v6615_v56, %v3199_v5  ;;  %vm6649_vm3 = vmmov %vm6648_vm0  ;;  %v3698_v33 = vmul.f32 %v6650_v35, %v5178_v21  ;;  %vm3742_vm1 = vcmask 97280  }
 0x322   : > { %v3569_v20 = vadd.f32 %v3563_v17, %v3539_v41  ;;  %3620 = vrot.lane.b32.xlu1 %v3609_v47, %s4677_s23  ;;  %v3180_v39 = vadd.f32 %v3174_v14, %v3150_v37  ;;  %v3669_v17 = vmul.f32 %v6647_v51, %v5187_v26  ;;  %v3791_v37 = vmul.f32 %v5353_v1, %v5187_v26 }
 0x323   : > { %v3121_v63 = vadd.f32 %v3115_v57, %v3091_v59 }
 0x324   : > { %v3599_v6 = vadd.f32 %v3593_v24, %v3569_v20  ;;  %v3201_v40 = vpop.permute.xlu1 %3200  ;;  %v3210_v47 = vadd.f32 %v3204_v55, %v3180_v39 }
 0x325   : > { %v3615_v31 = vpop.permute.xlu0 %3614  ;;  %v3151_v61 = vadd.f32 %v3145_v62, %v3121_v63  ;;  %v3205_v8 = vsel %vm3202_vm11, %v3199_v5, %v3201_v40  ;;  %vm6655_vm11 = vcmask 318464  }
 0x326   : > { %v3623_v23 = vsel %vm3622_vm8, %v3615_v31, %v6181_v22  ;;  %3648 = vrot.lane.b32.xlu1 %v3638_v28, %s4678_s29  ;;  %v6651_v28 = vld [vmem:[#allocation17_spill] sm:$0xff] }
 0x327   : > { %v3629_v53 = vadd.f32 %v3623_v23, %v3599_v6  ;;  %v3181_v29 = vadd.f32 %v3175_v45, %v3151_v61  ;;  %v3699_v6 = vmul.f32 %v6650_v35, %v5187_v26  ;;  %v3728_v2 = vmul.f32 %v6651_v28, %v5178_v21  ;;  %v6653_v45 = vld [vmem:[#allocation8_spill] sm:$0xff]  ;;  %v6661_v35 = vld [vmem:[#allocation18_spill] sm:$0xff] }
 0x328   : > { %v3229_v12 = vpop.permute.xlu1 %3228  ;;  %v3729_v63 = vmul.f32 %v6651_v28, %v5187_v26 }
 0x329   : > { %v6211_v25 = vpop.permute.xlu0 %3646  ;;  %v3211_v4 = vadd.f32 %v3205_v8, %v3181_v29  ;;  %v3234_v27 = vsel %vm6648_vm0, %v6618_v15, %v3229_v12 }
 0x32a   : > { %3650 = vrot.lane.b32.xlu1 %v3639_v30, %s4678_s29  ;;  %v3240_v5 = vadd.f32 %v3234_v27, %v3210_v47  ;;  %v6654_v30 = vld [vmem:[#allocation11_spill] sm:$0xff] }
 0x32b   : > { %v3763_v60 = vmul.f32 %v6653_v45, %v6654_v30  ;;  %v3821_v47 = vmul.f32 %v5363_v32, %v6654_v30 }
 0x32c   : > { %v3231_v43 = vpop.permute.xlu1 %3230 }
 0x32d   : > { %v3235_v58 = vsel %vm6649_vm3, %v3229_v12, %v3231_v43  ;;  %v3645_v41 = vpop.permute.xlu0 %3644  ;;  %vm6670_vm3 = vcmask 998400  }
 0x32e   : > { %v3241_v49 = vadd.f32 %v3235_v58, %v3211_v4  ;;  %v3653_v13 = vsel %vm3652_vm9, %v3645_v41, %v6211_v25  ;;  %3678 = vrot.lane.b32.xlu1 %v3668_v52, %s4679_s17  ;;  %v3792_v4 = vmul.f32 %v5353_v1, %v6654_v30  ;;  %v3820_v52 = vmul.f32 %v5363_v32, %v5187_v26 }
 0x32f   : > { %v6224_v56 = vadd.f32 %v3653_v13, %v3629_v53  ;;  %v3762_v53 = vmul.f32 %v6653_v45, %v5187_v26  ;;  %v6658_v13 = vld [vmem:[#allocation9_spill] sm:$0xff] }
 0x330   : > { %v3259_v50 = vpop.permute.xlu1 %3258 }
 0x331   : > { %v3264_v15 = vsel %vm3262_vm13, %v6622_v38, %v3259_v50 }
 0x332   : > { %v3270_v18 = vadd.f32 %v3264_v15, %v3240_v5  ;;  %3680 = vrot.lane.b32.xlu1 %v3669_v17, %s4679_s17  ;;  %v3849_v5 = vmul.f32 %v6658_v13, %v5187_v26  ;;  %s269_s17 = sand.u32 1, %s4580_s25  }
 0x334   : > { %v3261_v20 = vpop.permute.xlu1 %3260 }
 0x335   : > { %v3265_v57 = vsel %vm3262_vm13, %v3259_v50, %v3261_v20  ;;  %vm6657_vm13 = vcmask 310272  }
 0x336   : > { %v3271_v24 = vadd.f32 %v3265_v57, %v3241_v49  ;;  %3708 = vrot.lane.b32.xlu1 %v3698_v33, %s4680_s19  ;;  %vm6659_vm10 = vmmov %vm6657_vm13  ;;  %v3879_v33 = vmul.f32 %v6661_v35, %v5187_v26 }
 0x338   : > { %v3289_v59 = vpop.permute.xlu1 %3288 }
 0x339   : > { %v3294_v40 = vsel %vm3292_vm4, %v6626_v11, %v3289_v59 }
 0x33a   : > { %v3300_v38 = vadd.f32 %v3294_v40, %v3270_v18  ;;  %3710 = vrot.lane.b32.xlu1 %v3699_v6, %s4680_s19  ;;  %v3850_v18 = vmul.f32 %v6658_v13, %v6654_v30  ;;  %v3880_v6 = vmul.f32 %v6661_v35, %v6654_v30  ;;  %s4338_s19 = smul.u32 24, %s269_s17 }
 0x33c   : > { %v3291_v54 = vpop.permute.xlu1 %3290 }
 0x33d   : > { %v3295_v3 = vsel %vm3292_vm4, %v3289_v59, %v3291_v54  ;;  %vm6660_vm4 = vcmask 302080   ;;  %v6663_v54 = vld [vmem:[#allocation19_spill] sm:$0xff] }
 0x33e   : > { %v3301_v62 = vadd.f32 %v3295_v3, %v3271_v24  ;;  %3738 = vrot.lane.b32.xlu1 %v3728_v2, %s6652_s21  ;;  %v3909_v28 = vmul.f32 %v6663_v54, %v5187_v26 }
 0x340   : > { %v3319_v31 = vpop.permute.xlu1 %3318 }
 0x341   : > { %v3324_v0 = vsel %vm3322_vm12, %v5777_v16, %v3319_v31 }
 0x342   : > { %v3330_v11 = vadd.f32 %v3324_v0, %v3300_v38  ;;  %3740 = vrot.lane.b32.xlu1 %v3729_v63, %s6652_s21  ;;  %v6303_v0 = vpop.permute.xlu0 %3676  ;;  %s4530_s21 = sshll.u32 %s4686_s8, 4  ;;  %s4531_s21 = int_to_ptr.vmem [resolvable:$false] %s4530_s21 }
 0x344   : > { %v3321_v23 = vpop.permute.xlu1 %3320 }
 0x345   : > { %v3325_v21 = vsel %vm3322_vm12, %v3319_v31, %v3321_v23  ;;  %vm6656_vm12 = vmmov %vm6655_vm11  ;;  %v3910_v31 = vmul.f32 %v6663_v54, %v6654_v30  ;;  %v3939_v23 = vmul.f32 %v6611_v36, %v5187_v26 }
 0x346   : > { %v3331_v61 = vadd.f32 %v3325_v21, %v3301_v62  ;;  %3772 = vrot.lane.b32.xlu1 %v3762_v53, %s6584_s18 }
 0x348   : > { %v3349_v12 = vpop.permute.xlu1 %3348 }
 0x349   : > { %v3354_v14 = vsel %vm3352_vm5, %v6632_v34, %v3349_v12 }
 0x34a   : > { %v3360_v16 = vadd.f32 %v3354_v14, %v3330_v11  ;;  %3774 = vrot.lane.b32.xlu1 %v3763_v60, %s6584_s18  ;;  %s271_s18 = scalar_lea.vmem [#allocation3], %s4338_s19 }
 0x34c   : > { %v3351_v8 = vpop.permute.xlu1 %3350 }
 0x34d   : > { %v3355_v29 = vsel %vm3352_vm5, %v3349_v12, %v3351_v8  ;;  %vm6662_vm5 = vmmov %vm6660_vm4  ;;  %v6311_v12 = vpop.permute.xlu0 %3674 }
 0x34e   : > { %v3361_v55 = vadd.f32 %v3355_v29, %v3331_v61  ;;  %3801 = vrot.lane.b32.xlu1 %v3791_v37, %s6589_s20  ;;  %v3940_v61 = vmul.f32 %v6611_v36, %v6654_v30 }
 0x350   : > { %v3379_v39 = vpop.permute.xlu1 %3378 }
 0x351   : > { %v3384_v43 = vsel %vm6655_vm11, %v5831_v10, %v3379_v39  ;;  %v3707_v8 = vpop.permute.xlu0 %3706  ;;  %vm6671_vm11 = vmmov %vm6670_vm3 }
 0x352   : > { %v3390_v34 = vadd.f32 %v3384_v43, %v3360_v16  ;;  %3803 = vrot.lane.b32.xlu1 %v3792_v4, %s6589_s20  ;;  %s4132_s20 = sshll.u32 %s271_s18, 4  ;;  %s6372_s20 = int_to_ptr.vmem [resolvable:$true] %s4132_s20 }
 0x353   : > { %p4533_p0 = scmp.lt.s32.totalorder %s6372_s20, %s4531_s21 }
 0x354   : > { %v3381_v51 = vpop.permute.xlu1 %3380 }
 0x355   : > { %v3385_v27 = vsel %vm6656_vm12, %v3379_v39, %v3381_v51  ;;  %v3705_v36 = vpop.permute.xlu0 %3704  ;;  %vm3893_vm12 = vcmask 982016  }
 0x356   : > { %v3391_v58 = vadd.f32 %v3385_v27, %v3361_v55  ;;  %3830 = vrot.lane.b32.xlu1 %v3820_v52, %s6591_s9 }
 0x358   : > { %v3409_v41 = vpop.permute.xlu1 %3408 }
 0x359   : > { %v3414_v1 = vsel %vm6657_vm13, %v5863_v7, %v3409_v41  ;;  %v3737_v51 = vpop.permute.xlu0 %3736 }
 0x35a   : > { %v3420_v10 = vadd.f32 %v3414_v1, %v3390_v34  ;;  %3832 = vrot.lane.b32.xlu1 %v3821_v47, %s6591_s9  ;;  %s4340_s9 = smul.u32 384, %s4748_s28  ;;  %s4118_s28 = scalar_lea.sflag [#allocation4], %s269_s17 }
 0x35c   : > { %v3411_v49 = vpop.permute.xlu1 %3410  ;;  %s6370_s13 = scalar_lea.hbm %s6419_s7, %s4340_s9 }
 0x35d   : > { %v3415_v50 = vsel %vm6659_vm10, %v3409_v41, %v3411_v49  ;;  %v3735_v47 = vpop.permute.xlu0 %3734  ;;  %vm3923_vm10 = vcmask 973824  }
 0x35e   : > { %v3421_v17 = vadd.f32 %v3415_v50, %v3391_v58  ;;  %3859 = vrot.lane.b32.xlu1 %v3849_v5, %s4682_s14 }
 0x360   : > { %v3439_v15 = vpop.permute.xlu1 %3438 }
 0x361   : > { %v3444_v32 = vsel %vm6660_vm4, %v5895_v19, %v3439_v15  ;;  %v3771_v5 = vpop.permute.xlu0 %3770  ;;  %vm6673_vm4 = vmmov %vm6670_vm3 }
 0x362   : > { %v3450_v7 = vadd.f32 %v3444_v32, %v3420_v10  ;;  %3861 = vrot.lane.b32.xlu1 %v3850_v18, %s4682_s14 }
 0x364   : > { %v3441_v20 = vpop.permute.xlu1 %3440 }
 0x365   : > { %v3445_v57 = vsel %vm6662_vm5, %v3439_v15, %v3441_v20  ;;  %vm3953_vm5 = vcmask 965632  }
 0x366   : > { %v3451_v24 = vadd.f32 %v3445_v57, %v3421_v17  ;;  %3889 = vrot.lane.b32.xlu1 %v3879_v33, %s4683_s15 }
 0x368   : > { %v3469_v59 = vpop.permute.xlu1 %3468 }
 0x369   : > { %v3474_v40 = vsel %vm3472_vm14, %v5938_v46, %v3469_v59 }
 0x36a   : > { %v3480_v19 = vadd.f32 %v3474_v40, %v3450_v7  ;;  %3891 = vrot.lane.b32.xlu1 %v3880_v6, %s4683_s15 }
 0x36c   : > { %v3471_v38 = vpop.permute.xlu1 %3470 }
 0x36d   : > { %v3475_v2 = vsel %vm3472_vm14, %v3469_v59, %v3471_v38  ;;  %vm3682_vm14 = vcmask 113664  }
 0x36e   : > { %v3481_v3 = vadd.f32 %v3475_v2, %v3451_v24  ;;  %3919 = vrot.lane.b32.xlu1 %v3909_v28, %s6664_s22 }
 0x370   : > { %v3499_v62 = vpop.permute.xlu1 %3498 }
 0x371   : > { %v3504_v63 = vsel %vm3502_vm15, %v5993_v44, %v3499_v62 }
 0x372   : > { %v3510_v46 = vadd.f32 %v3504_v63, %v3480_v19  ;;  %3921 = vrot.lane.b32.xlu1 %v3910_v31, %s6664_s22  ;;  %s4532_s22 = scalar_lea.vmem %s4531_s21, 768 }
 0x374   : > { %v3501_v11 = vpop.permute.xlu1 %3500 }
 0x375   : > { %v3505_v45 = vsel %vm3502_vm15, %v3499_v62, %v3501_v11  ;;  %vm6665_vm15 = vcmask 1014784  }
 0x376   : > { %v3511_v53 = vadd.f32 %v3505_v45, %v3481_v3  ;;  %3949 = vrot.lane.b32.xlu1 %v3939_v23, %s4685_s16 }
 0x378   : > { %v3529_v21 = vpop.permute.xlu1 %3528 }
 0x379   : > { %v3534_v44 = vsel %vm3532_vm2, %v6049_v9, %v3529_v21 }
 0x37a   : > { %v3540_v60 = vadd.f32 %v3534_v44, %v3510_v46  ;;  %3951 = vrot.lane.b32.xlu1 %v3940_v61, %s4685_s16  ;;  %s4526_s16 = scalar_lea.vmem %s6372_s20, 384 }
 0x37b   : > { %p4527_p11 = scmp.ne.s32.totalorder %s6372_s20, %s4526_s16  ;;  %p4534_p1 = scmp.lt.s32.totalorder %s4532_s22, %s4526_s16 }
 0x37c   : > { %v3531_v14 = vpop.permute.xlu1 %3530 }
 0x37d   : > { %v3535_v26 = vsel %vm3532_vm2, %v3529_v21, %v3531_v14  ;;  %vm3712_vm2 = vcmask 105472   ;;  %v3683_v21 = vsel %vm3682_vm14, %v6311_v12, %v6303_v0  ;;  %p4528_p12 = pnand %p4527_p11, %p4765_p5  ;;  %p4535_p2 = por %p4534_p1, %p4533_p0 }
 0x37e   : > { %v3541_v16 = vadd.f32 %v3535_v26, %v3511_v53 }
 0x37f   : > { %p4529_p13 = pneg %p4528_p12 }
 0x380   : > { %v3559_v37 = vpop.permute.xlu1 %3558 }
 0x381   : > { %v3564_v29 = vsel %vm3562_vm6, %v6102_v48, %v3559_v37  ;;  %p4536_p3 = pnand %p4535_p2, %p4529_p13 }
 0x382   : > { %v3570_v55 = vadd.f32 %v3564_v29, %v3540_v60  ;;  %v3713_v60 = vsel %vm3712_vm2, %v3705_v36, %v3707_v8 }
 0x384   : > { %v3561_v39 = vpop.permute.xlu1 %3560 }
 0x385   : > { %v3565_v30 = vsel %vm3562_vm6, %v3559_v37, %v3561_v39  ;;  %vm6666_vm6 = vmmov %vm6665_vm15 }
 0x386   : > { %v3571_v4 = vadd.f32 %v3565_v30, %v3541_v16  ;;  %v3689_v16 = vadd.f32 %v3683_v21, %v6224_v56  ;;  %vm6669_vm0 = vmmov %vm6666_vm6 }
 0x388   : > { %v3589_v43 = vpop.permute.xlu1 %3588  ;;  %v3719_v30 = vadd.f32 %v3713_v60, %v3689_v16 }
 0x389   : > { %v3594_v9 = vsel %vm3592_vm7, %v6144_v42, %v3589_v43  ;;  %v3769_v42 = vpop.permute.xlu0 %3768 }
 0x38a   : > { %v3600_v34 = vadd.f32 %v3594_v9, %v3570_v55  ;;  %v3743_v55 = vsel %vm3742_vm1, %v3735_v47, %v3737_v51 }
 0x38b   : > { %v3749_v9 = vadd.f32 %v3743_v55, %v3719_v30 }
 0x38c   : > { %v3591_v52 = vpop.permute.xlu1 %3590 }
 0x38d   : > { %v3595_v27 = vsel %vm3592_vm7, %v3589_v43, %v3591_v52  ;;  %v3800_v7 = vpop.permute.xlu0 %3799  ;;  %vm6667_vm7 = vcmask 1006592  }
 0x38e   : > { %v3601_v58 = vadd.f32 %v3595_v27, %v3571_v4  ;;  %v3776_v4 = vsel %vm6666_vm6, %v3769_v42, %v3771_v5  ;;  %vm6672_vm13 = vmmov %vm6667_vm7 }
 0x390   : > { %v3619_v41 = vpop.permute.xlu1 %3618 }
 0x391   : > { %v3624_v48 = vsel %vm3622_vm8, %v6181_v22, %v3619_v41  ;;  %v3798_v33 = vpop.permute.xlu0 %3797 }
 0x392   : > { %v3630_v1 = vadd.f32 %v3624_v48, %v3600_v34 }
 0x394   : > { %v3621_v10 = vpop.permute.xlu1 %3620 }
 0x395   : > { %v3625_v49 = vsel %vm3622_vm8, %v3619_v41, %v3621_v10  ;;  %v3829_v24 = vpop.permute.xlu0 %3828  ;;  %vm6668_vm8 = vmmov %vm6667_vm7 }
 0x396   : > { %v3631_v13 = vadd.f32 %v3625_v49, %v3601_v58  ;;  %v3805_v52 = vsel %vm6668_vm8, %v3798_v33, %v3800_v7  ;;  %v3782_v58 = vadd.f32 %v3776_v4, %v3749_v9 }
 0x398   : > { %v3649_v50 = vpop.permute.xlu1 %3648 }
 0x399   : > { %v3827_v6 = vpop.permute.xlu0 %3826  ;;  %v3654_v23 = vsel %vm3652_vm9, %v6211_v25, %v3649_v50 }
 0x39a   : > { %v3660_v61 = vadd.f32 %v3654_v23, %v3630_v1  ;;  %v3834_v1 = vsel %vm6671_vm11, %v3827_v6, %v3829_v24 }
 0x39c   : > { %v3651_v17 = vpop.permute.xlu1 %3650 }
 0x39d   : > { %v3655_v15 = vsel %vm3652_vm9, %v3649_v50, %v3651_v17  ;;  %v3858_v19 = vpop.permute.xlu0 %3857  ;;  %vm3863_vm9 = vcmask 990208  }
 0x39e   : > { %v3661_v18 = vadd.f32 %v3655_v15, %v3631_v13 }
 0x3a0   : > { %v3679_v32 = vpop.permute.xlu1 %3678 }
 0x3a1   : > { %v3856_v28 = vpop.permute.xlu0 %3855  ;;  %v3684_v53 = vsel %vm3682_vm14, %v6303_v0, %v3679_v32 }
 0x3a2   : > { %v3690_v14 = vadd.f32 %v3684_v53, %v3660_v61  ;;  %v3864_v42 = vsel %vm3863_vm9, %v3856_v28, %v3858_v19  ;;  %v3963_v61 = vld [vmem:[%s6417_s5] sm:$0xff] }
 0x3a4   : > { %v3681_v20 = vpop.permute.xlu1 %3680 }
 0x3a5   : > { %v3888_v3 = vpop.permute.xlu0 %3887  ;;  %v3685_v29 = vsel %vm3682_vm14, %v3679_v32, %v3681_v20  ;;  %vm6674_vm14 = vcmask 64512  }
 0x3a6   : > { %v3691_v43 = vadd.f32 %v3685_v29, %v3661_v18 }
 0x3a8   : > { %v3709_v35 = vpop.permute.xlu1 %3708 }
 0x3a9   : > { %v3886_v63 = vpop.permute.xlu0 %3885  ;;  %v3714_v44 = vsel %vm3712_vm2, %v3707_v8, %v3709_v35 }
 0x3aa   : > { %v3720_v39 = vadd.f32 %v3714_v44, %v3690_v14 }
 0x3ac   : > { %v3711_v57 = vpop.permute.xlu1 %3710 }
 0x3ad   : > { %v3918_v11 = vpop.permute.xlu0 %3917  ;;  %v3715_v0 = vsel %vm3712_vm2, %v3709_v35, %v3711_v57  ;;  %v3894_v35 = vsel %vm3893_vm12, %v3886_v63, %v3888_v3  ;;  %vm6675_vm2 = vmmov %vm6674_vm14 }
 0x3ae   : > { %v3721_v27 = vadd.f32 %v3715_v0, %v3691_v43 }
 0x3b0   : > { %v3739_v22 = vpop.permute.xlu1 %3738 }
 0x3b1   : > { %v3916_v37 = vpop.permute.xlu0 %3915  ;;  %v3744_v25 = vsel %vm3742_vm1, %v3737_v51, %v3739_v22 }
 0x3b2   : > { %v3750_v8 = vadd.f32 %v3744_v25, %v3720_v39 }
 0x3b4   : > { %v3741_v59 = vpop.permute.xlu1 %3740 }
 0x3b5   : > { %v3745_v56 = vsel %vm3742_vm1, %v3739_v22, %v3741_v59  ;;  %v3948_v41 = vpop.permute.xlu0 %3947 }
 0x3b6   : > { %v3751_v10 = vadd.f32 %v3745_v56, %v3721_v27 }
 0x3b8   : > { %v3773_v40 = vpop.permute.xlu1 %3772 }
 0x3b9   : > { %v3777_v12 = vsel %vm6665_vm15, %v3771_v5, %v3773_v40  ;;  %v3811_v5 = vadd.f32 %v3805_v52, %v3782_v58  ;;  %v3946_v59 = vpop.permute.xlu0 %3945 }
 0x3ba   : > { %v3783_v51 = vadd.f32 %v3777_v12, %v3750_v8 }
 0x3bb   : > { %v3840_v32 = vadd.f32 %v3834_v1, %v3811_v5 }
 0x3bc   : > { %v3775_v38 = vpop.permute.xlu1 %3774 }
 0x3bd   : > { %v3778_v47 = vsel %vm6669_vm0, %v3773_v40, %v3775_v38  ;;  %v3870_v22 = vadd.f32 %v3864_v42, %v3840_v32  ;;  %v3968_v16 = vpop.permute.xlu0 %3967 }
 0x3be   : > { %v3784_v15 = vadd.f32 %v3778_v47, %v3751_v10 }
 0x3bf   : > { %v3900_v28 = vadd.f32 %v3894_v35, %v3870_v22 }
 0x3c0   : > { %v3802_v54 = vpop.permute.xlu1 %3801 }
 0x3c1   : > { %v3806_v34 = vsel %vm6667_vm7, %v3800_v7, %v3802_v54 }
 0x3c2   : > { %v3812_v49 = vadd.f32 %v3806_v34, %v3783_v51 }
 0x3c4   : > { %v3804_v2 = vpop.permute.xlu1 %3803 }
 0x3c5   : > { %v3807_v50 = vsel %vm6672_vm13, %v3802_v54, %v3804_v2 }
 0x3c6   : > { %v3813_v33 = vadd.f32 %v3807_v50, %v3784_v15 }
 0x3c8   : > { %v3831_v62 = vpop.permute.xlu1 %3830 }
 0x3c9   : > { %v3835_v48 = vsel %vm6670_vm3, %v3829_v24, %v3831_v62 }
 0x3ca   : > { %v3841_v18 = vadd.f32 %v3835_v48, %v3812_v49 }
 0x3cc   : > { %v3833_v31 = vpop.permute.xlu1 %3832 }
 0x3cd   : > { %v3836_v7 = vsel %vm6673_vm4, %v3831_v62, %v3833_v31  ;;  %v3954_v62 = vsel %vm3953_vm5, %v3946_v59, %v3948_v41 }
 0x3ce   : > { %v3842_v38 = vadd.f32 %v3836_v7, %v3813_v33 }
 0x3d0   : > { %v3860_v46 = vpop.permute.xlu1 %3859 }
 0x3d1   : > { %v3865_v17 = vsel %vm3863_vm9, %v3858_v19, %v3860_v46  ;;  %v3924_v19 = vsel %vm3923_vm10, %v3916_v37, %v3918_v11 }
 0x3d2   : > { %v3871_v57 = vadd.f32 %v3865_v17, %v3841_v18  ;;  %v3930_v23 = vadd.f32 %v3924_v19, %v3900_v28 }
 0x3d4   : > { %v3862_v45 = vpop.permute.xlu1 %3861 }
 0x3d5   : > { %v3866_v6 = vsel %vm3863_vm9, %v3860_v46, %v3862_v45 }
 0x3d8   : > { %v3890_v26 = vpop.permute.xlu1 %3889 }
 0x3d9   : > { %v3895_v20 = vsel %vm3893_vm12, %v3888_v3, %v3890_v26  ;;  %v3872_v3 = vadd.f32 %v3866_v6, %v3842_v38 }
 0x3da   : > { %v3901_v54 = vadd.f32 %v3895_v20, %v3871_v57 }
 0x3dc   : > { %v3892_v36 = vpop.permute.xlu1 %3891 }
 0x3dd   : > { %v3896_v2 = vsel %vm3893_vm12, %v3890_v26, %v3892_v36 }
 0x3de   : > { %v3902_v45 = vadd.f32 %v3896_v2, %v3872_v3 }
 0x3e0   : > { %v3920_v13 = vpop.permute.xlu1 %3919 }
 0x3e1   : > { %v3925_v40 = vsel %vm3923_vm10, %v3918_v11, %v3920_v13  ;;  %v3960_v11 = vadd.f32 %v3954_v62, %v3930_v23 }
 0x3e2   : > { %v3931_v31 = vadd.f32 %v3925_v40, %v3901_v54 }
 0x3e4   : > { %v3922_v24 = vpop.permute.xlu1 %3921 }
 0x3e5   : > { %v3926_v53 = vsel %vm3923_vm10, %v3920_v13, %v3922_v24 }
 0x3e6   : > { %v3932_v44 = vadd.f32 %v3926_v53, %v3902_v45 }
 0x3e8   : > { %v3950_v63 = vpop.permute.xlu1 %3949 }
 0x3e9   : > { %v3955_v46 = vsel %vm3953_vm5, %v3948_v41, %v3950_v63 }
 0x3ea   : > { %v3961_v21 = vadd.f32 %v3955_v46, %v3931_v31 }
 0x3ec   : > { %3973 = vmatprep.subr.mxu1 %v3961_v21  ;;  %v3952_v60 = vpop.permute.xlu1 %3951 }
 0x3ed   : > { %v3956_v14 = vsel %vm3953_vm5, %v3950_v63, %v3952_v60  ;;  %3974 = vmatpush1.msra.mxu1 %v3960_v11 }
 0x3ee   : > { %v3962_v26 = vadd.f32 %v3956_v14, %v3932_v44  ;;  %4231 = vmatmul.mubr.msk.f32.vlgmr.msra.gmra.mrb[10].mxu1 %vm6674_vm14, %v3963_v61 }
 0x3f0   : > { %4302 = vmatpush3.msra.mxu0 %v3962_v26 }
 0x3f1   : > { %4304 = vmatmul.mubr.msk.f32.vlgmr.msra.gmra.mrb[12].mxu0 %vm6675_vm2, %v3963_v61 }
 0x4c1   : > { %v4039_v37 = vpop.f32.mrb[10].mxu1 }
 0x4c2   : > { %v4040_v29 = vadd.f32 %v4039_v37, %v3968_v16  ;;  %v4041_v25 = vpop.f32.mrb[11].mxu1 }
 0x4c3   : > { %v4042_v55 = vadd.f32 %v4041_v25, %v3968_v16 }
 0x4c4   : > { %4114 = vst [vmem:[%s271_s18] sm:$0xff] %v4040_v29  ;;  %v4110_v39 = vpop.f32.mrb[12].mxu0 }
 0x4c5   : > { %4115 = vst [vmem:[%s271_s18 + $0x8] sm:$0xff] %v4042_v55  ;;  %v4111_v30 = vadd.f32 %v4110_v39, %v3968_v16  ;;  %v4305_v0 = vpop.f32.mrb[13].mxu0 }
 0x4c7   : > { %4116 = vst [vmem:[%s271_s18 + $0x10] sm:$0xff] %v4111_v30 }
 0x4c8   : > { %4539 = shalt.err (!%p4536_p3)
}
 0x4c9   : > { %s4540_s23 = scalar_lea.hbm %s6370_s13, 384  ;;  %s4544_s19 = scalar_lea.hbm %s6419_s7, 768 }
 0x4ca   : > { %p4541_p4 = scmp.ne.s32.totalorder %s6370_s13, %s4540_s23  ;;  %p4545_p9 = scmp.lt.u32.totalorder %s6370_s13, %s6419_s7 }
 0x4cb   : > { %p4546_p10 = scmp.lt.u32.totalorder %s4544_s19, %s4540_s23  ;;  %p4548_p12 = scmp.lt.u32.totalorder %s4540_s23, %s6370_s13 }
 0x4cc   : > { %p4542_p7 = pnand %p4541_p4, %p4765_p5 }
 0x4cd   : > { %p4547_p11 = por %p4546_p10, %p4545_p9 }
 0x4ce   : > { %p4543_p8 = pneg %p4542_p7 }
 0x4cf   : > { %p4549_p13 = por %p4548_p12, %p4547_p11 }
 0x4d1   : > { %p4550_p0 = pnand %p4549_p13, %p4543_p8 }
 0x4d3   : > { %4553 = shalt.err (!%p4550_p0)
}
 0x4d4   : > { %4341 = dma.vmem_to_hbm [thread:$0]  (%p4765_p5), %s6372_s20, 384, %s6370_s13, %s4118_s28  }
 0x4d5 PF: > { %p4347_p1 = scmp.ge.s32.totalorder %s4588_s27, 2  ;;  %s4144_s14 = sand.u32 1, %s4576_s24  }
 0x4d6   : > { %s4145_s15 = scalar_lea.sflag [#allocation4], %s4144_s14 }
 0x4d7   : > { %p4344_p2 = pnand %p4347_p1, %p4769_p6 }
 0x4d9   : > { %4571 = dma.done.wait (!%p4344_p2), %s4145_s15, 384  }
 0x4da   : > { %4573 = vsyncadd (!%p4344_p2), %s4145_s15, 4294966912  ;;  %p17_p3 = scmp.ge.s32.totalorder %s4752_s30, 4   ;;  %s6676_s24 = smov %s4580_s25 }
 0x4db   : > { %s6677_s25 = smov %s4584_s26  ;;  %s6678_s26 = smov %s4763_s10 }
 0x4dc   : > { %s6679_s27 = smov %s4752_s30  ;;  %19 = sbr.rel (!%p17_p3) target bundleno = 3 (0x3), region = 91 }
 0x4e3   :  { %4150 = vsyncpa [#allocation4], 1 }
 0x4e4   :  { %4152 = vsyncpa [#allocation4 + $0x1], 1 }

</bundles_post_ra>
